<compile_context>
chip_gen: v7x
topology: tpu7x:2x2x1
jax: 0.10.0
libtpu: 0.0.40
codegen_flags: <defaults>
</compile_context>

<pallas_src>
import jax
import jax.numpy as jnp
import numpy as np
from jax import lax
from jax.experimental import pallas as pl
from jax.experimental.pallas import tpu as pltpu

B = 2                                   # batch
C_IN, H_IN, W_IN = 1, 16, 16            # feature_shape
KS = (2, 3)                             # convs_kernel_size_list
COUT = (5, 10)                          # convs_out_list
OUT_DIM = 10                            # out_dim_size

H1C = H_IN - KS[0] + 1                  # 15  conv1 output spatial
H1P = H1C // 2                          # 7   pool1 output spatial
H2C = H1P - KS[1] + 1                   # 5   conv2 output spatial
H2P = H2C // 2                          # 2   pool2 output spatial
FC_IN = COUT[1] * H2P * H2P             # 40  == MNIST_CNN._compute_out_channels()

HW0 = H_IN * W_IN                       # 256 flattened input rows per image
HW1 = H1P * H1P                         # 49  flattened pool1 rows per image
# Rows computable by the shifted-window trick (output row r reads input rows
# r + di*W + dj).  Valid rows (i < Hout, j < Wout) are a subset; the rest is
# wrap-around garbage that no later read ever touches (asserted below).
N_C1 = HW0 - ((KS[0] - 1) * W_IN + (KS[0] - 1))   # 239 conv1 rows per image
N_C2 = HW1 - ((KS[1] - 1) * H1P + (KS[1] - 1))    # 33  conv2 rows per image
N_TAP1 = KS[0] * KS[0]                  # 4
N_TAP2 = KS[1] * KS[1]                  # 9
IM2_W = N_TAP2 * COUT[0]                # 45  im2col width for conv2


def _num_grid_steps():
    """v7x has 2 TensorCores/chip: split the batch across them.  v5e/v6e have
    a single TC, so one grid step for the whole batch avoids ~0.35us/step of
    pipeline prologue/epilogue on this us-scale kernel."""
    try:
        kind = jax.devices()[0].device_kind.lower()
    except Exception:
        return 1
    if "v7" in kind and B % 2 == 0:
        return 2
    return 1


NUM_STEPS = _num_grid_steps()
IPB = B // NUM_STEPS                    # images per grid step (sublane-stacked)

# Per-step stacked-slab sizes.
N1 = (IPB - 1) * HW0 + N_C1             # conv1 rows computed per step
N2 = (IPB - 1) * HW1 + N_C2             # conv2 rows computed per step

# ---- Static sanity checks for the wrap-row-garbage scheme (review item) ----
# conv1 valid rows only read x rows of the same image:
assert (N_C1 - 1) + (KS[0] - 1) * (W_IN + 1) < HW0
# pool1's deepest conv1 row read per image stays inside the valid conv1 rows:
assert 2 * (H1P - 1) * W_IN + (W_IN + 1) + 2 * (H1P - 1) < N_C1
# conv2 im2col's deepest p1 row read stays inside the stacked p1 slab:
assert (N2 - 1) + (KS[1] - 1) * (H1P + 1) < IPB * HW1
# pool2's deepest conv2 row read stays inside the valid conv2 rows:
assert (2 * H2P - 1) * H1P + (2 * H2P - 1) < N_C2


def mnist_cnn_kernel(x_ref, w1_ref, b1_ref, w2_ref, b2_ref, wfc_ref, bfc_ref,
                     out_ref, c1_ref, p1_ref, im2_ref, c2_ref, fcin_ref):
    # --------- conv1: C_IN == 1 -> per-tap VPU broadcast FMAs (no MXU) ------
    tap1_off = [di * W_IN + dj for di in range(KS[0]) for dj in range(KS[0])]
    for b in range(IPB):
        xb = b * HW0
        acc = None
        for t, off in enumerate(tap1_off):
            col = x_ref[pl.ds(xb + off, N_C1), :]               # (N_C1, 1)
            tap = col * w1_ref[pl.ds(t, 1), :]                   # (N_C1, C1)
            acc = tap if acc is None else acc + tap
        c1_ref[pl.ds(xb, N_C1), :] = acc + b1_ref[...]           # bias once

    # --------- maxpool(2) + ReLU -> flat (HW1, C1) rows per image -----------
    for b in range(IPB):
        cb, pb = b * HW0, b * HW1
        for ip in range(H1P):
            base = cb + 2 * ip * W_IN
            r00 = c1_ref[pl.ds(base, H1P, stride=2), :]
            r01 = c1_ref[pl.ds(base + 1, H1P, stride=2), :]
            r10 = c1_ref[pl.ds(base + W_IN, H1P, stride=2), :]
            r11 = c1_ref[pl.ds(base + W_IN + 1, H1P, stride=2), :]
            pooled = jnp.maximum(jnp.maximum(r00, r01), jnp.maximum(r10, r11))
            p1_ref[pl.ds(pb + ip * H1P, H1P), :] = jnp.maximum(pooled, 0.0)

    # --------- conv2: ONE fat im2col matmul (N2, 45) @ (45, 10) -------------
    for di in range(KS[1]):
        for dj in range(KS[1]):
            t = di * KS[1] + dj
            im2_ref[:, pl.ds(t * COUT[0], COUT[0])] = (
                p1_ref[pl.ds(di * H1P + dj, N2), :])
    c2_ref[...] = (jnp.dot(im2_ref[...], w2_ref[...],
                           preferred_element_type=jnp.float32) + b2_ref[...])

    # --------- maxpool(2) + ReLU -> (IPB, 40) FC feature slab ---------------
    for b in range(IPB):
        for ip in range(H2P):
            for jp in range(H2P):
                r0 = b * HW1 + (2 * ip) * H1P + 2 * jp
                top = c2_ref[pl.ds(r0, 2), :]            # rows (2ip, 2jp..+1)
                bot = c2_ref[pl.ds(r0 + H1P, 2), :]      # rows (2ip+1, ...)
                feat = jnp.max(jnp.maximum(top, bot), axis=0, keepdims=True)
                feat = jnp.maximum(feat, 0.0)            # ReLU, (1, C2)
                fcin_ref[pl.ds(b, 1),
                         pl.ds((ip * H2P + jp) * COUT[1], COUT[1])] = feat

    # --------- FC: single (IPB, 40) @ (40, 10) matmul ------------------------
    logits = (jnp.dot(fcin_ref[...], wfc_ref[...],
                      preferred_element_type=jnp.float32) + bfc_ref[...])

    # nn.Softmax(dim=-1), numerically stable; reciprocal on the EUP.
    m = jnp.max(logits, axis=-1, keepdims=True)
    e = jnp.exp(logits - m)
    s = jnp.sum(e, axis=-1, keepdims=True)
    proba = e * pl.reciprocal(s, approx=True)

    # Merged output (one DMA per step): lanes [0,10) = logit, [10,20) = proba.
    out_ref[:, :, pl.ds(0, OUT_DIM)] = logits.reshape(1, IPB, OUT_DIM)
    out_ref[:, :, pl.ds(OUT_DIM, OUT_DIM)] = proba.reshape(1, IPB, OUT_DIM)


def prepare_params(params):
    """One-time weight re-layout (outside the per-call jitted wrapper)."""
    w1, b1, w2, b2, wfc, bfc = params
    # conv1 taps: (C1, Cin, k, k) -> (k, k, Cin, C1) -> (k*k*Cin, C1) = (4, 5)
    w1_taps = jnp.transpose(w1, (2, 3, 1, 0)).reshape(N_TAP1 * C_IN, COUT[0])
    # conv2 im2col: (C2, C1, 3, 3) -> (3, 3, C1, C2) -> (45, 10); row = t*5+cin
    w2_im2 = jnp.transpose(w2, (2, 3, 1, 0)).reshape(IM2_W, COUT[1])
    # PyTorch flatten order is (C, H, W) -> rearrange fc weight to (H, W, C, O)
    # then flatten to (40, 10) matching the (ip, jp, c) feature layout.
    wfc_r = jnp.transpose(wfc.reshape(OUT_DIM, COUT[1], H2P, H2P),
                          (2, 3, 1, 0)).reshape(FC_IN, OUT_DIM)
    return (w1_taps, b1.reshape(1, COUT[0]),
            w2_im2, b2.reshape(1, COUT[1]),
            wfc_r, bfc.reshape(1, OUT_DIM))


@jax.jit
def mnist_cnn_forward(x_nchw, prepped):
    w1t, b1r, w2c, b2r, wfcr, bfcr = prepped
    # NCHW with C_IN == 1: flattening to (B*H*W, 1) is a free reshape.
    x_flat = x_nchw.reshape(B * HW0, 1)

    out = pl.pallas_call(
        mnist_cnn_kernel,
        out_shape=jax.ShapeDtypeStruct((NUM_STEPS, IPB, 2 * OUT_DIM),
                                       jnp.float32),
        grid=(NUM_STEPS,),
        in_specs=[
            pl.BlockSpec((IPB * HW0, 1), lambda s: (s, 0)),            # x (per step)
            pl.BlockSpec((N_TAP1, COUT[0]), lambda s: (0, 0)),         # w1 taps
            pl.BlockSpec((1, COUT[0]), lambda s: (0, 0)),              # b1
            pl.BlockSpec((IM2_W, COUT[1]), lambda s: (0, 0)),          # w2 im2col
            pl.BlockSpec((1, COUT[1]), lambda s: (0, 0)),              # b2
            pl.BlockSpec((FC_IN, OUT_DIM), lambda s: (0, 0)),          # fc weight
            pl.BlockSpec((1, OUT_DIM), lambda s: (0, 0)),              # fc bias
        ],
        out_specs=pl.BlockSpec((1, IPB, 2 * OUT_DIM), lambda s: (s, 0, 0)),
        scratch_shapes=[
            pltpu.VMEM((N1, COUT[0]), jnp.float32),          # conv1 out (flat rows)
            pltpu.VMEM((IPB * HW1, COUT[0]), jnp.float32),   # pool1 + relu
            pltpu.VMEM((N2, IM2_W), jnp.float32),            # conv2 im2col patches
            pltpu.VMEM((N2, COUT[1]), jnp.float32),          # conv2 out (flat rows)
            pltpu.VMEM((IPB, FC_IN), jnp.float32),           # pooled+flattened fc in
        ],
        compiler_params=pltpu.CompilerParams(
            dimension_semantics=("parallel",)),              # batch across TCs on v7x
    )(x_flat, w1t, b1r, w2c, b2r, wfcr, bfcr)

    out2 = out.reshape(B, 2 * OUT_DIM)
    return out2[:, :OUT_DIM], out2[:, OUT_DIM:]


def reference_forward(x_nchw, params):
    """Pure-JAX (XLA) reference of the PyTorch forward, NCHW semantics."""
    w1, b1, w2, b2, wfc, bfc = params

    def conv(x, w, b):
        y = lax.conv_general_dilated(
            x, w, window_strides=(1, 1), padding="VALID",
            dimension_numbers=("NCHW", "OIHW", "NCHW"),
            precision=lax.Precision.HIGHEST)
        return y + b[None, :, None, None]

    def maxpool2(x):   # MaxPool2d(2), floor mode
        b_, c_, h_, w_ = x.shape
        hh, ww = h_ // 2, w_ // 2
        return x[:, :, :hh * 2, :ww * 2].reshape(b_, c_, hh, 2, ww, 2).max(axis=(3, 5))

    out = x_nchw
    for w, b in ((w1, b1), (w2, b2)):
        out = jnp.maximum(maxpool2(conv(out, w, b)), 0.0)
    flat = out.reshape(out.shape[0], -1)
    logit = jnp.einsum("bi,oi->bo", flat, wfc,
                       precision=lax.Precision.HIGHEST) + bfc
    proba = jax.nn.softmax(logit, axis=-1)
    return logit, proba


def init_params(key):
    """Deterministic synthetic parameters with PyTorch shapes (OIHW / (out,in))."""
    k = jax.random.split(key, 6)
    w1 = 0.30 * jax.random.normal(k[0], (COUT[0], C_IN, KS[0], KS[0]), jnp.float32)
    b1 = 0.10 * jax.random.normal(k[1], (COUT[0],), jnp.float32)
    w2 = 0.15 * jax.random.normal(k[2], (COUT[1], COUT[0], KS[1], KS[1]), jnp.float32)
    b2 = 0.10 * jax.random.normal(k[3], (COUT[1],), jnp.float32)
    wfc = 0.15 * jax.random.normal(k[4], (OUT_DIM, FC_IN), jnp.float32)
    bfc = 0.10 * jax.random.normal(k[5], (OUT_DIM,), jnp.float32)
    return (w1, b1, w2, b2, wfc, bfc)


if __name__ == "__main__":
    root = jax.random.PRNGKey(0)
    pkey, xkey = jax.random.split(root)
    params = init_params(pkey)
    prepped = prepare_params(params)        # one-time layout prep (not per call)
    x = jax.random.normal(xkey, (B, C_IN, H_IN, W_IN), jnp.float32)

    logit, proba = jax.block_until_ready(mnist_cnn_forward(x, prepped))

    ref_logit, ref_proba = reference_forward(x, params)
    assert logit.shape == (B, OUT_DIM) and proba.shape == (B, OUT_DIM)
    np.testing.assert_allclose(np.asarray(logit), np.asarray(ref_logit),
                               rtol=2e-3, atol=2e-3)
    np.testing.assert_allclose(np.asarray(proba), np.asarray(ref_proba),
                               rtol=2e-3, atol=2e-3)
    print("KERNEL_OK")
</pallas_src>

<mosaic_0001>
module attributes {stable_mosaic.version = 11 : i64} {
  func.func @mnist_cnn_kernel(%arg0: i32, %arg1: memref<512x1xf32, #tpu.memory_space<vmem>>, %arg2: memref<4x5xf32, #tpu.memory_space<vmem>>, %arg3: memref<1x5xf32, #tpu.memory_space<vmem>>, %arg4: memref<45x10xf32, #tpu.memory_space<vmem>>, %arg5: memref<1x10xf32, #tpu.memory_space<vmem>>, %arg6: memref<40x10xf32, #tpu.memory_space<vmem>>, %arg7: memref<1x10xf32, #tpu.memory_space<vmem>>, %arg8: memref<1x2x20xf32, #tpu.memory_space<vmem>>, %arg9: memref<495x5xf32, #tpu.memory_space<vmem>>, %arg10: memref<98x5xf32, #tpu.memory_space<vmem>>, %arg11: memref<82x45xf32, #tpu.memory_space<vmem>>, %arg12: memref<82x10xf32, #tpu.memory_space<vmem>>, %arg13: memref<2x40xf32, #tpu.memory_space<vmem>>) attributes {dimension_semantics = [#tpu.dimension_semantics<parallel>], iteration_bounds = array<i64: 1>, scalar_prefetch = 0 : i64, scratch_operands = 5 : i64, tpu.core_type = #tpu.core_type<tc>, window_params = [{transform_indices = @transform_0, window_bounds = array<i64: 512, 1>}, {pipeline_mode = #tpu.pipeline_mode<synchronous>, transform_indices = @transform_1, window_bounds = array<i64: 4, 5>}, {pipeline_mode = #tpu.pipeline_mode<synchronous>, transform_indices = @transform_2, window_bounds = array<i64: 1, 5>}, {pipeline_mode = #tpu.pipeline_mode<synchronous>, transform_indices = @transform_3, window_bounds = array<i64: 45, 10>}, {pipeline_mode = #tpu.pipeline_mode<synchronous>, transform_indices = @transform_4, window_bounds = array<i64: 1, 10>}, {pipeline_mode = #tpu.pipeline_mode<synchronous>, transform_indices = @transform_5, window_bounds = array<i64: 40, 10>}, {pipeline_mode = #tpu.pipeline_mode<synchronous>, transform_indices = @transform_6, window_bounds = array<i64: 1, 10>}, {transform_indices = @transform_7, window_bounds = array<i64: 1, 2, 20>}]} {
    %c0 = arith.constant 0 : index
    %c0_0 = arith.constant 0 : index
    %0 = vector.load %arg1[%c0, %c0_0] : memref<512x1xf32, #tpu.memory_space<vmem>>, vector<239x1xf32>
    %c0_1 = arith.constant 0 : index
    %c0_2 = arith.constant 0 : index
    %1 = vector.load %arg2[%c0_1, %c0_2] : memref<4x5xf32, #tpu.memory_space<vmem>>, vector<1x5xf32>
    %2 = vector.broadcast %0 : vector<239x1xf32> to vector<239x5xf32>
    %3 = vector.broadcast %1 : vector<1x5xf32> to vector<239x5xf32>
    %4 = arith.mulf %2, %3 : vector<239x5xf32>
    %c1 = arith.constant 1 : index
    %c0_3 = arith.constant 0 : index
    %5 = vector.load %arg1[%c1, %c0_3] : memref<512x1xf32, #tpu.memory_space<vmem>>, vector<239x1xf32>
    %c1_4 = arith.constant 1 : index
    %c0_5 = arith.constant 0 : index
    %6 = vector.load %arg2[%c1_4, %c0_5] : memref<4x5xf32, #tpu.memory_space<vmem>>, vector<1x5xf32>
    %7 = vector.broadcast %5 : vector<239x1xf32> to vector<239x5xf32>
    %8 = vector.broadcast %6 : vector<1x5xf32> to vector<239x5xf32>
    %9 = arith.mulf %7, %8 : vector<239x5xf32>
    %10 = arith.addf %4, %9 : vector<239x5xf32>
    %c16 = arith.constant 16 : index
    %c0_6 = arith.constant 0 : index
    %11 = vector.load %arg1[%c16, %c0_6] : memref<512x1xf32, #tpu.memory_space<vmem>>, vector<239x1xf32>
    %c2 = arith.constant 2 : index
    %c0_7 = arith.constant 0 : index
    %12 = vector.load %arg2[%c2, %c0_7] : memref<4x5xf32, #tpu.memory_space<vmem>>, vector<1x5xf32>
    %13 = vector.broadcast %11 : vector<239x1xf32> to vector<239x5xf32>
    %14 = vector.broadcast %12 : vector<1x5xf32> to vector<239x5xf32>
    %15 = arith.mulf %13, %14 : vector<239x5xf32>
    %16 = arith.addf %10, %15 : vector<239x5xf32>
    %c17 = arith.constant 17 : index
    %c0_8 = arith.constant 0 : index
    %17 = vector.load %arg1[%c17, %c0_8] : memref<512x1xf32, #tpu.memory_space<vmem>>, vector<239x1xf32>
    %c3 = arith.constant 3 : index
    %c0_9 = arith.constant 0 : index
    %18 = vector.load %arg2[%c3, %c0_9] : memref<4x5xf32, #tpu.memory_space<vmem>>, vector<1x5xf32>
    %19 = vector.broadcast %17 : vector<239x1xf32> to vector<239x5xf32>
    %20 = vector.broadcast %18 : vector<1x5xf32> to vector<239x5xf32>
    %21 = arith.mulf %19, %20 : vector<239x5xf32>
    %22 = arith.addf %16, %21 : vector<239x5xf32>
    %c0_10 = arith.constant 0 : index
    %c0_11 = arith.constant 0 : index
    %23 = vector.load %arg3[%c0_10, %c0_11] : memref<1x5xf32, #tpu.memory_space<vmem>>, vector<1x5xf32>
    %24 = vector.broadcast %23 : vector<1x5xf32> to vector<239x5xf32>
    %25 = arith.addf %22, %24 : vector<239x5xf32>
    %c0_12 = arith.constant 0 : index
    %c0_13 = arith.constant 0 : index
    %26 = vector.load %arg9[%c0_12, %c0_13] : memref<495x5xf32, #tpu.memory_space<vmem>>, vector<239x5xf32>
    tpu.vector_store %arg9[%c0_12, %c0_13], %25 {strides = array<i32>} : memref<495x5xf32, #tpu.memory_space<vmem>>, vector<239x5xf32>,
    %c256 = arith.constant 256 : index
    %c0_14 = arith.constant 0 : index
    %27 = vector.load %arg1[%c256, %c0_14] : memref<512x1xf32, #tpu.memory_space<vmem>>, vector<239x1xf32>
    %c0_15 = arith.constant 0 : index
    %c0_16 = arith.constant 0 : index
    %28 = vector.load %arg2[%c0_15, %c0_16] : memref<4x5xf32, #tpu.memory_space<vmem>>, vector<1x5xf32>
    %29 = vector.broadcast %27 : vector<239x1xf32> to vector<239x5xf32>
    %30 = vector.broadcast %28 : vector<1x5xf32> to vector<239x5xf32>
    %31 = arith.mulf %29, %30 : vector<239x5xf32>
    %c257 = arith.constant 257 : index
    %c0_17 = arith.constant 0 : index
    %32 = vector.load %arg1[%c257, %c0_17] : memref<512x1xf32, #tpu.memory_space<vmem>>, vector<239x1xf32>
    %c1_18 = arith.constant 1 : index
    %c0_19 = arith.constant 0 : index
    %33 = vector.load %arg2[%c1_18, %c0_19] : memref<4x5xf32, #tpu.memory_space<vmem>>, vector<1x5xf32>
    %34 = vector.broadcast %32 : vector<239x1xf32> to vector<239x5xf32>
    %35 = vector.broadcast %33 : vector<1x5xf32> to vector<239x5xf32>
    %36 = arith.mulf %34, %35 : vector<239x5xf32>
    %37 = arith.addf %31, %36 : vector<239x5xf32>
    %c272 = arith.constant 272 : index
    %c0_20 = arith.constant 0 : index
    %38 = vector.load %arg1[%c272, %c0_20] : memref<512x1xf32, #tpu.memory_space<vmem>>, vector<239x1xf32>
    %c2_21 = arith.constant 2 : index
    %c0_22 = arith.constant 0 : index
    %39 = vector.load %arg2[%c2_21, %c0_22] : memref<4x5xf32, #tpu.memory_space<vmem>>, vector<1x5xf32>
    %40 = vector.broadcast %38 : vector<239x1xf32> to vector<239x5xf32>
    %41 = vector.broadcast %39 : vector<1x5xf32> to vector<239x5xf32>
    %42 = arith.mulf %40, %41 : vector<239x5xf32>
    %43 = arith.addf %37, %42 : vector<239x5xf32>
    %c273 = arith.constant 273 : index
    %c0_23 = arith.constant 0 : index
    %44 = vector.load %arg1[%c273, %c0_23] : memref<512x1xf32, #tpu.memory_space<vmem>>, vector<239x1xf32>
    %c3_24 = arith.constant 3 : index
    %c0_25 = arith.constant 0 : index
    %45 = vector.load %arg2[%c3_24, %c0_25] : memref<4x5xf32, #tpu.memory_space<vmem>>, vector<1x5xf32>
    %46 = vector.broadcast %44 : vector<239x1xf32> to vector<239x5xf32>
    %47 = vector.broadcast %45 : vector<1x5xf32> to vector<239x5xf32>
    %48 = arith.mulf %46, %47 : vector<239x5xf32>
    %49 = arith.addf %43, %48 : vector<239x5xf32>
    %c0_26 = arith.constant 0 : index
    %c0_27 = arith.constant 0 : index
    %50 = vector.load %arg3[%c0_26, %c0_27] : memref<1x5xf32, #tpu.memory_space<vmem>>, vector<1x5xf32>
    %51 = vector.broadcast %50 : vector<1x5xf32> to vector<239x5xf32>
    %52 = arith.addf %49, %51 : vector<239x5xf32>
    %c256_28 = arith.constant 256 : index
    %c0_29 = arith.constant 0 : index
    %53 = vector.load %arg9[%c256_28, %c0_29] : memref<495x5xf32, #tpu.memory_space<vmem>>, vector<239x5xf32>
    tpu.vector_store %arg9[%c256_28, %c0_29], %52 {strides = array<i32>} : memref<495x5xf32, #tpu.memory_space<vmem>>, vector<239x5xf32>,
    %c0_30 = arith.constant 0 : index
    %c0_31 = arith.constant 0 : index
    %54 = tpu.strided_load %arg9[%c0_30, %c0_31] {strides = array<i32: 2, 1>} : memref<495x5xf32, #tpu.memory_space<vmem>>, vector<7x5xf32>
    %c1_32 = arith.constant 1 : index
    %c0_33 = arith.constant 0 : index
    %55 = tpu.strided_load %arg9[%c1_32, %c0_33] {strides = array<i32: 2, 1>} : memref<495x5xf32, #tpu.memory_space<vmem>>, vector<7x5xf32>
    %c16_34 = arith.constant 16 : index
    %c0_35 = arith.constant 0 : index
    %56 = tpu.strided_load %arg9[%c16_34, %c0_35] {strides = array<i32: 2, 1>} : memref<495x5xf32, #tpu.memory_space<vmem>>, vector<7x5xf32>
    %c17_36 = arith.constant 17 : index
    %c0_37 = arith.constant 0 : index
    %57 = tpu.strided_load %arg9[%c17_36, %c0_37] {strides = array<i32: 2, 1>} : memref<495x5xf32, #tpu.memory_space<vmem>>, vector<7x5xf32>
    %58 = arith.maximumf %54, %55 : vector<7x5xf32>
    %59 = arith.maximumf %56, %57 : vector<7x5xf32>
    %60 = arith.maximumf %58, %59 : vector<7x5xf32>
    %cst = arith.constant 0.000000e+00 : f32
    %61 = vector.broadcast %cst : f32 to vector<7x5xf32>
    %62 = arith.maximumf %60, %61 : vector<7x5xf32>
    %c0_38 = arith.constant 0 : index
    %c0_39 = arith.constant 0 : index
    %63 = vector.load %arg10[%c0_38, %c0_39] : memref<98x5xf32, #tpu.memory_space<vmem>>, vector<7x5xf32>
    tpu.vector_store %arg10[%c0_38, %c0_39], %62 {strides = array<i32>} : memref<98x5xf32, #tpu.memory_space<vmem>>, vector<7x5xf32>,
    %c32 = arith.constant 32 : index
    %c0_40 = arith.constant 0 : index
    %64 = tpu.strided_load %arg9[%c32, %c0_40] {strides = array<i32: 2, 1>} : memref<495x5xf32, #tpu.memory_space<vmem>>, vector<7x5xf32>
    %c33 = arith.constant 33 : index
    %c0_41 = arith.constant 0 : index
    %65 = tpu.strided_load %arg9[%c33, %c0_41] {strides = array<i32: 2, 1>} : memref<495x5xf32, #tpu.memory_space<vmem>>, vector<7x5xf32>
    %c48 = arith.constant 48 : index
    %c0_42 = arith.constant 0 : index
    %66 = tpu.strided_load %arg9[%c48, %c0_42] {strides = array<i32: 2, 1>} : memref<495x5xf32, #tpu.memory_space<vmem>>, vector<7x5xf32>
    %c49 = arith.constant 49 : index
    %c0_43 = arith.constant 0 : index
    %67 = tpu.strided_load %arg9[%c49, %c0_43] {strides = array<i32: 2, 1>} : memref<495x5xf32, #tpu.memory_space<vmem>>, vector<7x5xf32>
    %68 = arith.maximumf %64, %65 : vector<7x5xf32>
    %69 = arith.maximumf %66, %67 : vector<7x5xf32>
    %70 = arith.maximumf %68, %69 : vector<7x5xf32>
    %cst_44 = arith.constant 0.000000e+00 : f32
    %71 = vector.broadcast %cst_44 : f32 to vector<7x5xf32>
    %72 = arith.maximumf %70, %71 : vector<7x5xf32>
    %c7 = arith.constant 7 : index
    %c0_45 = arith.constant 0 : index
    %73 = vector.load %arg10[%c7, %c0_45] : memref<98x5xf32, #tpu.memory_space<vmem>>, vector<7x5xf32>
    tpu.vector_store %arg10[%c7, %c0_45], %72 {strides = array<i32>} : memref<98x5xf32, #tpu.memory_space<vmem>>, vector<7x5xf32>,
    %c64 = arith.constant 64 : index
    %c0_46 = arith.constant 0 : index
    %74 = tpu.strided_load %arg9[%c64, %c0_46] {strides = array<i32: 2, 1>} : memref<495x5xf32, #tpu.memory_space<vmem>>, vector<7x5xf32>
    %c65 = arith.constant 65 : index
    %c0_47 = arith.constant 0 : index
    %75 = tpu.strided_load %arg9[%c65, %c0_47] {strides = array<i32: 2, 1>} : memref<495x5xf32, #tpu.memory_space<vmem>>, vector<7x5xf32>
    %c80 = arith.constant 80 : index
    %c0_48 = arith.constant 0 : index
    %76 = tpu.strided_load %arg9[%c80, %c0_48] {strides = array<i32: 2, 1>} : memref<495x5xf32, #tpu.memory_space<vmem>>, vector<7x5xf32>
    %c81 = arith.constant 81 : index
    %c0_49 = arith.constant 0 : index
    %77 = tpu.strided_load %arg9[%c81, %c0_49] {strides = array<i32: 2, 1>} : memref<495x5xf32, #tpu.memory_space<vmem>>, vector<7x5xf32>
    %78 = arith.maximumf %74, %75 : vector<7x5xf32>
    %79 = arith.maximumf %76, %77 : vector<7x5xf32>
    %80 = arith.maximumf %78, %79 : vector<7x5xf32>
    %cst_50 = arith.constant 0.000000e+00 : f32
    %81 = vector.broadcast %cst_50 : f32 to vector<7x5xf32>
    %82 = arith.maximumf %80, %81 : vector<7x5xf32>
    %c14 = arith.constant 14 : index
    %c0_51 = arith.constant 0 : index
    %83 = vector.load %arg10[%c14, %c0_51] : memref<98x5xf32, #tpu.memory_space<vmem>>, vector<7x5xf32>
    tpu.vector_store %arg10[%c14, %c0_51], %82 {strides = array<i32>} : memref<98x5xf32, #tpu.memory_space<vmem>>, vector<7x5xf32>,
    %c96 = arith.constant 96 : index
    %c0_52 = arith.constant 0 : index
    %84 = tpu.strided_load %arg9[%c96, %c0_52] {strides = array<i32: 2, 1>} : memref<495x5xf32, #tpu.memory_space<vmem>>, vector<7x5xf32>
    %c97 = arith.constant 97 : index
    %c0_53 = arith.constant 0 : index
    %85 = tpu.strided_load %arg9[%c97, %c0_53] {strides = array<i32: 2, 1>} : memref<495x5xf32, #tpu.memory_space<vmem>>, vector<7x5xf32>
    %c112 = arith.constant 112 : index
    %c0_54 = arith.constant 0 : index
    %86 = tpu.strided_load %arg9[%c112, %c0_54] {strides = array<i32: 2, 1>} : memref<495x5xf32, #tpu.memory_space<vmem>>, vector<7x5xf32>
    %c113 = arith.constant 113 : index
    %c0_55 = arith.constant 0 : index
    %87 = tpu.strided_load %arg9[%c113, %c0_55] {strides = array<i32: 2, 1>} : memref<495x5xf32, #tpu.memory_space<vmem>>, vector<7x5xf32>
    %88 = arith.maximumf %84, %85 : vector<7x5xf32>
    %89 = arith.maximumf %86, %87 : vector<7x5xf32>
    %90 = arith.maximumf %88, %89 : vector<7x5xf32>
    %cst_56 = arith.constant 0.000000e+00 : f32
    %91 = vector.broadcast %cst_56 : f32 to vector<7x5xf32>
    %92 = arith.maximumf %90, %91 : vector<7x5xf32>
    %c21 = arith.constant 21 : index
    %c0_57 = arith.constant 0 : index
    %93 = vector.load %arg10[%c21, %c0_57] : memref<98x5xf32, #tpu.memory_space<vmem>>, vector<7x5xf32>
    tpu.vector_store %arg10[%c21, %c0_57], %92 {strides = array<i32>} : memref<98x5xf32, #tpu.memory_space<vmem>>, vector<7x5xf32>,
    %c128 = arith.constant 128 : index
    %c0_58 = arith.constant 0 : index
    %94 = tpu.strided_load %arg9[%c128, %c0_58] {strides = array<i32: 2, 1>} : memref<495x5xf32, #tpu.memory_space<vmem>>, vector<7x5xf32>
    %c129 = arith.constant 129 : index
    %c0_59 = arith.constant 0 : index
    %95 = tpu.strided_load %arg9[%c129, %c0_59] {strides = array<i32: 2, 1>} : memref<495x5xf32, #tpu.memory_space<vmem>>, vector<7x5xf32>
    %c144 = arith.constant 144 : index
    %c0_60 = arith.constant 0 : index
    %96 = tpu.strided_load %arg9[%c144, %c0_60] {strides = array<i32: 2, 1>} : memref<495x5xf32, #tpu.memory_space<vmem>>, vector<7x5xf32>
    %c145 = arith.constant 145 : index
    %c0_61 = arith.constant 0 : index
    %97 = tpu.strided_load %arg9[%c145, %c0_61] {strides = array<i32: 2, 1>} : memref<495x5xf32, #tpu.memory_space<vmem>>, vector<7x5xf32>
    %98 = arith.maximumf %94, %95 : vector<7x5xf32>
    %99 = arith.maximumf %96, %97 : vector<7x5xf32>
    %100 = arith.maximumf %98, %99 : vector<7x5xf32>
    %cst_62 = arith.constant 0.000000e+00 : f32
    %101 = vector.broadcast %cst_62 : f32 to vector<7x5xf32>
    %102 = arith.maximumf %100, %101 : vector<7x5xf32>
    %c28 = arith.constant 28 : index
    %c0_63 = arith.constant 0 : index
    %103 = vector.load %arg10[%c28, %c0_63] : memref<98x5xf32, #tpu.memory_space<vmem>>, vector<7x5xf32>
    tpu.vector_store %arg10[%c28, %c0_63], %102 {strides = array<i32>} : memref<98x5xf32, #tpu.memory_space<vmem>>, vector<7x5xf32>,
    %c160 = arith.constant 160 : index
    %c0_64 = arith.constant 0 : index
    %104 = tpu.strided_load %arg9[%c160, %c0_64] {strides = array<i32: 2, 1>} : memref<495x5xf32, #tpu.memory_space<vmem>>, vector<7x5xf32>
    %c161 = arith.constant 161 : index
    %c0_65 = arith.constant 0 : index
    %105 = tpu.strided_load %arg9[%c161, %c0_65] {strides = array<i32: 2, 1>} : memref<495x5xf32, #tpu.memory_space<vmem>>, vector<7x5xf32>
    %c176 = arith.constant 176 : index
    %c0_66 = arith.constant 0 : index
    %106 = tpu.strided_load %arg9[%c176, %c0_66] {strides = array<i32: 2, 1>} : memref<495x5xf32, #tpu.memory_space<vmem>>, vector<7x5xf32>
    %c177 = arith.constant 177 : index
    %c0_67 = arith.constant 0 : index
    %107 = tpu.strided_load %arg9[%c177, %c0_67] {strides = array<i32: 2, 1>} : memref<495x5xf32, #tpu.memory_space<vmem>>, vector<7x5xf32>
    %108 = arith.maximumf %104, %105 : vector<7x5xf32>
    %109 = arith.maximumf %106, %107 : vector<7x5xf32>
    %110 = arith.maximumf %108, %109 : vector<7x5xf32>
    %cst_68 = arith.constant 0.000000e+00 : f32
    %111 = vector.broadcast %cst_68 : f32 to vector<7x5xf32>
    %112 = arith.maximumf %110, %111 : vector<7x5xf32>
    %c35 = arith.constant 35 : index
    %c0_69 = arith.constant 0 : index
    %113 = vector.load %arg10[%c35, %c0_69] : memref<98x5xf32, #tpu.memory_space<vmem>>, vector<7x5xf32>
    tpu.vector_store %arg10[%c35, %c0_69], %112 {strides = array<i32>} : memref<98x5xf32, #tpu.memory_space<vmem>>, vector<7x5xf32>,
    %c192 = arith.constant 192 : index
    %c0_70 = arith.constant 0 : index
    %114 = tpu.strided_load %arg9[%c192, %c0_70] {strides = array<i32: 2, 1>} : memref<495x5xf32, #tpu.memory_space<vmem>>, vector<7x5xf32>
    %c193 = arith.constant 193 : index
    %c0_71 = arith.constant 0 : index
    %115 = tpu.strided_load %arg9[%c193, %c0_71] {strides = array<i32: 2, 1>} : memref<495x5xf32, #tpu.memory_space<vmem>>, vector<7x5xf32>
    %c208 = arith.constant 208 : index
    %c0_72 = arith.constant 0 : index
    %116 = tpu.strided_load %arg9[%c208, %c0_72] {strides = array<i32: 2, 1>} : memref<495x5xf32, #tpu.memory_space<vmem>>, vector<7x5xf32>
    %c209 = arith.constant 209 : index
    %c0_73 = arith.constant 0 : index
    %117 = tpu.strided_load %arg9[%c209, %c0_73] {strides = array<i32: 2, 1>} : memref<495x5xf32, #tpu.memory_space<vmem>>, vector<7x5xf32>
    %118 = arith.maximumf %114, %115 : vector<7x5xf32>
    %119 = arith.maximumf %116, %117 : vector<7x5xf32>
    %120 = arith.maximumf %118, %119 : vector<7x5xf32>
    %cst_74 = arith.constant 0.000000e+00 : f32
    %121 = vector.broadcast %cst_74 : f32 to vector<7x5xf32>
    %122 = arith.maximumf %120, %121 : vector<7x5xf32>
    %c42 = arith.constant 42 : index
    %c0_75 = arith.constant 0 : index
    %123 = vector.load %arg10[%c42, %c0_75] : memref<98x5xf32, #tpu.memory_space<vmem>>, vector<7x5xf32>
    tpu.vector_store %arg10[%c42, %c0_75], %122 {strides = array<i32>} : memref<98x5xf32, #tpu.memory_space<vmem>>, vector<7x5xf32>,
    %c256_76 = arith.constant 256 : index
    %c0_77 = arith.constant 0 : index
    %124 = tpu.strided_load %arg9[%c256_76, %c0_77] {strides = array<i32: 2, 1>} : memref<495x5xf32, #tpu.memory_space<vmem>>, vector<7x5xf32>
    %c257_78 = arith.constant 257 : index
    %c0_79 = arith.constant 0 : index
    %125 = tpu.strided_load %arg9[%c257_78, %c0_79] {strides = array<i32: 2, 1>} : memref<495x5xf32, #tpu.memory_space<vmem>>, vector<7x5xf32>
    %c272_80 = arith.constant 272 : index
    %c0_81 = arith.constant 0 : index
    %126 = tpu.strided_load %arg9[%c272_80, %c0_81] {strides = array<i32: 2, 1>} : memref<495x5xf32, #tpu.memory_space<vmem>>, vector<7x5xf32>
    %c273_82 = arith.constant 273 : index
    %c0_83 = arith.constant 0 : index
    %127 = tpu.strided_load %arg9[%c273_82, %c0_83] {strides = array<i32: 2, 1>} : memref<495x5xf32, #tpu.memory_space<vmem>>, vector<7x5xf32>
    %128 = arith.maximumf %124, %125 : vector<7x5xf32>
    %129 = arith.maximumf %126, %127 : vector<7x5xf32>
    %130 = arith.maximumf %128, %129 : vector<7x5xf32>
    %cst_84 = arith.constant 0.000000e+00 : f32
    %131 = vector.broadcast %cst_84 : f32 to vector<7x5xf32>
    %132 = arith.maximumf %130, %131 : vector<7x5xf32>
    %c49_85 = arith.constant 49 : index
    %c0_86 = arith.constant 0 : index
    %133 = vector.load %arg10[%c49_85, %c0_86] : memref<98x5xf32, #tpu.memory_space<vmem>>, vector<7x5xf32>
    tpu.vector_store %arg10[%c49_85, %c0_86], %132 {strides = array<i32>} : memref<98x5xf32, #tpu.memory_space<vmem>>, vector<7x5xf32>,
    %c288 = arith.constant 288 : index
    %c0_87 = arith.constant 0 : index
    %134 = tpu.strided_load %arg9[%c288, %c0_87] {strides = array<i32: 2, 1>} : memref<495x5xf32, #tpu.memory_space<vmem>>, vector<7x5xf32>
    %c289 = arith.constant 289 : index
    %c0_88 = arith.constant 0 : index
    %135 = tpu.strided_load %arg9[%c289, %c0_88] {strides = array<i32: 2, 1>} : memref<495x5xf32, #tpu.memory_space<vmem>>, vector<7x5xf32>
    %c304 = arith.constant 304 : index
    %c0_89 = arith.constant 0 : index
    %136 = tpu.strided_load %arg9[%c304, %c0_89] {strides = array<i32: 2, 1>} : memref<495x5xf32, #tpu.memory_space<vmem>>, vector<7x5xf32>
    %c305 = arith.constant 305 : index
    %c0_90 = arith.constant 0 : index
    %137 = tpu.strided_load %arg9[%c305, %c0_90] {strides = array<i32: 2, 1>} : memref<495x5xf32, #tpu.memory_space<vmem>>, vector<7x5xf32>
    %138 = arith.maximumf %134, %135 : vector<7x5xf32>
    %139 = arith.maximumf %136, %137 : vector<7x5xf32>
    %140 = arith.maximumf %138, %139 : vector<7x5xf32>
    %cst_91 = arith.constant 0.000000e+00 : f32
    %141 = vector.broadcast %cst_91 : f32 to vector<7x5xf32>
    %142 = arith.maximumf %140, %141 : vector<7x5xf32>
    %c56 = arith.constant 56 : index
    %c0_92 = arith.constant 0 : index
    %143 = vector.load %arg10[%c56, %c0_92] : memref<98x5xf32, #tpu.memory_space<vmem>>, vector<7x5xf32>
    tpu.vector_store %arg10[%c56, %c0_92], %142 {strides = array<i32>} : memref<98x5xf32, #tpu.memory_space<vmem>>, vector<7x5xf32>,
    %c320 = arith.constant 320 : index
    %c0_93 = arith.constant 0 : index
    %144 = tpu.strided_load %arg9[%c320, %c0_93] {strides = array<i32: 2, 1>} : memref<495x5xf32, #tpu.memory_space<vmem>>, vector<7x5xf32>
    %c321 = arith.constant 321 : index
    %c0_94 = arith.constant 0 : index
    %145 = tpu.strided_load %arg9[%c321, %c0_94] {strides = array<i32: 2, 1>} : memref<495x5xf32, #tpu.memory_space<vmem>>, vector<7x5xf32>
    %c336 = arith.constant 336 : index
    %c0_95 = arith.constant 0 : index
    %146 = tpu.strided_load %arg9[%c336, %c0_95] {strides = array<i32: 2, 1>} : memref<495x5xf32, #tpu.memory_space<vmem>>, vector<7x5xf32>
    %c337 = arith.constant 337 : index
    %c0_96 = arith.constant 0 : index
    %147 = tpu.strided_load %arg9[%c337, %c0_96] {strides = array<i32: 2, 1>} : memref<495x5xf32, #tpu.memory_space<vmem>>, vector<7x5xf32>
    %148 = arith.maximumf %144, %145 : vector<7x5xf32>
    %149 = arith.maximumf %146, %147 : vector<7x5xf32>
    %150 = arith.maximumf %148, %149 : vector<7x5xf32>
    %cst_97 = arith.constant 0.000000e+00 : f32
    %151 = vector.broadcast %cst_97 : f32 to vector<7x5xf32>
    %152 = arith.maximumf %150, %151 : vector<7x5xf32>
    %c63 = arith.constant 63 : index
    %c0_98 = arith.constant 0 : index
    %153 = vector.load %arg10[%c63, %c0_98] : memref<98x5xf32, #tpu.memory_space<vmem>>, vector<7x5xf32>
    tpu.vector_store %arg10[%c63, %c0_98], %152 {strides = array<i32>} : memref<98x5xf32, #tpu.memory_space<vmem>>, vector<7x5xf32>,
    %c352 = arith.constant 352 : index
    %c0_99 = arith.constant 0 : index
    %154 = tpu.strided_load %arg9[%c352, %c0_99] {strides = array<i32: 2, 1>} : memref<495x5xf32, #tpu.memory_space<vmem>>, vector<7x5xf32>
    %c353 = arith.constant 353 : index
    %c0_100 = arith.constant 0 : index
    %155 = tpu.strided_load %arg9[%c353, %c0_100] {strides = array<i32: 2, 1>} : memref<495x5xf32, #tpu.memory_space<vmem>>, vector<7x5xf32>
    %c368 = arith.constant 368 : index
    %c0_101 = arith.constant 0 : index
    %156 = tpu.strided_load %arg9[%c368, %c0_101] {strides = array<i32: 2, 1>} : memref<495x5xf32, #tpu.memory_space<vmem>>, vector<7x5xf32>
    %c369 = arith.constant 369 : index
    %c0_102 = arith.constant 0 : index
    %157 = tpu.strided_load %arg9[%c369, %c0_102] {strides = array<i32: 2, 1>} : memref<495x5xf32, #tpu.memory_space<vmem>>, vector<7x5xf32>
    %158 = arith.maximumf %154, %155 : vector<7x5xf32>
    %159 = arith.maximumf %156, %157 : vector<7x5xf32>
    %160 = arith.maximumf %158, %159 : vector<7x5xf32>
    %cst_103 = arith.constant 0.000000e+00 : f32
    %161 = vector.broadcast %cst_103 : f32 to vector<7x5xf32>
    %162 = arith.maximumf %160, %161 : vector<7x5xf32>
    %c70 = arith.constant 70 : index
    %c0_104 = arith.constant 0 : index
    %163 = vector.load %arg10[%c70, %c0_104] : memref<98x5xf32, #tpu.memory_space<vmem>>, vector<7x5xf32>
    tpu.vector_store %arg10[%c70, %c0_104], %162 {strides = array<i32>} : memref<98x5xf32, #tpu.memory_space<vmem>>, vector<7x5xf32>,
    %c384 = arith.constant 384 : index
    %c0_105 = arith.constant 0 : index
    %164 = tpu.strided_load %arg9[%c384, %c0_105] {strides = array<i32: 2, 1>} : memref<495x5xf32, #tpu.memory_space<vmem>>, vector<7x5xf32>
    %c385 = arith.constant 385 : index
    %c0_106 = arith.constant 0 : index
    %165 = tpu.strided_load %arg9[%c385, %c0_106] {strides = array<i32: 2, 1>} : memref<495x5xf32, #tpu.memory_space<vmem>>, vector<7x5xf32>
    %c400 = arith.constant 400 : index
    %c0_107 = arith.constant 0 : index
    %166 = tpu.strided_load %arg9[%c400, %c0_107] {strides = array<i32: 2, 1>} : memref<495x5xf32, #tpu.memory_space<vmem>>, vector<7x5xf32>
    %c401 = arith.constant 401 : index
    %c0_108 = arith.constant 0 : index
    %167 = tpu.strided_load %arg9[%c401, %c0_108] {strides = array<i32: 2, 1>} : memref<495x5xf32, #tpu.memory_space<vmem>>, vector<7x5xf32>
    %168 = arith.maximumf %164, %165 : vector<7x5xf32>
    %169 = arith.maximumf %166, %167 : vector<7x5xf32>
    %170 = arith.maximumf %168, %169 : vector<7x5xf32>
    %cst_109 = arith.constant 0.000000e+00 : f32
    %171 = vector.broadcast %cst_109 : f32 to vector<7x5xf32>
    %172 = arith.maximumf %170, %171 : vector<7x5xf32>
    %c77 = arith.constant 77 : index
    %c0_110 = arith.constant 0 : index
    %173 = vector.load %arg10[%c77, %c0_110] : memref<98x5xf32, #tpu.memory_space<vmem>>, vector<7x5xf32>
    tpu.vector_store %arg10[%c77, %c0_110], %172 {strides = array<i32>} : memref<98x5xf32, #tpu.memory_space<vmem>>, vector<7x5xf32>,
    %c416 = arith.constant 416 : index
    %c0_111 = arith.constant 0 : index
    %174 = tpu.strided_load %arg9[%c416, %c0_111] {strides = array<i32: 2, 1>} : memref<495x5xf32, #tpu.memory_space<vmem>>, vector<7x5xf32>
    %c417 = arith.constant 417 : index
    %c0_112 = arith.constant 0 : index
    %175 = tpu.strided_load %arg9[%c417, %c0_112] {strides = array<i32: 2, 1>} : memref<495x5xf32, #tpu.memory_space<vmem>>, vector<7x5xf32>
    %c432 = arith.constant 432 : index
    %c0_113 = arith.constant 0 : index
    %176 = tpu.strided_load %arg9[%c432, %c0_113] {strides = array<i32: 2, 1>} : memref<495x5xf32, #tpu.memory_space<vmem>>, vector<7x5xf32>
    %c433 = arith.constant 433 : index
    %c0_114 = arith.constant 0 : index
    %177 = tpu.strided_load %arg9[%c433, %c0_114] {strides = array<i32: 2, 1>} : memref<495x5xf32, #tpu.memory_space<vmem>>, vector<7x5xf32>
    %178 = arith.maximumf %174, %175 : vector<7x5xf32>
    %179 = arith.maximumf %176, %177 : vector<7x5xf32>
    %180 = arith.maximumf %178, %179 : vector<7x5xf32>
    %cst_115 = arith.constant 0.000000e+00 : f32
    %181 = vector.broadcast %cst_115 : f32 to vector<7x5xf32>
    %182 = arith.maximumf %180, %181 : vector<7x5xf32>
    %c84 = arith.constant 84 : index
    %c0_116 = arith.constant 0 : index
    %183 = vector.load %arg10[%c84, %c0_116] : memref<98x5xf32, #tpu.memory_space<vmem>>, vector<7x5xf32>
    tpu.vector_store %arg10[%c84, %c0_116], %182 {strides = array<i32>} : memref<98x5xf32, #tpu.memory_space<vmem>>, vector<7x5xf32>,
    %c448 = arith.constant 448 : index
    %c0_117 = arith.constant 0 : index
    %184 = tpu.strided_load %arg9[%c448, %c0_117] {strides = array<i32: 2, 1>} : memref<495x5xf32, #tpu.memory_space<vmem>>, vector<7x5xf32>
    %c449 = arith.constant 449 : index
    %c0_118 = arith.constant 0 : index
    %185 = tpu.strided_load %arg9[%c449, %c0_118] {strides = array<i32: 2, 1>} : memref<495x5xf32, #tpu.memory_space<vmem>>, vector<7x5xf32>
    %c464 = arith.constant 464 : index
    %c0_119 = arith.constant 0 : index
    %186 = tpu.strided_load %arg9[%c464, %c0_119] {strides = array<i32: 2, 1>} : memref<495x5xf32, #tpu.memory_space<vmem>>, vector<7x5xf32>
    %c465 = arith.constant 465 : index
    %c0_120 = arith.constant 0 : index
    %187 = tpu.strided_load %arg9[%c465, %c0_120] {strides = array<i32: 2, 1>} : memref<495x5xf32, #tpu.memory_space<vmem>>, vector<7x5xf32>
    %188 = arith.maximumf %184, %185 : vector<7x5xf32>
    %189 = arith.maximumf %186, %187 : vector<7x5xf32>
    %190 = arith.maximumf %188, %189 : vector<7x5xf32>
    %cst_121 = arith.constant 0.000000e+00 : f32
    %191 = vector.broadcast %cst_121 : f32 to vector<7x5xf32>
    %192 = arith.maximumf %190, %191 : vector<7x5xf32>
    %c91 = arith.constant 91 : index
    %c0_122 = arith.constant 0 : index
    %193 = vector.load %arg10[%c91, %c0_122] : memref<98x5xf32, #tpu.memory_space<vmem>>, vector<7x5xf32>
    tpu.vector_store %arg10[%c91, %c0_122], %192 {strides = array<i32>} : memref<98x5xf32, #tpu.memory_space<vmem>>, vector<7x5xf32>,
    %c0_123 = arith.constant 0 : index
    %c0_124 = arith.constant 0 : index
    %194 = vector.load %arg10[%c0_123, %c0_124] : memref<98x5xf32, #tpu.memory_space<vmem>>, vector<82x5xf32>
    %c0_125 = arith.constant 0 : index
    %c0_126 = arith.constant 0 : index
    %195 = vector.load %arg11[%c0_125, %c0_126] : memref<82x45xf32, #tpu.memory_space<vmem>>, vector<82x5xf32>
    tpu.vector_store %arg11[%c0_125, %c0_126], %194 {strides = array<i32>} : memref<82x45xf32, #tpu.memory_space<vmem>>, vector<82x5xf32>,
    %c1_127 = arith.constant 1 : index
    %c0_128 = arith.constant 0 : index
    %196 = vector.load %arg10[%c1_127, %c0_128] : memref<98x5xf32, #tpu.memory_space<vmem>>, vector<82x5xf32>
    %c0_129 = arith.constant 0 : index
    %c5 = arith.constant 5 : index
    %197 = vector.load %arg11[%c0_129, %c5] : memref<82x45xf32, #tpu.memory_space<vmem>>, vector<82x5xf32>
    tpu.vector_store %arg11[%c0_129, %c5], %196 {strides = array<i32>} : memref<82x45xf32, #tpu.memory_space<vmem>>, vector<82x5xf32>,
    %c2_130 = arith.constant 2 : index
    %c0_131 = arith.constant 0 : index
    %198 = vector.load %arg10[%c2_130, %c0_131] : memref<98x5xf32, #tpu.memory_space<vmem>>, vector<82x5xf32>
    %c0_132 = arith.constant 0 : index
    %c10 = arith.constant 10 : index
    %199 = vector.load %arg11[%c0_132, %c10] : memref<82x45xf32, #tpu.memory_space<vmem>>, vector<82x5xf32>
    tpu.vector_store %arg11[%c0_132, %c10], %198 {strides = array<i32>} : memref<82x45xf32, #tpu.memory_space<vmem>>, vector<82x5xf32>,
    %c7_133 = arith.constant 7 : index
    %c0_134 = arith.constant 0 : index
    %200 = vector.load %arg10[%c7_133, %c0_134] : memref<98x5xf32, #tpu.memory_space<vmem>>, vector<82x5xf32>
    %c0_135 = arith.constant 0 : index
    %c15 = arith.constant 15 : index
    %201 = vector.load %arg11[%c0_135, %c15] : memref<82x45xf32, #tpu.memory_space<vmem>>, vector<82x5xf32>
    tpu.vector_store %arg11[%c0_135, %c15], %200 {strides = array<i32>} : memref<82x45xf32, #tpu.memory_space<vmem>>, vector<82x5xf32>,
    %c8 = arith.constant 8 : index
    %c0_136 = arith.constant 0 : index
    %202 = vector.load %arg10[%c8, %c0_136] : memref<98x5xf32, #tpu.memory_space<vmem>>, vector<82x5xf32>
    %c0_137 = arith.constant 0 : index
    %c20 = arith.constant 20 : index
    %203 = vector.load %arg11[%c0_137, %c20] : memref<82x45xf32, #tpu.memory_space<vmem>>, vector<82x5xf32>
    tpu.vector_store %arg11[%c0_137, %c20], %202 {strides = array<i32>} : memref<82x45xf32, #tpu.memory_space<vmem>>, vector<82x5xf32>,
    %c9 = arith.constant 9 : index
    %c0_138 = arith.constant 0 : index
    %204 = vector.load %arg10[%c9, %c0_138] : memref<98x5xf32, #tpu.memory_space<vmem>>, vector<82x5xf32>
    %c0_139 = arith.constant 0 : index
    %c25 = arith.constant 25 : index
    %205 = vector.load %arg11[%c0_139, %c25] : memref<82x45xf32, #tpu.memory_space<vmem>>, vector<82x5xf32>
    tpu.vector_store %arg11[%c0_139, %c25], %204 {strides = array<i32>} : memref<82x45xf32, #tpu.memory_space<vmem>>, vector<82x5xf32>,
    %c14_140 = arith.constant 14 : index
    %c0_141 = arith.constant 0 : index
    %206 = vector.load %arg10[%c14_140, %c0_141] : memref<98x5xf32, #tpu.memory_space<vmem>>, vector<82x5xf32>
    %c0_142 = arith.constant 0 : index
    %c30 = arith.constant 30 : index
    %207 = vector.load %arg11[%c0_142, %c30] : memref<82x45xf32, #tpu.memory_space<vmem>>, vector<82x5xf32>
    tpu.vector_store %arg11[%c0_142, %c30], %206 {strides = array<i32>} : memref<82x45xf32, #tpu.memory_space<vmem>>, vector<82x5xf32>,
    %c15_143 = arith.constant 15 : index
    %c0_144 = arith.constant 0 : index
    %208 = vector.load %arg10[%c15_143, %c0_144] : memref<98x5xf32, #tpu.memory_space<vmem>>, vector<82x5xf32>
    %c0_145 = arith.constant 0 : index
    %c35_146 = arith.constant 35 : index
    %209 = vector.load %arg11[%c0_145, %c35_146] : memref<82x45xf32, #tpu.memory_space<vmem>>, vector<82x5xf32>
    tpu.vector_store %arg11[%c0_145, %c35_146], %208 {strides = array<i32>} : memref<82x45xf32, #tpu.memory_space<vmem>>, vector<82x5xf32>,
    %c16_147 = arith.constant 16 : index
    %c0_148 = arith.constant 0 : index
    %210 = vector.load %arg10[%c16_147, %c0_148] : memref<98x5xf32, #tpu.memory_space<vmem>>, vector<82x5xf32>
    %c0_149 = arith.constant 0 : index
    %c40 = arith.constant 40 : index
    %211 = vector.load %arg11[%c0_149, %c40] : memref<82x45xf32, #tpu.memory_space<vmem>>, vector<82x5xf32>
    tpu.vector_store %arg11[%c0_149, %c40], %210 {strides = array<i32>} : memref<82x45xf32, #tpu.memory_space<vmem>>, vector<82x5xf32>,
    %c0_150 = arith.constant 0 : index
    %c0_151 = arith.constant 0 : index
    %212 = vector.load %arg11[%c0_150, %c0_151] : memref<82x45xf32, #tpu.memory_space<vmem>>, vector<82x45xf32>
    %c0_152 = arith.constant 0 : index
    %c0_153 = arith.constant 0 : index
    %213 = vector.load %arg4[%c0_152, %c0_153] : memref<45x10xf32, #tpu.memory_space<vmem>>, vector<45x10xf32>
    %cst_154 = arith.constant dense<0.000000e+00> : vector<82x10xf32>
    %214 = tpu.matmul %212, %213, %cst_154 {dimension_numbers = #tpu.dot_dimension_numbers<[1], [0], [0], [1], [0, 0, 1, 1], [], []>} : vector<82x45xf32>, vector<45x10xf32>, vector<82x10xf32> -> vector<82x10xf32>
    %c0_155 = arith.constant 0 : index
    %c0_156 = arith.constant 0 : index
    %215 = vector.load %arg5[%c0_155, %c0_156] : memref<1x10xf32, #tpu.memory_space<vmem>>, vector<1x10xf32>
    %216 = vector.broadcast %215 : vector<1x10xf32> to vector<82x10xf32>
    %217 = arith.addf %214, %216 : vector<82x10xf32>
    %c0_157 = arith.constant 0 : index
    %c0_158 = arith.constant 0 : index
    %218 = vector.load %arg12[%c0_157, %c0_158] : memref<82x10xf32, #tpu.memory_space<vmem>>, vector<82x10xf32>
    tpu.vector_store %arg12[%c0_157, %c0_158], %217 {strides = array<i32>} : memref<82x10xf32, #tpu.memory_space<vmem>>, vector<82x10xf32>,
    %c0_159 = arith.constant 0 : index
    %c0_160 = arith.constant 0 : index
    %219 = vector.load %arg12[%c0_159, %c0_160] : memref<82x10xf32, #tpu.memory_space<vmem>>, vector<2x10xf32>
    %c7_161 = arith.constant 7 : index
    %c0_162 = arith.constant 0 : index
    %220 = vector.load %arg12[%c7_161, %c0_162] : memref<82x10xf32, #tpu.memory_space<vmem>>, vector<2x10xf32>
    %221 = arith.maximumf %219, %220 : vector<2x10xf32>
    %cst_163 = arith.constant dense<0xFF800000> : vector<10xf32>
    %222 = vector.multi_reduction <maximumf>, %221, %cst_163 [0] : vector<2x10xf32> to vector<10xf32>
    %223 = vector.shape_cast %222 : vector<10xf32> to vector<1x10xf32>
    %cst_164 = arith.constant 0.000000e+00 : f32
    %224 = vector.broadcast %cst_164 : f32 to vector<1x10xf32>
    %225 = arith.maximumf %223, %224 : vector<1x10xf32>
    %c0_165 = arith.constant 0 : index
    %c0_166 = arith.constant 0 : index
    %226 = vector.load %arg13[%c0_165, %c0_166] : memref<2x40xf32, #tpu.memory_space<vmem>>, vector<1x10xf32>
    tpu.vector_store %arg13[%c0_165, %c0_166], %225 {strides = array<i32>} : memref<2x40xf32, #tpu.memory_space<vmem>>, vector<1x10xf32>,
    %c2_167 = arith.constant 2 : index
    %c0_168 = arith.constant 0 : index
    %227 = vector.load %arg12[%c2_167, %c0_168] : memref<82x10xf32, #tpu.memory_space<vmem>>, vector<2x10xf32>
    %c9_169 = arith.constant 9 : index
    %c0_170 = arith.constant 0 : index
    %228 = vector.load %arg12[%c9_169, %c0_170] : memref<82x10xf32, #tpu.memory_space<vmem>>, vector<2x10xf32>
    %229 = arith.maximumf %227, %228 : vector<2x10xf32>
    %cst_171 = arith.constant dense<0xFF800000> : vector<10xf32>
    %230 = vector.multi_reduction <maximumf>, %229, %cst_171 [0] : vector<2x10xf32> to vector<10xf32>
    %231 = vector.shape_cast %230 : vector<10xf32> to vector<1x10xf32>
    %cst_172 = arith.constant 0.000000e+00 : f32
    %232 = vector.broadcast %cst_172 : f32 to vector<1x10xf32>
    %233 = arith.maximumf %231, %232 : vector<1x10xf32>
    %c0_173 = arith.constant 0 : index
    %c10_174 = arith.constant 10 : index
    %234 = vector.load %arg13[%c0_173, %c10_174] : memref<2x40xf32, #tpu.memory_space<vmem>>, vector<1x10xf32>
    tpu.vector_store %arg13[%c0_173, %c10_174], %233 {strides = array<i32>} : memref<2x40xf32, #tpu.memory_space<vmem>>, vector<1x10xf32>,
    %c14_175 = arith.constant 14 : index
    %c0_176 = arith.constant 0 : index
    %235 = vector.load %arg12[%c14_175, %c0_176] : memref<82x10xf32, #tpu.memory_space<vmem>>, vector<2x10xf32>
    %c21_177 = arith.constant 21 : index
    %c0_178 = arith.constant 0 : index
    %236 = vector.load %arg12[%c21_177, %c0_178] : memref<82x10xf32, #tpu.memory_space<vmem>>, vector<2x10xf32>
    %237 = arith.maximumf %235, %236 : vector<2x10xf32>
    %cst_179 = arith.constant dense<0xFF800000> : vector<10xf32>
    %238 = vector.multi_reduction <maximumf>, %237, %cst_179 [0] : vector<2x10xf32> to vector<10xf32>
    %239 = vector.shape_cast %238 : vector<10xf32> to vector<1x10xf32>
    %cst_180 = arith.constant 0.000000e+00 : f32
    %240 = vector.broadcast %cst_180 : f32 to vector<1x10xf32>
    %241 = arith.maximumf %239, %240 : vector<1x10xf32>
    %c0_181 = arith.constant 0 : index
    %c20_182 = arith.constant 20 : index
    %242 = vector.load %arg13[%c0_181, %c20_182] : memref<2x40xf32, #tpu.memory_space<vmem>>, vector<1x10xf32>
    tpu.vector_store %arg13[%c0_181, %c20_182], %241 {strides = array<i32>} : memref<2x40xf32, #tpu.memory_space<vmem>>, vector<1x10xf32>,
    %c16_183 = arith.constant 16 : index
    %c0_184 = arith.constant 0 : index
    %243 = vector.load %arg12[%c16_183, %c0_184] : memref<82x10xf32, #tpu.memory_space<vmem>>, vector<2x10xf32>
    %c23 = arith.constant 23 : index
    %c0_185 = arith.constant 0 : index
    %244 = vector.load %arg12[%c23, %c0_185] : memref<82x10xf32, #tpu.memory_space<vmem>>, vector<2x10xf32>
    %245 = arith.maximumf %243, %244 : vector<2x10xf32>
    %cst_186 = arith.constant dense<0xFF800000> : vector<10xf32>
    %246 = vector.multi_reduction <maximumf>, %245, %cst_186 [0] : vector<2x10xf32> to vector<10xf32>
    %247 = vector.shape_cast %246 : vector<10xf32> to vector<1x10xf32>
    %cst_187 = arith.constant 0.000000e+00 : f32
    %248 = vector.broadcast %cst_187 : f32 to vector<1x10xf32>
    %249 = arith.maximumf %247, %248 : vector<1x10xf32>
    %c0_188 = arith.constant 0 : index
    %c30_189 = arith.constant 30 : index
    %250 = vector.load %arg13[%c0_188, %c30_189] : memref<2x40xf32, #tpu.memory_space<vmem>>, vector<1x10xf32>
    tpu.vector_store %arg13[%c0_188, %c30_189], %249 {strides = array<i32>} : memref<2x40xf32, #tpu.memory_space<vmem>>, vector<1x10xf32>,
    %c49_190 = arith.constant 49 : index
    %c0_191 = arith.constant 0 : index
    %251 = vector.load %arg12[%c49_190, %c0_191] : memref<82x10xf32, #tpu.memory_space<vmem>>, vector<2x10xf32>
    %c56_192 = arith.constant 56 : index
    %c0_193 = arith.constant 0 : index
    %252 = vector.load %arg12[%c56_192, %c0_193] : memref<82x10xf32, #tpu.memory_space<vmem>>, vector<2x10xf32>
    %253 = arith.maximumf %251, %252 : vector<2x10xf32>
    %cst_194 = arith.constant dense<0xFF800000> : vector<10xf32>
    %254 = vector.multi_reduction <maximumf>, %253, %cst_194 [0] : vector<2x10xf32> to vector<10xf32>
    %255 = vector.shape_cast %254 : vector<10xf32> to vector<1x10xf32>
    %cst_195 = arith.constant 0.000000e+00 : f32
    %256 = vector.broadcast %cst_195 : f32 to vector<1x10xf32>
    %257 = arith.maximumf %255, %256 : vector<1x10xf32>
    %c1_196 = arith.constant 1 : index
    %c0_197 = arith.constant 0 : index
    %258 = vector.load %arg13[%c1_196, %c0_197] : memref<2x40xf32, #tpu.memory_space<vmem>>, vector<1x10xf32>
    tpu.vector_store %arg13[%c1_196, %c0_197], %257 {strides = array<i32>} : memref<2x40xf32, #tpu.memory_space<vmem>>, vector<1x10xf32>,
    %c51 = arith.constant 51 : index
    %c0_198 = arith.constant 0 : index
    %259 = vector.load %arg12[%c51, %c0_198] : memref<82x10xf32, #tpu.memory_space<vmem>>, vector<2x10xf32>
    %c58 = arith.constant 58 : index
    %c0_199 = arith.constant 0 : index
    %260 = vector.load %arg12[%c58, %c0_199] : memref<82x10xf32, #tpu.memory_space<vmem>>, vector<2x10xf32>
    %261 = arith.maximumf %259, %260 : vector<2x10xf32>
    %cst_200 = arith.constant dense<0xFF800000> : vector<10xf32>
    %262 = vector.multi_reduction <maximumf>, %261, %cst_200 [0] : vector<2x10xf32> to vector<10xf32>
    %263 = vector.shape_cast %262 : vector<10xf32> to vector<1x10xf32>
    %cst_201 = arith.constant 0.000000e+00 : f32
    %264 = vector.broadcast %cst_201 : f32 to vector<1x10xf32>
    %265 = arith.maximumf %263, %264 : vector<1x10xf32>
    %c1_202 = arith.constant 1 : index
    %c10_203 = arith.constant 10 : index
    %266 = vector.load %arg13[%c1_202, %c10_203] : memref<2x40xf32, #tpu.memory_space<vmem>>, vector<1x10xf32>
    tpu.vector_store %arg13[%c1_202, %c10_203], %265 {strides = array<i32>} : memref<2x40xf32, #tpu.memory_space<vmem>>, vector<1x10xf32>,
    %c63_204 = arith.constant 63 : index
    %c0_205 = arith.constant 0 : index
    %267 = vector.load %arg12[%c63_204, %c0_205] : memref<82x10xf32, #tpu.memory_space<vmem>>, vector<2x10xf32>
    %c70_206 = arith.constant 70 : index
    %c0_207 = arith.constant 0 : index
    %268 = vector.load %arg12[%c70_206, %c0_207] : memref<82x10xf32, #tpu.memory_space<vmem>>, vector<2x10xf32>
    %269 = arith.maximumf %267, %268 : vector<2x10xf32>
    %cst_208 = arith.constant dense<0xFF800000> : vector<10xf32>
    %270 = vector.multi_reduction <maximumf>, %269, %cst_208 [0] : vector<2x10xf32> to vector<10xf32>
    %271 = vector.shape_cast %270 : vector<10xf32> to vector<1x10xf32>
    %cst_209 = arith.constant 0.000000e+00 : f32
    %272 = vector.broadcast %cst_209 : f32 to vector<1x10xf32>
    %273 = arith.maximumf %271, %272 : vector<1x10xf32>
    %c1_210 = arith.constant 1 : index
    %c20_211 = arith.constant 20 : index
    %274 = vector.load %arg13[%c1_210, %c20_211] : memref<2x40xf32, #tpu.memory_space<vmem>>, vector<1x10xf32>
    tpu.vector_store %arg13[%c1_210, %c20_211], %273 {strides = array<i32>} : memref<2x40xf32, #tpu.memory_space<vmem>>, vector<1x10xf32>,
    %c65_212 = arith.constant 65 : index
    %c0_213 = arith.constant 0 : index
    %275 = vector.load %arg12[%c65_212, %c0_213] : memref<82x10xf32, #tpu.memory_space<vmem>>, vector<2x10xf32>
    %c72 = arith.constant 72 : index
    %c0_214 = arith.constant 0 : index
    %276 = vector.load %arg12[%c72, %c0_214] : memref<82x10xf32, #tpu.memory_space<vmem>>, vector<2x10xf32>
    %277 = arith.maximumf %275, %276 : vector<2x10xf32>
    %cst_215 = arith.constant dense<0xFF800000> : vector<10xf32>
    %278 = vector.multi_reduction <maximumf>, %277, %cst_215 [0] : vector<2x10xf32> to vector<10xf32>
    %279 = vector.shape_cast %278 : vector<10xf32> to vector<1x10xf32>
    %cst_216 = arith.constant 0.000000e+00 : f32
    %280 = vector.broadcast %cst_216 : f32 to vector<1x10xf32>
    %281 = arith.maximumf %279, %280 : vector<1x10xf32>
    %c1_217 = arith.constant 1 : index
    %c30_218 = arith.constant 30 : index
    %282 = vector.load %arg13[%c1_217, %c30_218] : memref<2x40xf32, #tpu.memory_space<vmem>>, vector<1x10xf32>
    tpu.vector_store %arg13[%c1_217, %c30_218], %281 {strides = array<i32>} : memref<2x40xf32, #tpu.memory_space<vmem>>, vector<1x10xf32>,
    %c0_219 = arith.constant 0 : index
    %c0_220 = arith.constant 0 : index
    %283 = vector.load %arg13[%c0_219, %c0_220] : memref<2x40xf32, #tpu.memory_space<vmem>>, vector<2x40xf32>
    %c0_221 = arith.constant 0 : index
    %c0_222 = arith.constant 0 : index
    %284 = vector.load %arg6[%c0_221, %c0_222] : memref<40x10xf32, #tpu.memory_space<vmem>>, vector<40x10xf32>
    %cst_223 = arith.constant dense<0.000000e+00> : vector<2x10xf32>
    %285 = tpu.matmul %283, %284, %cst_223 {dimension_numbers = #tpu.dot_dimension_numbers<[1], [0], [0], [1], [0, 0, 1, 1], [], []>} : vector<2x40xf32>, vector<40x10xf32>, vector<2x10xf32> -> vector<2x10xf32>
    %c0_224 = arith.constant 0 : index
    %c0_225 = arith.constant 0 : index
    %286 = vector.load %arg7[%c0_224, %c0_225] : memref<1x10xf32, #tpu.memory_space<vmem>>, vector<1x10xf32>
    %287 = vector.broadcast %286 : vector<1x10xf32> to vector<2x10xf32>
    %288 = arith.addf %285, %287 : vector<2x10xf32>
    %cst_226 = arith.constant dense<0xFF800000> : vector<2xf32>
    %289 = vector.multi_reduction <maximumf>, %288, %cst_226 [1] : vector<2x10xf32> to vector<2xf32>
    %290 = vector.shape_cast %289 : vector<2xf32> to vector<2x1xf32>
    %291 = vector.broadcast %290 : vector<2x1xf32> to vector<2x10xf32>
    %292 = arith.subf %288, %291 : vector<2x10xf32>
    %293 = math.exp %292 : vector<2x10xf32>
    %cst_227 = arith.constant dense<0.000000e+00> : vector<2xf32>
    %294 = vector.multi_reduction <add>, %293, %cst_227 [1] : vector<2x10xf32> to vector<2xf32>
    %295 = vector.shape_cast %294 : vector<2xf32> to vector<2x1xf32>
    %296 = tpu.reciprocal %295 {approx = true} : vector<2x1xf32> -> vector<2x1xf32>
    %297 = vector.broadcast %296 : vector<2x1xf32> to vector<2x10xf32>
    %298 = arith.mulf %293, %297 : vector<2x10xf32>
    %299 = vector.shape_cast %288 : vector<2x10xf32> to vector<1x2x10xf32>
    %c0_228 = arith.constant 0 : index
    %c0_229 = arith.constant 0 : index
    %c0_230 = arith.constant 0 : index
    %300 = vector.load %arg8[%c0_228, %c0_229, %c0_230] : memref<1x2x20xf32, #tpu.memory_space<vmem>>, vector<1x2x10xf32>
    tpu.vector_store %arg8[%c0_228, %c0_229, %c0_230], %299 {strides = array<i32>} : memref<1x2x20xf32, #tpu.memory_space<vmem>>, vector<1x2x10xf32>,
    %301 = vector.shape_cast %298 : vector<2x10xf32> to vector<1x2x10xf32>
    %c0_231 = arith.constant 0 : index
    %c0_232 = arith.constant 0 : index
    %c10_233 = arith.constant 10 : index
    %302 = vector.load %arg8[%c0_231, %c0_232, %c10_233] : memref<1x2x20xf32, #tpu.memory_space<vmem>>, vector<1x2x10xf32>
    tpu.vector_store %arg8[%c0_231, %c0_232, %c10_233], %301 {strides = array<i32>} : memref<1x2x20xf32, #tpu.memory_space<vmem>>, vector<1x2x10xf32>,
    return
  }
  func.func @transform_0(%arg0: i32) -> (i32, i32) {
    %c0_i32 = arith.constant 0 : i32
    %c0_i32_0 = arith.constant 0 : i32
    return %arg0, %c0_i32 : i32, i32
  }
  func.func @transform_1(%arg0: i32) -> (i32, i32) {
    %c0_i32 = arith.constant 0 : i32
    %c0_i32_0 = arith.constant 0 : i32
    %c0_i32_1 = arith.constant 0 : i32
    return %c0_i32, %c0_i32_0 : i32, i32
  }
  func.func @transform_2(%arg0: i32) -> (i32, i32) {
    %c0_i32 = arith.constant 0 : i32
    %c0_i32_0 = arith.constant 0 : i32
    %c0_i32_1 = arith.constant 0 : i32
    return %c0_i32, %c0_i32_0 : i32, i32
  }
  func.func @transform_3(%arg0: i32) -> (i32, i32) {
    %c0_i32 = arith.constant 0 : i32
    %c0_i32_0 = arith.constant 0 : i32
    %c0_i32_1 = arith.constant 0 : i32
    return %c0_i32, %c0_i32_0 : i32, i32
  }
  func.func @transform_4(%arg0: i32) -> (i32, i32) {
    %c0_i32 = arith.constant 0 : i32
    %c0_i32_0 = arith.constant 0 : i32
    %c0_i32_1 = arith.constant 0 : i32
    return %c0_i32, %c0_i32_0 : i32, i32
  }
  func.func @transform_5(%arg0: i32) -> (i32, i32) {
    %c0_i32 = arith.constant 0 : i32
    %c0_i32_0 = arith.constant 0 : i32
    %c0_i32_1 = arith.constant 0 : i32
    return %c0_i32, %c0_i32_0 : i32, i32
  }
  func.func @transform_6(%arg0: i32) -> (i32, i32) {
    %c0_i32 = arith.constant 0 : i32
    %c0_i32_0 = arith.constant 0 : i32
    %c0_i32_1 = arith.constant 0 : i32
    return %c0_i32, %c0_i32_0 : i32, i32
  }
  func.func @transform_7(%arg0: i32) -> (i32, i32, i32) {
    %c0_i32 = arith.constant 0 : i32
    %c0_i32_0 = arith.constant 0 : i32
    %c0_i32_1 = arith.constant 0 : i32
    return %arg0, %c0_i32, %c0_i32_0 : i32, i32, i32
  }
}

</mosaic_0001>

<bundles_post_ra>
// kernel: mnist_cnn_forward.1
= control target key start
LH: loop header
LB: loop body
LE: loop exit
PB: predicated region body
PF: predicated region fallthrough
CT: control target
= control target key end

     0   :  { %v3395_v0 = vmov 0   ;;  %vm1013_vm0 = vcmask 39936   ;;  %vm1043_vm1 = vcmask 38912   ;;  %s3396_s23 = smov 5   ;;  %s3397_s24 = smov 10   ;;  %vm2868_vm2 = vcmask 1044480   ;;  %s5354_s0 = inlined_call_operand.vmem [shape: f32[512,1], index: 0, kind: input, shape index: {}]   ;;  %s5355_s1 = inlined_call_operand.vmem [shape: f32[4,5], index: 1, kind: input, shape index: {}]   ;;  %s5356_s2 = inlined_call_operand.vmem [shape: f32[1,5], index: 2, kind: input, shape index: {}]   ;;  %s5357_s3 = inlined_call_operand.vmem [shape: f32[45,10], index: 3, kind: input, shape index: {}]   ;;  %s5358_s4 = inlined_call_operand.vmem [shape: f32[1,10], index: 4, kind: input, shape index: {}]   ;;  %s5359_s5 = inlined_call_operand.vmem [shape: f32[40,10], index: 5, kind: input, shape index: {}]   ;;  %s5360_s6 = inlined_call_operand.vmem [shape: f32[1,10], index: 6, kind: input, shape index: {}]   ;;  %s5361_s7 = inlined_call_operand.vmem [shape: f32[1,2,20], index: 7, kind: output, shape index: {}]  }
   0x1   :  { %3380 = vset.pattern.permute.xlu1 %v3395_v0  ;;  %3379 = vset.pattern.permute.xlu0 %v3395_v0  ;;  %v3451_v1 = vld [vmem:[%s5354_s0 + $0x10] sm:$0xff]  ;;  %v26_v2 = vld [vmem:[%s5354_s0] sm:$0xff]  ;;  %v3460_v3 = vld [vmem:[%s5354_s0 + $0x18] sm:$0xff]  ;;  %s3398_s25 = smov 15   ;;  %s3399_s9 = smov 20   ;;  %vm3405_vm3 = vmmov 1  }
   0x2   :  { %69 = vperm.xlu1 %3380, %v3451_v1   ;;  %59 = vperm.xlu0 %3379, %v26_v2   ;;  %v27_v4 = vld [vmem:[%s5354_s0 + $0x8] sm:$0xff]  ;;  %v3474_v6 = vld [vmem:[%s5354_s0 + $0x20] sm:$0xff]  ;;  %v3481_v7 = vld [vmem:[%s5354_s0 + $0x38] sm:$0xff]  ;;  %s3400_s13 = smov 25   ;;  %s3402_s14 = smov 35   ;;  %vm3406_vm5 = vmmov 0  }
   0x3   :  { %v3469_v5 = vld [vmem:[%s5354_s0 + $0x28] sm:$0xff]  ;;  %v3486_v8 = vld [vmem:[%s5354_s0 + $0x30] sm:$0xff]  ;;  %v3498_v10 = vld [vmem:[%s5354_s0 + $0x40] sm:$0xff]  ;;  %s3404_s19 = smov 40   ;;  %vm2264_vm6 = vcmask 33792   ;;  %vm2321_vm7 = vcmask 80936  }
   0x4   :  { %v3493_v9 = vld [vmem:[%s5354_s0 + $0x48] sm:$0xff]  ;;  %v3505_v11 = vld [vmem:[%s5354_s0 + $0x58] sm:$0xff]  ;;  %v3510_v12 = vld [vmem:[%s5354_s0 + $0x50] sm:$0xff]  ;;  %vm2389_vm8 = vcmask 121936   ;;  %vm2457_vm9 = vcmask 162936   ;;  %vm2525_vm10 = vcmask 203936  }
   0x5   :  { %v3517_v13 = vld [vmem:[%s5354_s0 + $0x68] sm:$0xff]  ;;  %v3522_v14 = vld [vmem:[%s5354_s0 + $0x60] sm:$0xff]  ;;  %v3529_v15 = vld [vmem:[%s5354_s0 + $0x78] sm:$0xff]  ;;  %vm2593_vm11 = vcmask 244936   ;;  %vm2661_vm12 = vcmask 285936   ;;  %vm2729_vm13 = vcmask 326936  }
   0x6   :  { %74 = vperm.xlu1 %3380, %v3460_v3   ;;  %64 = vperm.xlu0 %3379, %v27_v4   ;;  %v3534_v16 = vld [vmem:[%s5354_s0 + $0x70] sm:$0xff]  ;;  %v3541_v17 = vld [vmem:[%s5354_s0 + $0x88] sm:$0xff]  ;;  %v3546_v18 = vld [vmem:[%s5354_s0 + $0x80] sm:$0xff]  ;;  %vm5364_vm14 = vcmask 367936   ;;  %vm2834_vm15 = vcmask 367616  }
   0x7   :  { %v45_v19 = vld [vmem:[%s5354_s0 + $0x98] sm:$0xff]  ;;  %v44_v20 = vld [vmem:[%s5354_s0 + $0x90] sm:$0xff]  ;;  %v47_v21 = vld [vmem:[%s5354_s0 + $0xa8] sm:$0xff] }
   0x8   :  { %v46_v22 = vld [vmem:[%s5354_s0 + $0xa0] sm:$0xff]  ;;  %v49_v23 = vld [vmem:[%s5354_s0 + $0xb8] sm:$0xff]  ;;  %v48_v24 = vld [vmem:[%s5354_s0 + $0xb0] sm:$0xff] }
   0x9   :  { %v51_v25 = vld [vmem:[%s5354_s0 + $0xc8] sm:$0xff]  ;;  %v50_v26 = vld [vmem:[%s5354_s0 + $0xc0] sm:$0xff]  ;;  %v53_v27 = vld [vmem:[%s5354_s0 + $0xd8] sm:$0xff] }
   0xa   :  { %84 = vperm.xlu1 %3380, %v3469_v5   ;;  %79 = vperm.xlu0 %3379, %v3474_v6   ;;  %v52_v28 = vld [vmem:[%s5354_s0 + $0xd0] sm:$0xff]  ;;  %v55_v29 = vld [vmem:[%s5354_s0 + $0xe8] sm:$0x7f]  ;;  %v54_v30 = vld [vmem:[%s5354_s0 + $0xe0] sm:$0xff] }
   0xb   :  { %v242_v31 = vld [vmem:[%s5354_s0 + $0x9] sm:$0xff]  ;;  %v241_v32 = vld [vmem:[%s5354_s0 + $0x1] sm:$0xff]  ;;  %v3595_v33 = vld [vmem:[%s5354_s0 + $0x19] sm:$0xff] }
   0xc   :  { %v3600_v34 = vld [vmem:[%s5354_s0 + $0x11] sm:$0xff]  ;;  %v3607_v35 = vld [vmem:[%s5354_s0 + $0x29] sm:$0xff]  ;;  %v3612_v36 = vld [vmem:[%s5354_s0 + $0x21] sm:$0xff] }
   0xd   :  { %v3619_v37 = vld [vmem:[%s5354_s0 + $0x39] sm:$0xff]  ;;  %v3624_v38 = vld [vmem:[%s5354_s0 + $0x31] sm:$0xff]  ;;  %v3631_v39 = vld [vmem:[%s5354_s0 + $0x49] sm:$0xff] }
   0xe   :  { %94 = vperm.xlu1 %3380, %v3481_v7   ;;  %89 = vperm.xlu0 %3379, %v3486_v8   ;;  %v3636_v40 = vld [vmem:[%s5354_s0 + $0x41] sm:$0xff]  ;;  %v3643_v41 = vld [vmem:[%s5354_s0 + $0x59] sm:$0xff]  ;;  %v3648_v42 = vld [vmem:[%s5354_s0 + $0x51] sm:$0xff] }
   0xf   :  { %v3655_v43 = vld [vmem:[%s5354_s0 + $0x69] sm:$0xff]  ;;  %v3660_v44 = vld [vmem:[%s5354_s0 + $0x61] sm:$0xff]  ;;  %v3667_v45 = vld [vmem:[%s5354_s0 + $0x79] sm:$0xff] }
  0x10   :  { %v3672_v46 = vld [vmem:[%s5354_s0 + $0x71] sm:$0xff]  ;;  %v3679_v47 = vld [vmem:[%s5354_s0 + $0x89] sm:$0xff]  ;;  %v3684_v48 = vld [vmem:[%s5354_s0 + $0x81] sm:$0xff] }
  0x11   :  { %v260_v49 = vld [vmem:[%s5354_s0 + $0x99] sm:$0xff]  ;;  %v259_v50 = vld [vmem:[%s5354_s0 + $0x91] sm:$0xff]  ;;  %v262_v51 = vld [vmem:[%s5354_s0 + $0xa9] sm:$0xff] }
  0x12   :  { %104 = vperm.xlu1 %3380, %v3493_v9   ;;  %99 = vperm.xlu0 %3379, %v3498_v10   ;;  %v261_v52 = vld [vmem:[%s5354_s0 + $0xa1] sm:$0xff]  ;;  %v264_v53 = vld [vmem:[%s5354_s0 + $0xb9] sm:$0xff]  ;;  %v263_v54 = vld [vmem:[%s5354_s0 + $0xb1] sm:$0xff] }
  0x13   :  { %v266_v55 = vld [vmem:[%s5354_s0 + $0xc9] sm:$0xff]  ;;  %v265_v56 = vld [vmem:[%s5354_s0 + $0xc1] sm:$0xff]  ;;  %v268_v57 = vld [vmem:[%s5354_s0 + $0xd9] sm:$0xff] }
  0x14   :  { %v267_v58 = vld [vmem:[%s5354_s0 + $0xd1] sm:$0xff]  ;;  %v270_v59 = vld [vmem:[%s5354_s0 + $0xe9] sm:$0x7f]  ;;  %v269_v60 = vld [vmem:[%s5354_s0 + $0xe1] sm:$0xff] }
  0x15   :  { %v1045_v61 = vld [vmem:[%s5354_s0 + $0x100] sm:$0xff]  ;;  %v1047_v62 = vld [vmem:[%s5354_s0 + $0x110] sm:$0xff]  ;;  %v1046_v63 = vld [vmem:[%s5354_s0 + $0x108] sm:$0xff] }
  0x16   :  { %114 = vperm.xlu1 %3380, %v3505_v11   ;;  %109 = vperm.xlu0 %3379, %v3510_v12   ;;  %v1049_v0 = vld [vmem:[%s5354_s0 + $0x120] sm:$0xff]  ;;  %v1048_v2 = vld [vmem:[%s5354_s0 + $0x118] sm:$0xff]  ;;  %vm3352_vm4 = vmpackc.low %vm2868_vm2, %vm3405_vm3  ;;  %vm2468_vm2 = vcmask 156792   ;;  %vm2536_vm3 = vcmask 197792  }
  0x1a   :  { %124 = vperm.xlu1 %3380, %v3517_v13   ;;  %119 = vperm.xlu0 %3379, %v3522_v14  }
  0x1e   :  { %134 = vperm.xlu1 %3380, %v3529_v15   ;;  %129 = vperm.xlu0 %3379, %v3534_v16  }
  0x22   :  { %144 = vperm.xlu1 %3380, %v3541_v17   ;;  %139 = vperm.xlu0 %3379, %v3546_v18  }
  0x26   :  { %154 = vperm.xlu1 %3380, %v45_v19   ;;  %149 = vperm.xlu0 %3379, %v44_v20   ;;  %v1051_v19 = vld [vmem:[%s5354_s0 + $0x130] sm:$0xff]  ;;  %v1050_v20 = vld [vmem:[%s5354_s0 + $0x128] sm:$0xff] }
  0x2a   :  { %164 = vperm.xlu1 %3380, %v47_v21   ;;  %159 = vperm.xlu0 %3379, %v46_v22  }
  0x2e   :  { %174 = vperm.xlu1 %3380, %v49_v23   ;;  %169 = vperm.xlu0 %3379, %v48_v24   ;;  %v1260_v23 = vld [vmem:[%s5354_s0 + $0x101] sm:$0xff]  ;;  %v1052_v24 = vld [vmem:[%s5354_s0 + $0x138] sm:$0xff] }
  0x32   :  { %184 = vperm.xlu1 %3380, %v51_v25   ;;  %179 = vperm.xlu0 %3379, %v50_v26  }
  0x36   :  { %194 = vperm.xlu1 %3380, %v53_v27   ;;  %189 = vperm.xlu0 %3379, %v52_v28   ;;  %v3767_v27 = vld [vmem:[%s5354_s0 + $0x111] sm:$0xff]  ;;  %v1261_v28 = vld [vmem:[%s5354_s0 + $0x109] sm:$0xff] }
  0x3a   :  { %204 = vperm.xlu1 %3380, %v55_v29   ;;  %199 = vperm.xlu0 %3379, %v54_v30  }
  0x3e   :  { %279 = vperm.xlu1 %3380, %v242_v31   ;;  %274 = vperm.xlu0 %3379, %v241_v32   ;;  %v3780_v31 = vld [vmem:[%s5354_s0 + $0x121] sm:$0xff]  ;;  %v3785_v32 = vld [vmem:[%s5354_s0 + $0x119] sm:$0xff] }
  0x42   :  { %289 = vperm.xlu1 %3380, %v3595_v33   ;;  %284 = vperm.xlu0 %3379, %v3600_v34  }
  0x46   :  { %299 = vperm.xlu1 %3380, %v3607_v35   ;;  %294 = vperm.xlu0 %3379, %v3612_v36  }
  0x4a   :  { %309 = vperm.xlu1 %3380, %v3619_v37   ;;  %304 = vperm.xlu0 %3379, %v3624_v38  }
  0x4e   :  { %319 = vperm.xlu1 %3380, %v3631_v39   ;;  %314 = vperm.xlu0 %3379, %v3636_v40  }
  0x52   :  { %329 = vperm.xlu1 %3380, %v3643_v41   ;;  %324 = vperm.xlu0 %3379, %v3648_v42  }
  0x56   :  { %339 = vperm.xlu1 %3380, %v3655_v43   ;;  %334 = vperm.xlu0 %3379, %v3660_v44  }
  0x5a   :  { %349 = vperm.xlu1 %3380, %v3667_v45   ;;  %344 = vperm.xlu0 %3379, %v3672_v46  }
  0x5e   :  { %359 = vperm.xlu1 %3380, %v3679_v47   ;;  %354 = vperm.xlu0 %3379, %v3684_v48  }
  0x62   :  { %369 = vperm.xlu1 %3380, %v260_v49   ;;  %364 = vperm.xlu0 %3379, %v259_v50  }
  0x66   :  { %379 = vperm.xlu1 %3380, %v262_v51   ;;  %374 = vperm.xlu0 %3379, %v261_v52   ;;  %v3796_v51 = vld [vmem:[%s5354_s0 + $0x131] sm:$0xff]  ;;  %v3801_v52 = vld [vmem:[%s5354_s0 + $0x129] sm:$0xff] }
  0x6a   :  { %389 = vperm.xlu1 %3380, %v264_v53   ;;  %384 = vperm.xlu0 %3379, %v263_v54  }
  0x6e   :  { %399 = vperm.xlu1 %3380, %v266_v55   ;;  %394 = vperm.xlu0 %3379, %v265_v56   ;;  %v3812_v55 = vld [vmem:[%s5354_s0 + $0x139] sm:$0xff] }
  0x72   :  { %409 = vperm.xlu1 %3380, %v268_v57   ;;  %404 = vperm.xlu0 %3379, %v267_v58  }
  0x76   :  { %419 = vperm.xlu1 %3380, %v270_v59   ;;  %414 = vperm.xlu0 %3379, %v269_v60  }
  0x7a   :  { %1078 = vperm.xlu1 %3380, %v1045_v61   ;;  %519 = vperm.xlu0 %3379, %v3451_v1  }
  0x7e   :  { %1088 = vperm.xlu1 %3380, %v1047_v62   ;;  %1083 = vperm.xlu0 %3379, %v1046_v63  }
  0x81   :  { %v3740_v4 = vpop.permute.xlu1 %69  ;;  %v3742_v1 = vpop.permute.xlu0 %59 }
  0x82   :  { %1098 = vperm.xlu1 %3380, %v1049_v0   ;;  %1093 = vperm.xlu0 %3379, %v1048_v2  }
  0x85   :  { %v3750_v21 = vpop.permute.xlu1 %74  ;;  %v3752_v22 = vpop.permute.xlu0 %64 }
  0x86   :  { %1108 = vperm.xlu1 %3380, %v1051_v19   ;;  %1103 = vperm.xlu0 %3379, %v1050_v20  }
  0x89   :  { %v3760_v25 = vpop.permute.xlu1 %84  ;;  %v3762_v26 = vpop.permute.xlu0 %79 }
  0x8a   :  { %1293 = vperm.xlu1 %3380, %v1260_v23   ;;  %1113 = vperm.xlu0 %3379, %v1052_v24  }
  0x8d   :  { %v3772_v29 = vpop.permute.xlu1 %94  ;;  %v3774_v30 = vpop.permute.xlu0 %89 }
  0x8e   :  { %1303 = vperm.xlu1 %3380, %v3767_v27   ;;  %1298 = vperm.xlu0 %3379, %v1261_v28  }
  0x91   :  { %v3787_v49 = vpop.permute.xlu1 %104  ;;  %v3789_v50 = vpop.permute.xlu0 %99 }
  0x92   :  { %5365 = vst [vmem:[#allocation7_spill] sm:$0xff] %v3787_v49  ;;  %5366 = vst [vmem:[#allocation8_spill] sm:$0xff] %v3789_v50  ;;  %1313 = vperm.xlu1 %3380, %v3780_v31   ;;  %1308 = vperm.xlu0 %3379, %v3785_v32  }
  0x95   :  { %v3803_v53 = vpop.permute.xlu1 %114  ;;  %v3805_v54 = vpop.permute.xlu0 %109 }
  0x96   :  { %5367 = vst [vmem:[#allocation9_spill] sm:$0xff] %v3803_v53  ;;  %5368 = vst [vmem:[#allocation10_spill] sm:$0xff] %v3805_v54  ;;  %1323 = vperm.xlu1 %3380, %v3796_v51   ;;  %1318 = vperm.xlu0 %3379, %v3801_v52   ;;  %v4097_v54 = vld [vmem:[%s5354_s0 + $0x199] sm:$0xff]  ;;  %v4102_v53 = vld [vmem:[%s5354_s0 + $0x191] sm:$0xff] }
  0x97   :  { %5408 = vst [vmem:[#allocation50_spill] sm:$0xff] %v4097_v54  ;;  %5409 = vst [vmem:[#allocation51_spill] sm:$0xff] %v4102_v53 }
  0x99   :  { %v3814_v56 = vpop.permute.xlu1 %124  ;;  %v3816_v57 = vpop.permute.xlu0 %119 }
  0x9a   :  { %5369 = vst [vmem:[#allocation11_spill] sm:$0xff] %v3814_v56  ;;  %5370 = vst [vmem:[#allocation12_spill] sm:$0xff] %v3816_v57  ;;  %524 = vperm.xlu1 %3380, %v3460_v3   ;;  %1328 = vperm.xlu0 %3379, %v3812_v55  }
  0x9d   :  { %v3820_v58 = vpop.permute.xlu1 %134  ;;  %v3822_v59 = vpop.permute.xlu0 %129 }
  0x9e   :  { %5371 = vst [vmem:[#allocation13_spill] sm:$0xff] %v3820_v58  ;;  %5372 = vst [vmem:[#allocation14_spill] sm:$0xff] %v3822_v59  ;;  %534 = vperm.xlu1 %3380, %v3469_v5   ;;  %529 = vperm.xlu0 %3379, %v3474_v6  }
  0xa1   :  { %v3826_v60 = vpop.permute.xlu1 %144  ;;  %v3828_v61 = vpop.permute.xlu0 %139 }
  0xa2   :  { %5373 = vst [vmem:[#allocation15_spill] sm:$0xff] %v3826_v60  ;;  %5374 = vst [vmem:[#allocation16_spill] sm:$0xff] %v3828_v61  ;;  %544 = vperm.xlu1 %3380, %v3481_v7   ;;  %539 = vperm.xlu0 %3379, %v3486_v8  }
  0xa5   :  { %v3832_v63 = vpop.permute.xlu1 %154  ;;  %v3834_v3 = vpop.permute.xlu0 %149 }
  0xa6   :  { %5375 = vst [vmem:[#allocation17_spill] sm:$0xff] %v3832_v63  ;;  %5376 = vst [vmem:[#allocation18_spill] sm:$0xff] %v3834_v3  ;;  %554 = vperm.xlu1 %3380, %v3493_v9   ;;  %549 = vperm.xlu0 %3379, %v3498_v10   ;;  %v1512_v9 = vld [vmem:[%s5354_s0 + $0x148] sm:$0xff]  ;;  %v1511_v10 = vld [vmem:[%s5354_s0 + $0x140] sm:$0xff] }
  0xa9   :  { %v3838_v23 = vpop.permute.xlu1 %164  ;;  %v3840_v5 = vpop.permute.xlu0 %159 }
  0xaa   :  { %5377 = vst [vmem:[#allocation19_spill] sm:$0xff] %v3838_v23  ;;  %5378 = vst [vmem:[#allocation20_spill] sm:$0xff] %v3840_v5  ;;  %1543 = vperm.xlu1 %3380, %v1048_v2   ;;  %1538 = vperm.xlu0 %3379, %v1047_v62  }
  0xad   :  { %v3842_v6 = vpop.permute.xlu1 %174  ;;  %v3844_v28 = vpop.permute.xlu0 %169 }
  0xae   :  { %5379 = vst [vmem:[#allocation21_spill] sm:$0xff] %v3842_v6  ;;  %5380 = vst [vmem:[#allocation22_spill] sm:$0xff] %v3844_v28  ;;  %1553 = vperm.xlu1 %3380, %v1050_v20   ;;  %1548 = vperm.xlu0 %3379, %v1049_v0  }
  0xb1   :  { %v3846_v7 = vpop.permute.xlu1 %184  ;;  %v3848_v8 = vpop.permute.xlu0 %179 }
  0xb2   :  { %5381 = vst [vmem:[#allocation23_spill] sm:$0xff] %v3846_v7  ;;  %5382 = vst [vmem:[#allocation24_spill] sm:$0xff] %v3848_v8  ;;  %1563 = vperm.xlu1 %3380, %v1052_v24   ;;  %1558 = vperm.xlu0 %3379, %v1051_v19   ;;  %v1056_v19 = vld [vmem:[%s5354_s0 + $0x158] sm:$0xff]  ;;  %v1055_v24 = vld [vmem:[%s5354_s0 + $0x150] sm:$0xff] }
  0xb5   :  { %v3856_v62 = vpop.permute.xlu1 %194  ;;  %v3858_v2 = vpop.permute.xlu0 %189 }
  0xb6   :  { %5383 = vst [vmem:[#allocation25_spill] sm:$0xff] %v3856_v62  ;;  %5384 = vst [vmem:[#allocation26_spill] sm:$0xff] %v3858_v2  ;;  %1573 = vperm.xlu1 %3380, %v1512_v9   ;;  %1568 = vperm.xlu0 %3379, %v1511_v10   ;;  %v3883_v2 = vld [vmem:[%s5354_s0 + $0x159] sm:$0xff]  ;;  %v3888_v62 = vld [vmem:[%s5354_s0 + $0x151] sm:$0xff] }
  0xb9   :  { %v205_v0 = vpop.permute.xlu1 %204  ;;  %v200_v20 = vpop.permute.xlu0 %199 }
  0xba   :  { %1123 = vperm.xlu1 %3380, %v1512_v9   ;;  %1118 = vperm.xlu0 %3379, %v1511_v10   ;;  %v1269_v0 = vld [vmem:[%s5354_s0 + $0x149] sm:$0xff]  ;;  %v1268_v9 = vld [vmem:[%s5354_s0 + $0x141] sm:$0xff] }
  0xbd   :  { %v3866_v8 = vpop.permute.xlu1 %279  ;;  %v3868_v7 = vpop.permute.xlu0 %274 }
  0xbe   :  { %1133 = vperm.xlu1 %3380, %v1056_v19   ;;  %1128 = vperm.xlu0 %3379, %v1055_v24  }
  0xc1   :  { %v3876_v10 = vpop.permute.xlu1 %289  ;;  %v3878_v20 = vpop.permute.xlu0 %284 }
  0xc2   :  { %1338 = vperm.xlu1 %3380, %v1269_v0   ;;  %1333 = vperm.xlu0 %3379, %v1268_v9  }
  0xc5   :  { %v3890_v28 = vpop.permute.xlu1 %299  ;;  %v3892_v6 = vpop.permute.xlu0 %294 }
  0xc6   :  { %1348 = vperm.xlu1 %3380, %v3883_v2   ;;  %1343 = vperm.xlu0 %3379, %v3888_v62  }
  0xc9   :  { %v3896_v5 = vpop.permute.xlu1 %309  ;;  %v3898_v23 = vpop.permute.xlu0 %304 }
  0xca   :  { %564 = vperm.xlu1 %3380, %v3505_v11   ;;  %559 = vperm.xlu0 %3379, %v3510_v12  }
  0xcd   :  { %v3902_v3 = vpop.permute.xlu1 %319  ;;  %v3904_v63 = vpop.permute.xlu0 %314 }
  0xce   :  { %5385 = vst [vmem:[#allocation27_spill] sm:$0xff] %v3902_v3  ;;  %5386 = vst [vmem:[#allocation28_spill] sm:$0xff] %v3904_v63  ;;  %574 = vperm.xlu1 %3380, %v3517_v13   ;;  %569 = vperm.xlu0 %3379, %v3522_v14  }
  0xd1   :  { %v3908_v61 = vpop.permute.xlu1 %329  ;;  %v3910_v60 = vpop.permute.xlu0 %324 }
  0xd2   :  { %5387 = vst [vmem:[#allocation29_spill] sm:$0xff] %v3908_v61  ;;  %5388 = vst [vmem:[#allocation30_spill] sm:$0xff] %v3910_v60  ;;  %769 = vperm.xlu1 %3380, %v3595_v33   ;;  %764 = vperm.xlu0 %3379, %v3600_v34  }
  0xd5   :  { %v3914_v59 = vpop.permute.xlu1 %339  ;;  %v3916_v11 = vpop.permute.xlu0 %334 }
  0xd6   :  { %5389 = vst [vmem:[#allocation31_spill] sm:$0xff] %v3914_v59  ;;  %5390 = vst [vmem:[#allocation32_spill] sm:$0xff] %v3916_v11  ;;  %779 = vperm.xlu1 %3380, %v3607_v35   ;;  %774 = vperm.xlu0 %3379, %v3612_v36  }
  0xd9   :  { %v3920_v12 = vpop.permute.xlu1 %349  ;;  %v3922_v13 = vpop.permute.xlu0 %344 }
  0xda   :  { %5391 = vst [vmem:[#allocation33_spill] sm:$0xff] %v3920_v12  ;;  %5392 = vst [vmem:[#allocation34_spill] sm:$0xff] %v3922_v13  ;;  %789 = vperm.xlu1 %3380, %v3619_v37   ;;  %784 = vperm.xlu0 %3379, %v3624_v38  }
  0xdd   :  { %v3926_v14 = vpop.permute.xlu1 %359  ;;  %v3928_v33 = vpop.permute.xlu0 %354 }
  0xde   :  { %5393 = vst [vmem:[#allocation35_spill] sm:$0xff] %v3926_v14  ;;  %5394 = vst [vmem:[#allocation36_spill] sm:$0xff] %v3928_v33  ;;  %799 = vperm.xlu1 %3380, %v3631_v39   ;;  %794 = vperm.xlu0 %3379, %v3636_v40  }
  0xe1   :  { %v3932_v34 = vpop.permute.xlu1 %369  ;;  %v3934_v35 = vpop.permute.xlu0 %364 }
  0xe2   :  { %5395 = vst [vmem:[#allocation37_spill] sm:$0xff] %v3932_v34  ;;  %5396 = vst [vmem:[#allocation38_spill] sm:$0xff] %v3934_v35  ;;  %1788 = vperm.xlu1 %3380, %v3785_v32   ;;  %1783 = vperm.xlu0 %3379, %v3767_v27  }
  0xe5   :  { %v3938_v36 = vpop.permute.xlu1 %379  ;;  %v3940_v37 = vpop.permute.xlu0 %374 }
  0xe6   :  { %5397 = vst [vmem:[#allocation39_spill] sm:$0xff] %v3938_v36  ;;  %5398 = vst [vmem:[#allocation40_spill] sm:$0xff] %v3940_v37  ;;  %1798 = vperm.xlu1 %3380, %v3801_v52   ;;  %1793 = vperm.xlu0 %3379, %v3780_v31   ;;  %v1516_v31 = vld [vmem:[%s5354_s0 + $0x168] sm:$0xff] }
  0xe9   :  { %v3944_v38 = vpop.permute.xlu1 %389  ;;  %v3946_v39 = vpop.permute.xlu0 %384 }
  0xea   :  { %5399 = vst [vmem:[#allocation41_spill] sm:$0xff] %v3944_v38  ;;  %5400 = vst [vmem:[#allocation42_spill] sm:$0xff] %v3946_v39  ;;  %1808 = vperm.xlu1 %3380, %v3812_v55   ;;  %1803 = vperm.xlu0 %3379, %v3796_v51   ;;  %v1515_v51 = vld [vmem:[%s5354_s0 + $0x160] sm:$0xff] }
  0xed   :  { %v3950_v40 = vpop.permute.xlu1 %399  ;;  %v3952_v32 = vpop.permute.xlu0 %394 }
  0xee   :  { %5401 = vst [vmem:[#allocation43_spill] sm:$0xff] %v3950_v40  ;;  %5402 = vst [vmem:[#allocation44_spill] sm:$0xff] %v3952_v32  ;;  %1818 = vperm.xlu1 %3380, %v1269_v0   ;;  %1813 = vperm.xlu0 %3379, %v1268_v9   ;;  %v4003_v32 = vld [vmem:[%s5354_s0 + $0x179] sm:$0xff]  ;;  %v4008_v40 = vld [vmem:[%s5354_s0 + $0x171] sm:$0xff] }
  0xf1   :  { %v3954_v27 = vpop.permute.xlu1 %409  ;;  %v3956_v37 = vpop.permute.xlu0 %404 }
  0xf2   :  { %5403 = vst [vmem:[#allocation45_spill] sm:$0xff] %v3954_v27  ;;  %5404 = vst [vmem:[#allocation46_spill] sm:$0xff] %v3956_v37  ;;  %1583 = vperm.xlu1 %3380, %v1056_v19   ;;  %1578 = vperm.xlu0 %3379, %v1055_v24  }
  0xf5   :  { %v420_v52 = vpop.permute.xlu1 %419  ;;  %v415_v55 = vpop.permute.xlu0 %414 }
  0xf6   :  { %1593 = vperm.xlu1 %3380, %v1516_v31   ;;  %1588 = vperm.xlu0 %3379, %v1515_v51  }
  0xf9   :  { %v3964_v0 = vpop.permute.xlu1 %1078  ;;  %v3966_v9 = vpop.permute.xlu0 %519 }
  0xfa   :  { %809 = vperm.xlu1 %3380, %v3643_v41   ;;  %804 = vperm.xlu0 %3379, %v3648_v42   ;;  %v1060_v41 = vld [vmem:[%s5354_s0 + $0x178] sm:$0xff]  ;;  %v1059_v42 = vld [vmem:[%s5354_s0 + $0x170] sm:$0xff] }
  0xfd   :  { %v3970_v19 = vpop.permute.xlu1 %1088  ;;  %v3972_v24 = vpop.permute.xlu0 %1083 }
  0xfe   :  { %819 = vperm.xlu1 %3380, %v3655_v43   ;;  %814 = vperm.xlu0 %3379, %v3660_v44   ;;  %v1273_v43 = vld [vmem:[%s5354_s0 + $0x169] sm:$0xff]  ;;  %v1272_v44 = vld [vmem:[%s5354_s0 + $0x161] sm:$0xff] }
 0x101   :  { %v3976_v52 = vpop.permute.xlu1 %1098  ;;  %v3978_v55 = vpop.permute.xlu0 %1093 }
 0x102   :  { %1143 = vperm.xlu1 %3380, %v1516_v31   ;;  %1138 = vperm.xlu0 %3379, %v1515_v51  }
 0x105   :  { %v3986_v37 = vpop.permute.xlu1 %1108  ;;  %v3988_v27 = vpop.permute.xlu0 %1103 }
 0x106   :  { %1153 = vperm.xlu1 %3380, %v1060_v41   ;;  %1148 = vperm.xlu0 %3379, %v1059_v42  }
 0x109   :  { %v3996_v31 = vpop.permute.xlu1 %1293  ;;  %v3998_v51 = vpop.permute.xlu0 %1113 }
 0x10a   :  { %1358 = vperm.xlu1 %3380, %v1273_v43   ;;  %1353 = vperm.xlu0 %3379, %v1272_v44  }
 0x10d   :  { %v4010_v39 = vpop.permute.xlu1 %1303  ;;  %v4012_v38 = vpop.permute.xlu0 %1298 }
 0x10e   :  { %1368 = vperm.xlu1 %3380, %v4003_v32   ;;  %1363 = vperm.xlu0 %3379, %v4008_v40  }
 0x111   :  { %v4016_v36 = vpop.permute.xlu1 %1313  ;;  %v4018_v35 = vpop.permute.xlu0 %1308 }
 0x112   :  { %584 = vperm.xlu1 %3380, %v3529_v15   ;;  %579 = vperm.xlu0 %3379, %v3534_v16  }
 0x115   :  { %v4022_v34 = vpop.permute.xlu1 %1323  ;;  %v4024_v33 = vpop.permute.xlu0 %1318 }
 0x116   :  { %594 = vperm.xlu1 %3380, %v3541_v17   ;;  %589 = vperm.xlu0 %3379, %v3546_v18   ;;  %v1520_v17 = vld [vmem:[%s5354_s0 + $0x188] sm:$0xff]  ;;  %v1519_v18 = vld [vmem:[%s5354_s0 + $0x180] sm:$0xff] }
 0x119   :  { %v4028_v14 = vpop.permute.xlu1 %524  ;;  %v4030_v58 = vpop.permute.xlu0 %1328 }
 0x11a   :  { %1828 = vperm.xlu1 %3380, %v3883_v2   ;;  %1823 = vperm.xlu0 %3379, %v3888_v62  }
 0x11d   :  { %v4034_v13 = vpop.permute.xlu1 %534  ;;  %v4036_v15 = vpop.permute.xlu0 %529 }
 0x11e   :  { %1838 = vperm.xlu1 %3380, %v1273_v43   ;;  %1833 = vperm.xlu0 %3379, %v1272_v44  }
 0x121   :  { %v4038_v16 = vpop.permute.xlu1 %544  ;;  %v4040_v12 = vpop.permute.xlu0 %539 }
 0x122   :  { %1603 = vperm.xlu1 %3380, %v1060_v41   ;;  %1598 = vperm.xlu0 %3379, %v1059_v42  }
 0x125   :  { %v4048_v62 = vpop.permute.xlu1 %554  ;;  %v4050_v2 = vpop.permute.xlu0 %549 }
 0x126   :  { %1613 = vperm.xlu1 %3380, %v1520_v17   ;;  %1608 = vperm.xlu0 %3379, %v1519_v18  }
 0x129   :  { %v4052_v43 = vpop.permute.xlu1 %1543  ;;  %v4054_v44 = vpop.permute.xlu0 %1538 }
 0x12a   :  { %829 = vperm.xlu1 %3380, %v3667_v45   ;;  %824 = vperm.xlu0 %3379, %v3672_v46   ;;  %v4071_v45 = vld [vmem:[%s5354_s0 + $0x198] sm:$0xff]  ;;  %v4076_v46 = vld [vmem:[%s5354_s0 + $0x190] sm:$0xff] }
 0x12d   :  { %v4058_v41 = vpop.permute.xlu1 %1553  ;;  %v4060_v42 = vpop.permute.xlu0 %1548 }
 0x12e   :  { %839 = vperm.xlu1 %3380, %v3679_v47   ;;  %834 = vperm.xlu0 %3379, %v3684_v48   ;;  %v1277_v48 = vld [vmem:[%s5354_s0 + $0x189] sm:$0xff] }
 0x131   :  { %v4064_v57 = vpop.permute.xlu1 %1563  ;;  %v4066_v56 = vpop.permute.xlu0 %1558 }
 0x132   :  { %1163 = vperm.xlu1 %3380, %v1520_v17   ;;  %1158 = vperm.xlu0 %3379, %v1519_v18   ;;  %v1276_v17 = vld [vmem:[%s5354_s0 + $0x181] sm:$0xff] }
 0x135   :  { %v4078_v11 = vpop.permute.xlu1 %1573  ;;  %v4080_v47 = vpop.permute.xlu0 %1568 }
 0x136   :  { %5405 = vst [vmem:[#allocation47_spill] sm:$0xff] %v4080_v47  ;;  %1173 = vperm.xlu1 %3380, %v4071_v45   ;;  %1168 = vperm.xlu0 %3379, %v4076_v46  }
 0x139   :  { %v4090_v18 = vpop.permute.xlu1 %1123  ;;  %v4092_v59 = vpop.permute.xlu0 %1118 }
 0x13a   :  { %5406 = vst [vmem:[#allocation48_spill] sm:$0xff] %v4090_v18  ;;  %5407 = vst [vmem:[#allocation49_spill] sm:$0xff] %v4092_v59  ;;  %1378 = vperm.xlu1 %3380, %v1277_v48   ;;  %1373 = vperm.xlu0 %3379, %v1276_v17  }
 0x13d   :  { %v4104_v60 = vpop.permute.xlu1 %1133  ;;  %v4106_v61 = vpop.permute.xlu0 %1128 }
 0x13e   :  { %5410 = vst [vmem:[#allocation52_spill] sm:$0xff] %v4104_v60  ;;  %5411 = vst [vmem:[#allocation53_spill] sm:$0xff] %v4106_v61  ;;  %1388 = vperm.xlu1 %3380, %v4097_v54   ;;  %1383 = vperm.xlu0 %3379, %v4102_v53   ;;  %v503_v61 = vld [vmem:[%s5354_s0 + $0x98] sm:$0xff]  ;;  %v502_v60 = vld [vmem:[%s5354_s0 + $0x90] sm:$0xff] }
 0x141   :  { %v4110_v59 = vpop.permute.xlu1 %1338  ;;  %v4112_v18 = vpop.permute.xlu0 %1333 }
 0x142   :  { %5412 = vst [vmem:[#allocation54_spill] sm:$0xff] %v4110_v59  ;;  %5413 = vst [vmem:[#allocation55_spill] sm:$0xff] %v4112_v18  ;;  %1848 = vperm.xlu1 %3380, %v4003_v32   ;;  %1843 = vperm.xlu0 %3379, %v4008_v40   ;;  %v4129_v32 = vld [vmem:[%s5355_s1 + $0x1] ss:$0 sm:$0xff]  ;;  %v505_v18 = vld [vmem:[%s5354_s0 + $0xa8] sm:$0xff] }
 0x143   :  { %v504_v59 = vld [vmem:[%s5354_s0 + $0xa0] sm:$0xff] }
 0x145   :  { %v4116_v50 = vpop.permute.xlu1 %1348  ;;  %v4118_v49 = vpop.permute.xlu0 %1343 }
 0x146   :  { %5414 = vst [vmem:[#allocation56_spill] sm:$0xff] %v4116_v50  ;;  %5415 = vst [vmem:[#allocation57_spill] sm:$0xff] %v4118_v49  ;;  %1858 = vperm.xlu1 %3380, %v1277_v48   ;;  %1853 = vperm.xlu0 %3379, %v1276_v17   ;;  %v4138_v48 = vld [vmem:[%s5355_s1] ss:$0 sm:$0xff]  ;;  %v4143_v17 = vld [vmem:[%s5355_s1 + $0x2] ss:$0 sm:$0xff]  ;;  %v426_v49 = vmul.f32 %v4129_v32, %v3868_v7 }
 0x147   :  { %v671_v7 = vmul.f32 %v4143_v17, %v3966_v9  ;;  %v214_v53 = vmul.f32 %v4138_v48, %v3750_v21  ;;  %v215_v21 = vmul.f32 %v4138_v48, %v3762_v26 }
 0x149   :  { %v4131_v40 = vpop.permute.xlu1 %564  ;;  %v4133_v50 = vpop.permute.xlu0 %559 }
 0x14a   :  { %5416 = vst [vmem:[#allocation58_spill] sm:$0xff] %v4131_v40  ;;  %5417 = vst [vmem:[#allocation59_spill] sm:$0xff] %v4133_v50  ;;  %604 = vperm.xlu1 %3380, %v503_v61   ;;  %599 = vperm.xlu0 %3379, %v502_v60   ;;  %v427_v50 = vmul.f32 %v4129_v32, %v3866_v8  ;;  %v429_v40 = vmul.f32 %v4129_v32, %v3876_v10 }
 0x14b   :  { %v211_v60 = vmul.f32 %v4138_v48, %v3742_v1  ;;  %v428_v61 = vmul.f32 %v4129_v32, %v3878_v20  ;;  %v212_v8 = vmul.f32 %v4138_v48, %v3752_v22  ;;  %v672_v10 = vmul.f32 %v4143_v17, %v4028_v14 }
 0x14c   :  { %v213_v1 = vmul.f32 %v4138_v48, %v3740_v4  ;;  %v216_v20 = vmul.f32 %v4138_v48, %v3760_v25  ;;  %v218_v22 = vmul.f32 %v4138_v48, %v3772_v29  ;;  %v674_v4 = vmul.f32 %v4143_v17, %v4034_v13 }
 0x14d   :  { %v4163_v63 = vpop.permute.xlu1 %574  ;;  %v4165_v3 = vpop.permute.xlu0 %569  ;;  %v456_v9 = vadd.f32 %v426_v49, %v211_v60  ;;  %v457_v14 = vadd.f32 %v427_v50, %v212_v8  ;;  %v673_v25 = vmul.f32 %v4143_v17, %v4036_v15  ;;  %v431_v29 = vmul.f32 %v4129_v32, %v3890_v28  ;;  %v4205_v15 = vld [vmem:[%s5356_s2] ss:$0 sm:$0xff] }
 0x14e   :  { %5418 = vst [vmem:[#allocation60_spill] sm:$0xff] %v4163_v63  ;;  %5419 = vst [vmem:[#allocation61_spill] sm:$0xff] %v4165_v3  ;;  %614 = vperm.xlu1 %3380, %v505_v18   ;;  %609 = vperm.xlu0 %3379, %v504_v59   ;;  %v4180_v3 = vld [vmem:[%s5355_s1 + $0x3] ss:$0 sm:$0xff]  ;;  %v459_v59 = vadd.f32 %v429_v40, %v214_v53  ;;  %v458_v18 = vadd.f32 %v428_v61, %v213_v1 }
 0x14f   :  { %v701_v63 = vadd.f32 %v671_v7, %v456_v9  ;;  %v702_v54 = vadd.f32 %v672_v10, %v457_v14  ;;  %v430_v50 = vmul.f32 %v4129_v32, %v3892_v6  ;;  %v433_v53 = vmul.f32 %v4129_v32, %v3896_v5 }
 0x150   :  { %v432_v13 = vmul.f32 %v4129_v32, %v3898_v23  ;;  %v217_v28 = vmul.f32 %v4138_v48, %v3774_v30  ;;  %v4217_v23 = vld [vmem:[%s5354_s0 + $0x1a0] sm:$0xff]  ;;  %v704_v5 = vadd.f32 %v674_v4, %v459_v59  ;;  %v703_v40 = vadd.f32 %v673_v25, %v458_v18 }
 0x151   :  { %v770_v49 = vpop.permute.xlu1 %769  ;;  %v765_v60 = vpop.permute.xlu0 %764  ;;  %v676_v61 = vmul.f32 %v4143_v17, %v4038_v16  ;;  %v675_v7 = vmul.f32 %v4143_v17, %v4040_v12  ;;  %v461_v1 = vadd.f32 %v431_v29, %v216_v20  ;;  %v460_v9 = vadd.f32 %v430_v50, %v215_v21  ;;  %v748_v12 = vld [vmem:[%s5354_s0 + $0x99] sm:$0xff] }
 0x152   :  { %v917_v47 = vmul.f32 %v4180_v3, %v770_v49  ;;  %v916_v26 = vmul.f32 %v4180_v3, %v765_v60  ;;  %1623 = vperm.xlu1 %3380, %v4071_v45   ;;  %1618 = vperm.xlu0 %3379, %v4076_v46   ;;  %v4210_v45 = vld [vmem:[%s5354_s0 + $0x1a8] sm:$0xff]  ;;  %v463_v14 = vadd.f32 %v433_v53, %v218_v22  ;;  %v747_v22 = vld [vmem:[%s5354_s0 + $0x91] sm:$0xff] }
 0x153   :  { %v462_v59 = vadd.f32 %v432_v13, %v217_v28  ;;  %v1230_v16 = vmul.f32 %v4138_v48, %v3964_v0  ;;  %v1445_v18 = vmul.f32 %v4129_v32, %v3996_v31  ;;  %v706_v4 = vadd.f32 %v676_v61, %v461_v1 }
 0x154   :  { %v947_v6 = vadd.f32 %v917_v47, %v702_v54  ;;  %v946_v46 = vadd.f32 %v916_v26, %v701_v63  ;;  %v705_v25 = vadd.f32 %v675_v7, %v460_v9  ;;  %v678_v49 = vmul.f32 %v4143_v17, %v4048_v62 }
 0x155   :  { %v780_v8 = vpop.permute.xlu1 %779  ;;  %v775_v10 = vpop.permute.xlu0 %774  ;;  %v677_v0 = vmul.f32 %v4143_v17, %v4050_v2  ;;  %v1232_v13 = vmul.f32 %v4138_v48, %v3970_v19  ;;  %v1231_v62 = vmul.f32 %v4138_v48, %v3972_v24  ;;  %v4255_v2 = vmul.f32 %v4138_v48, %v3976_v52  ;;  %v749_v52 = vld [vmem:[%s5354_s0 + $0xa1] sm:$0xff] }
 0x156   :  { %v984_v30 = vadd.f32 %v4205_v15, %v947_v6  ;;  %v983_v54 = vadd.f32 %v4205_v15, %v946_v46  ;;  %v919_v63 = vmul.f32 %v4180_v3, %v780_v8  ;;  %v918_v47 = vmul.f32 %v4180_v3, %v775_v10  ;;  %1633 = vperm.xlu1 %3380, %v4210_v45   ;;  %v750_v6 = vld [vmem:[%s5354_s0 + $0xa9] sm:$0xff] }
 0x157   :  { %1628 = vperm.xlu0 %3379, %v4217_v23   ;;  %v1446_v28 = vmul.f32 %v4129_v32, %v4012_v38  ;;  %v1233_v46 = vmul.f32 %v4138_v48, %v3978_v55  ;;  %v708_v38 = vadd.f32 %v678_v49, %v463_v14  ;;  %v1691_v61 = vmul.f32 %v4143_v17, %v4052_v43 }
 0x158   :  { %1015 = vst.msk [vmem:[#allocation2 + $0x8] sm:$0xff] %vm1013_vm0, %v984_v30  ;;  %1014 = vst.msk [vmem:[#allocation2] sm:$0xff] %vm1013_vm0, %v983_v54  ;;  %v949_v20 = vadd.f32 %v919_v63, %v704_v5  ;;  %v948_v21 = vadd.f32 %v918_v47, %v703_v40  ;;  %v1475_v5 = vadd.f32 %v1445_v18, %v1230_v16 }
 0x159   :  { %v790_v60 = vpop.permute.xlu1 %789  ;;  %v785_v31 = vpop.permute.xlu0 %784  ;;  %v707_v40 = vadd.f32 %v677_v0, %v462_v59  ;;  %v1690_v7 = vmul.f32 %v4143_v17, %v4054_v44  ;;  %v1447_v47 = vmul.f32 %v4129_v32, %v4010_v39  ;;  %v1476_v1 = vadd.f32 %v1446_v28, %v1231_v62 }
 0x15a   :  { %v986_v26 = vadd.f32 %v4205_v15, %v949_v20  ;;  %v985_v29 = vadd.f32 %v4205_v15, %v948_v21  ;;  %v921_v50 = vmul.f32 %v4180_v3, %v790_v60  ;;  %v920_v53 = vmul.f32 %v4180_v3, %v785_v31  ;;  %849 = vperm.xlu1 %3380, %v748_v12  }
 0x15b   :  { %844 = vperm.xlu0 %3379, %v747_v22   ;;  %v1448_v43 = vmul.f32 %v4129_v32, %v4018_v35  ;;  %v1450_v44 = vmul.f32 %v4129_v32, %v4024_v33  ;;  %v4285_v9 = vmul.f32 %v4138_v48, %v3986_v37  ;;  %v1235_v14 = vmul.f32 %v4138_v48, %v3988_v27  ;;  %v4298_v27 = vld [vmem:[%s5354_s0 + $0x1b8] sm:$0xff] }
 0x15c   :  { %1017 = vst.msk [vmem:[#allocation2 + $0x18] sm:$0xff] %vm1013_vm0, %v986_v26  ;;  %1016 = vst.msk [vmem:[#allocation2 + $0x10] sm:$0xff] %vm1013_vm0, %v985_v29  ;;  %v951_v19 = vadd.f32 %v921_v50, %v706_v4  ;;  %v950_v24 = vadd.f32 %v920_v53, %v705_v25  ;;  %v1721_v12 = vadd.f32 %v1691_v61, %v1476_v1 }
 0x15d   :  { %v800_v55 = vpop.permute.xlu1 %799  ;;  %v795_v8 = vpop.permute.xlu0 %794  ;;  %v1720_v35 = vadd.f32 %v1690_v7, %v1475_v5  ;;  %v1693_v33 = vmul.f32 %v4143_v17, %v4058_v41  ;;  %v1692_v16 = vmul.f32 %v4143_v17, %v4060_v42  ;;  %v1477_v42 = vadd.f32 %v1447_v47, %v1232_v13  ;;  %v4351_v47 = vld [vmem:[%s5354_s0 + $0x1b9] sm:$0xff] }
 0x15e   :  { %v988_v10 = vadd.f32 %v4205_v15, %v951_v19  ;;  %v987_v30 = vadd.f32 %v4205_v15, %v950_v24  ;;  %v923_v54 = vmul.f32 %v4180_v3, %v800_v55  ;;  %v922_v63 = vmul.f32 %v4180_v3, %v795_v8  ;;  %859 = vperm.xlu1 %3380, %v750_v6  }
 0x15f   :  { %854 = vperm.xlu0 %3379, %v749_v52   ;;  %v2062_v20 = vld [vmem:[#allocation2] ss:$2 sm:$0x7f]  ;;  %v2064_v21 = vld [vmem:[#allocation2 + $0x1] ss:$2 sm:$0x7f]  ;;  %v1449_v49 = vmul.f32 %v4129_v32, %v4016_v36  ;;  %v1478_v0 = vadd.f32 %v1448_v43, %v1233_v46  ;;  %v1480_v60 = vadd.f32 %v1450_v44, %v1235_v14  ;;  %v1695_v29 = vmul.f32 %v4143_v17, %v4064_v57 }
 0x160   :  { %1019 = vst.msk [vmem:[#allocation2 + $0x28] sm:$0xff] %vm1013_vm0, %v988_v10  ;;  %1018 = vst.msk [vmem:[#allocation2 + $0x20] sm:$0xff] %vm1013_vm0, %v987_v30  ;;  %v953_v39 = vadd.f32 %v923_v54, %v708_v38  ;;  %v952_v59 = vadd.f32 %v922_v63, %v707_v40  ;;  %v1722_v62 = vadd.f32 %v1692_v16, %v1477_v42  ;;  %v4333_v40 = vld [vmem:[%s5354_s0 + $0x1a9] sm:$0xff] }
 0x161   :  { %v1789_v37 = vpop.permute.xlu1 %1788  ;;  %v1784_v18 = vpop.permute.xlu0 %1783  ;;  %v1723_v13 = vadd.f32 %v1693_v33, %v1478_v0  ;;  %v2069_v57 = vmax.f32 %v2062_v20, %v2064_v21  ;;  %v1479_v52 = vadd.f32 %v1449_v49, %v4255_v2  ;;  %v1451_v38 = vmul.f32 %v4129_v32, %v4022_v34  ;;  %v5420_v30 = vld [vmem:[#allocation47_spill] sm:$0xff] }
 0x162   :  { %v990_v22 = vadd.f32 %v4205_v15, %v953_v39  ;;  %v989_v4 = vadd.f32 %v4205_v15, %v952_v59  ;;  %v1936_v25 = vmul.f32 %v4180_v3, %v1789_v37  ;;  %v1935_v41 = vmul.f32 %v4180_v3, %v1784_v18  ;;  %1183 = vperm.xlu1 %3380, %v4210_v45   ;;  %v4315_v45 = vld [vmem:[%s5354_s0 + $0x1b0] sm:$0xff] }
 0x163   :  { %v2066_v31 = vld [vmem:[#allocation2 + $0x10] ss:$2 sm:$0x7f]  ;;  %v2068_v26 = vld [vmem:[#allocation2 + $0x11] ss:$2 sm:$0x7f]  ;;  %1178 = vperm.xlu0 %3379, %v4217_v23   ;;  %v1694_v23 = vmul.f32 %v4143_v17, %v4066_v56  ;;  %v1452_v56 = vmul.f32 %v4129_v32, %v4030_v58  ;;  %v1237_v7 = vmul.f32 %v4138_v48, %v3998_v51  ;;  %v1725_v55 = vadd.f32 %v1695_v29, %v1480_v60 }
 0x164   :  { %1021 = vst.msk [vmem:[#allocation2 + $0x38] sm:$0xff] %vm1013_vm0, %v990_v22  ;;  %1020 = vst.msk [vmem:[#allocation2 + $0x30] sm:$0xff] %vm1013_vm0, %v989_v4  ;;  %v1966_v50 = vadd.f32 %v1936_v25, %v1721_v12  ;;  %v1965_v53 = vadd.f32 %v1935_v41, %v1720_v35  ;;  %v2070_v36 = vmax.f32 %v2066_v31, %v2068_v26  ;;  %v4342_v58 = vld [vmem:[%s5354_s0 + $0x1a1] sm:$0xff]  ;;  %v4366_v20 = vld [vmem:[%s5354_s0 + $0x1b1] sm:$0xff] }
 0x165   :  { %v1799_v28 = vpop.permute.xlu1 %1798  ;;  %v1794_v6 = vpop.permute.xlu0 %1793  ;;  %v1724_v8 = vadd.f32 %v1694_v23, %v1479_v52  ;;  %v1697_v10 = vmul.f32 %v4143_v17, %v4078_v11  ;;  %v1696_v54 = vmul.f32 %v4143_v17, %v5420_v30  ;;  %v1481_v12 = vadd.f32 %v1451_v38, %v4285_v9  ;;  %v5424_v52 = vld [vmem:[#allocation28_spill] sm:$0xff]  ;;  %v5427_v30 = vld [vmem:[#allocation58_spill] sm:$0xff] }
 0x166   :  { %v2003_v46 = vadd.f32 %v4205_v15, %v1966_v50  ;;  %v2002_v5 = vadd.f32 %v4205_v15, %v1965_v53  ;;  %v1938_v19 = vmul.f32 %v4180_v3, %v1799_v28  ;;  %v1937_v24 = vmul.f32 %v4180_v3, %v1794_v6  ;;  %1193 = vperm.xlu1 %3380, %v4298_v27   ;;  %v5421_v6 = vld [vmem:[#allocation50_spill] sm:$0xff] }
 0x167   :  { %1188 = vperm.xlu0 %3379, %v4315_v45   ;;  %v2071_v61 = vmax.f32 %v2069_v57, %v2070_v36  ;;  %v2075_v43 = vld [vmem:[#allocation2 + $0x20] ss:$2 sm:$0x7f]  ;;  %v2077_v44 = vld [vmem:[#allocation2 + $0x21] ss:$2 sm:$0x7f]  ;;  %v1482_v35 = vadd.f32 %v1452_v56, %v1237_v7  ;;  %v1726_v22 = vadd.f32 %v1696_v54, %v1481_v12  ;;  %v434_v38 = vmul.f32 %v4129_v32, %v5424_v52 }
 0x168   :  { %2033 = vst.msk [vmem:[#allocation2 + $0x108] sm:$0xff] %vm1013_vm0, %v2003_v46  ;;  %2032 = vst.msk [vmem:[#allocation2 + $0x100] sm:$0xff] %vm1013_vm0, %v2002_v5  ;;  %v1968_v34 = vadd.f32 %v1938_v19, %v1723_v13  ;;  %v1967_v2 = vadd.f32 %v1937_v24, %v1722_v62  ;;  %v2082_v41 = vmax.f32 %v2075_v43, %v2077_v44  ;;  %v5422_v5 = vld [vmem:[#allocation51_spill] sm:$0xff]  ;;  %v5429_v43 = vld [vmem:[#allocation29_spill] sm:$0xff] }
 0x169   :  { %v1809_v51 = vpop.permute.xlu1 %1808  ;;  %v1804_v63 = vpop.permute.xlu0 %1803  ;;  %v2072_v1 = vmax.f32 %v2071_v61, 0.0  ;;  %v1727_v9 = vadd.f32 %v1697_v10, %v1482_v35  ;;  %v5423_v19 = vld [vmem:[#allocation27_spill] sm:$0xff]  ;;  %v680_v54 = vmul.f32 %v4143_v17, %v5427_v30  ;;  %v437_v44 = vmul.f32 %v4129_v32, %v5429_v43 }
 0x16a   :  { %v2005_v14 = vadd.f32 %v4205_v15, %v1968_v34  ;;  %v2004_v39 = vadd.f32 %v4205_v15, %v1967_v2  ;;  %v1940_v59 = vmul.f32 %v4180_v3, %v1809_v51  ;;  %v1939_v11 = vmul.f32 %v4180_v3, %v1804_v63  ;;  %1398 = vperm.xlu1 %3380, %v4333_v40   ;;  %v5425_v7 = vld [vmem:[#allocation7_spill] sm:$0xff] }
 0x16b   :  { %v2079_v33 = vld [vmem:[#allocation2 + $0x30] ss:$2 sm:$0x7f]  ;;  %v2081_v16 = vld [vmem:[#allocation2 + $0x31] ss:$2 sm:$0x7f]  ;;  %1393 = vperm.xlu0 %3379, %v4342_v58   ;;  %v435_v24 = vmul.f32 %v4129_v32, %v5423_v19 }
 0x16c   :  { %2073 = vst.msk [vmem:[#allocation3] sm:$0x7f] %vm1043_vm1, %v2072_v1  ;;  %v1970_v37 = vadd.f32 %v1940_v59, %v1725_v55  ;;  %v1969_v18 = vadd.f32 %v1939_v11, %v1724_v8  ;;  %v2083_v21 = vmax.f32 %v2079_v33, %v2081_v16  ;;  %v220_v55 = vmul.f32 %v4138_v48, %v5425_v7  ;;  %v5426_v8 = vld [vmem:[#allocation8_spill] sm:$0xff]  ;;  %v5428_v51 = vld [vmem:[#allocation59_spill] sm:$0xff]  ;;  %v5431_v33 = vld [vmem:[#allocation9_spill] sm:$0xff] }
 0x16d   :  { %2035 = vst.msk [vmem:[#allocation2 + $0x118] sm:$0xff] %vm1013_vm0, %v2005_v14  ;;  %2034 = vst.msk [vmem:[#allocation2 + $0x110] sm:$0xff] %vm1013_vm0, %v2004_v39  ;;  %v1819_v4 = vpop.permute.xlu1 %1818  ;;  %v1814_v25 = vpop.permute.xlu0 %1813  ;;  %v219_v10 = vmul.f32 %v4138_v48, %v5426_v8  ;;  %v679_v63 = vmul.f32 %v4143_v17, %v5428_v51  ;;  %v5430_v14 = vld [vmem:[#allocation30_spill] sm:$0xff]  ;;  %v507_v59 = vld [vmem:[%s5354_s0 + $0xb8] sm:$0xff]  ;;  %v222_v16 = vmul.f32 %v4138_v48, %v5431_v33 }
 0x16e   :  { %v2007_v42 = vadd.f32 %v4205_v15, %v1970_v37  ;;  %v2006_v49 = vadd.f32 %v4205_v15, %v1969_v18  ;;  %v1942_v0 = vmul.f32 %v4180_v3, %v1819_v4  ;;  %v1941_v60 = vmul.f32 %v4180_v3, %v1814_v25  ;;  %1408 = vperm.xlu1 %3380, %v4351_v47   ;;  %v506_v35 = vld [vmem:[%s5354_s0 + $0xb0] sm:$0xff]  ;;  %v5432_v37 = vld [vmem:[#allocation10_spill] sm:$0xff] }
 0x16f   :  { %1403 = vperm.xlu0 %3379, %v4366_v20   ;;  %v2084_v31 = vmax.f32 %v2082_v41, %v2083_v21  ;;  %v2153_v26 = vld [vmem:[#allocation2 + $0x100] ss:$2 sm:$0x7f]  ;;  %v2155_v53 = vld [vmem:[#allocation2 + $0x101] ss:$2 sm:$0x7f]  ;;  %v436_v39 = vmul.f32 %v4129_v32, %v5430_v14  ;;  %v465_v11 = vadd.f32 %v435_v24, %v220_v55  ;;  %v464_v12 = vadd.f32 %v434_v38, %v219_v10 }
 0x170   :  { %2037 = vst.msk [vmem:[#allocation2 + $0x128] sm:$0xff] %vm1013_vm0, %v2007_v42  ;;  %2036 = vst.msk [vmem:[#allocation2 + $0x120] sm:$0xff] %vm1013_vm0, %v2006_v49  ;;  %v1972_v29 = vadd.f32 %v1942_v0, %v1727_v9  ;;  %v1971_v50 = vadd.f32 %v1941_v60, %v1726_v22  ;;  %v2160_v56 = vmax.f32 %v2153_v26, %v2155_v53  ;;  %v5433_v21 = vld [vmem:[#allocation60_spill] sm:$0xff]  ;;  %v5434_v9 = vld [vmem:[#allocation61_spill] sm:$0xff] }
 0x171   :  { %v4376_v36 = vpop.permute.xlu1 %1583  ;;  %v4378_v13 = vpop.permute.xlu0 %1578  ;;  %v2085_v62 = vmax.f32 %v2084_v31, 0.0  ;;  %v221_v18 = vmul.f32 %v4138_v48, %v5432_v37  ;;  %v681_v22 = vmul.f32 %v4143_v17, %v5434_v9  ;;  %v710_v42 = vadd.f32 %v680_v54, %v465_v11  ;;  %v509_v26 = vld [vmem:[%s5354_s0 + $0xc8] sm:$0xff]  ;;  %v1527_v14 = vld [vmem:[%s5354_s0 + $0x1c0] sm:$0xff] }
 0x172   :  { %v2009_v23 = vadd.f32 %v4205_v15, %v1972_v29  ;;  %v2008_v28 = vadd.f32 %v4205_v15, %v1971_v50  ;;  %1868 = vperm.xlu1 %3380, %v5421_v6   ;;  %v709_v49 = vadd.f32 %v679_v63, %v464_v12  ;;  %v467_v50 = vadd.f32 %v437_v44, %v222_v16  ;;  %v1528_v44 = vld [vmem:[%s5354_s0 + $0x1c8] sm:$0xff] }
 0x173   :  { %1863 = vperm.xlu0 %3379, %v5422_v5   ;;  %2086 = vst.msk [vmem:[#allocation3 + $0x7] sm:$0x7f] %vm1043_vm1, %v2085_v62  ;;  %v466_v53 = vadd.f32 %v436_v39, %v221_v18  ;;  %v754_v33 = vld [vmem:[%s5354_s0 + $0xc9] sm:$0xff]  ;;  %v753_v18 = vld [vmem:[%s5354_s0 + $0xc1] sm:$0xff] }
 0x174   :  { %v2157_v57 = vld [vmem:[#allocation2 + $0x110] ss:$2 sm:$0x7f]  ;;  %v2159_v46 = vld [vmem:[#allocation2 + $0x111] ss:$2 sm:$0x7f] }
 0x175   :  { %2039 = vst.msk [vmem:[#allocation2 + $0x138] sm:$0xff] %vm1013_vm0, %v2009_v23  ;;  %2038 = vst.msk [vmem:[#allocation2 + $0x130] sm:$0xff] %vm1013_vm0, %v2008_v28  ;;  %v2161_v61 = vmax.f32 %v2157_v57, %v2159_v46  ;;  %v4393_v34 = vpop.permute.xlu1 %1593  ;;  %v4395_v2 = vpop.permute.xlu0 %1588  ;;  %v508_v57 = vld [vmem:[%s5354_s0 + $0xc0] sm:$0xff]  ;;  %v711_v19 = vadd.f32 %v681_v22, %v466_v53 }
 0x176   :  { %1878 = vperm.xlu1 %3380, %v4333_v40  }
 0x177   :  { %v2162_v1 = vmax.f32 %v2160_v56, %v2161_v61  ;;  %1873 = vperm.xlu0 %3379, %v4342_v58   ;;  %v682_v58 = vmul.f32 %v4143_v17, %v5433_v21  ;;  %v2166_v4 = vld [vmem:[#allocation2 + $0x120] ss:$2 sm:$0x7f]  ;;  %v2168_v0 = vld [vmem:[#allocation2 + $0x121] ss:$2 sm:$0x7f] }
 0x178   :  { %v2173_v38 = vmax.f32 %v2166_v4, %v2168_v0  ;;  %v5435_v0 = vld [vmem:[#allocation54_spill] sm:$0xff] }
 0x179   :  { %v2163_v40 = vmax.f32 %v2162_v1, 0.0  ;;  %v810_v25 = vpop.permute.xlu1 %809  ;;  %v805_v41 = vpop.permute.xlu0 %804  ;;  %v712_v5 = vadd.f32 %v682_v58, %v467_v50 }
 0x17a   :  { %v925_v60 = vmul.f32 %v4180_v3, %v810_v25  ;;  %v924_v31 = vmul.f32 %v4180_v3, %v805_v41  ;;  %624 = vperm.xlu1 %3380, %v507_v59   ;;  %v2243_v29 = vld [vmem:[#allocation3] sm:$0xff] }
 0x17b   :  { %2164 = vst.msk [vmem:[#allocation3 + $0x31] sm:$0x7f] %vm1043_vm1, %v2163_v40  ;;  %619 = vperm.xlu0 %3379, %v506_v35  }
 0x17c   :  { %v2170_v62 = vld [vmem:[#allocation2 + $0x130] ss:$2 sm:$0x7f]  ;;  %v2172_v23 = vld [vmem:[#allocation2 + $0x131] ss:$2 sm:$0x7f]  ;;  %v955_v28 = vadd.f32 %v925_v60, %v710_v42  ;;  %v954_v6 = vadd.f32 %v924_v31, %v709_v49  ;;  %v1454_v60 = vmul.f32 %v4129_v32, %v5435_v0 }
 0x17d   :  { %2254 = vst.msk [vmem:[#allocation4] sm:$0xff] %vm1013_vm0, %v2243_v29  ;;  %v2174_v46 = vmax.f32 %v2170_v62, %v2172_v23  ;;  %v820_v24 = vpop.permute.xlu1 %819  ;;  %v815_v52 = vpop.permute.xlu0 %814  ;;  %v4488_v49 = vld [vmem:[%s5354_s0 + $0x1d8] sm:$0xff]  ;;  %v5436_v31 = vld [vmem:[#allocation55_spill] sm:$0xff] }
 0x17e   :  { %v992_v56 = vadd.f32 %v4205_v15, %v955_v28  ;;  %v991_v61 = vadd.f32 %v4205_v15, %v954_v6  ;;  %v927_v7 = vmul.f32 %v4180_v3, %v820_v24  ;;  %v926_v55 = vmul.f32 %v4180_v3, %v815_v52  ;;  %634 = vperm.xlu1 %3380, %v509_v26   ;;  %v4497_v29 = vld [vmem:[%s5354_s0 + $0x1d0] sm:$0xff]  ;;  %v5438_v28 = vld [vmem:[#allocation49_spill] sm:$0xff] }
 0x17f   :  { %629 = vperm.xlu0 %3379, %v508_v57   ;;  %v2175_v8 = vmax.f32 %v2173_v38, %v2174_v46  ;;  %v1453_v26 = vmul.f32 %v4129_v32, %v5436_v31  ;;  %v5437_v62 = vld [vmem:[#allocation48_spill] sm:$0xff]  ;;  %v1238_v6 = vmul.f32 %v4138_v48, %v5438_v28  ;;  %v1699_v57 = vmul.f32 %v4143_v17, %v4376_v36  ;;  %v5440_v24 = vld [vmem:[#allocation57_spill] sm:$0xff]  ;;  %v1285_v38 = vld [vmem:[%s5354_s0 + $0x1c9] sm:$0xff] }
 0x180   :  { %1023 = vst.msk [vmem:[#allocation2 + $0x48] sm:$0xff] %vm1013_vm0, %v992_v56  ;;  %1022 = vst.msk [vmem:[#allocation2 + $0x40] sm:$0xff] %vm1013_vm0, %v991_v61  ;;  %v957_v10 = vadd.f32 %v927_v7, %v712_v5  ;;  %v956_v30 = vadd.f32 %v926_v55, %v711_v19  ;;  %v1239_v23 = vmul.f32 %v4138_v48, %v5437_v62  ;;  %v5439_v5 = vld [vmem:[#allocation56_spill] sm:$0xff]  ;;  %v1284_v36 = vld [vmem:[%s5354_s0 + $0x1c1] sm:$0xff] }
 0x181   :  { %v4439_v54 = vpop.permute.xlu1 %1143  ;;  %v4441_v51 = vpop.permute.xlu0 %1138  ;;  %v2176_v63 = vmax.f32 %v2175_v8, 0.0  ;;  %v1698_v46 = vmul.f32 %v4143_v17, %v4378_v13  ;;  %v1456_v19 = vmul.f32 %v4129_v32, %v5439_v5  ;;  %v1455_v52 = vmul.f32 %v4129_v32, %v5440_v24  ;;  %v5441_v13 = vld [vmem:[#allocation52_spill] sm:$0xff]  ;;  %v5442_v55 = vld [vmem:[#allocation53_spill] sm:$0xff] }
 0x182   :  { %v994_v1 = vadd.f32 %v4205_v15, %v957_v10  ;;  %v993_v43 = vadd.f32 %v4205_v15, %v956_v30  ;;  %1643 = vperm.xlu1 %3380, %v4298_v27   ;;  %v752_v27 = vld [vmem:[%s5354_s0 + $0xb9] sm:$0xff]  ;;  %v1484_v56 = vadd.f32 %v1454_v60, %v1239_v23  ;;  %v1483_v61 = vadd.f32 %v1453_v26, %v1238_v6 }
 0x183   :  { %1638 = vperm.xlu0 %3379, %v4315_v45   ;;  %2177 = vst.msk [vmem:[#allocation3 + $0x38] sm:$0x7f] %vm1043_vm1, %v2176_v63  ;;  %v751_v45 = vld [vmem:[%s5354_s0 + $0xb1] sm:$0xff]  ;;  %v1241_v7 = vmul.f32 %v4138_v48, %v5441_v13  ;;  %v1240_v8 = vmul.f32 %v4138_v48, %v5442_v55  ;;  %v1701_v10 = vmul.f32 %v4143_v17, %v4393_v34  ;;  %v4540_v34 = vld [vmem:[%s5354_s0 + $0x1d9] sm:$0xff] }
 0x184   :  { %1025 = vst.msk [vmem:[#allocation2 + $0x58] sm:$0xff] %vm1013_vm0, %v994_v1  ;;  %1024 = vst.msk [vmem:[#allocation2 + $0x50] sm:$0xff] %vm1013_vm0, %v993_v43  ;;  %v1700_v30 = vmul.f32 %v4143_v17, %v4395_v2  ;;  %v5444_v5 = vld [vmem:[#allocation32_spill] sm:$0xff]  ;;  %v5447_v55 = vld [vmem:[#allocation33_spill] sm:$0xff] }
 0x185   :  { %v4456_v39 = vpop.permute.xlu1 %1153  ;;  %v4458_v59 = vpop.permute.xlu0 %1148 }
 0x186   :  { %1653 = vperm.xlu1 %3380, %v1528_v44  }
 0x187   :  { %1648 = vperm.xlu0 %3379, %v1527_v14   ;;  %v2088_v11 = vld [vmem:[#allocation2 + $0x40] ss:$2 sm:$0x7f]  ;;  %v2090_v12 = vld [vmem:[#allocation2 + $0x41] ss:$2 sm:$0x7f] }
 0x188   :  { %v2095_v21 = vmax.f32 %v2088_v11, %v2090_v12  ;;  %v1486_v11 = vadd.f32 %v1456_v19, %v1241_v7  ;;  %v1485_v12 = vadd.f32 %v1455_v52, %v1240_v8  ;;  %v438_v19 = vmul.f32 %v4129_v32, %v5444_v5 }
 0x189   :  { %v4466_v35 = vpop.permute.xlu1 %1358  ;;  %v4468_v40 = vpop.permute.xlu0 %1353  ;;  %v441_v8 = vmul.f32 %v4129_v32, %v5447_v55 }
 0x18a   :  { %869 = vperm.xlu1 %3380, %v752_v27  }
 0x18b   :  { %v2092_v16 = vld [vmem:[#allocation2 + $0x50] ss:$2 sm:$0x7f]  ;;  %v2094_v37 = vld [vmem:[#allocation2 + $0x51] ss:$2 sm:$0x7f]  ;;  %864 = vperm.xlu0 %3379, %v751_v45  }
 0x18c   :  { %v2096_v58 = vmax.f32 %v2092_v16, %v2094_v37  ;;  %v4545_v16 = vld [vmem:[%s5354_s0 + $0x1d1] sm:$0xff]  ;;  %v1731_v37 = vadd.f32 %v1701_v10, %v1486_v11  ;;  %v5448_v10 = vld [vmem:[#allocation34_spill] sm:$0xff] }
 0x18d   :  { %v4476_v9 = vpop.permute.xlu1 %1368  ;;  %v4478_v22 = vpop.permute.xlu0 %1363 }
 0x18e   :  { %879 = vperm.xlu1 %3380, %v754_v33   ;;  %v2097_v4 = vmax.f32 %v2095_v21, %v2096_v58 }
 0x18f   :  { %874 = vperm.xlu0 %3379, %v753_v18   ;;  %v1730_v18 = vadd.f32 %v1700_v30, %v1485_v12  ;;  %v440_v30 = vmul.f32 %v4129_v32, %v5448_v10 }
 0x190   :  { %v2098_v25 = vmax.f32 %v2097_v4, 0.0 }
 0x191   :  { %v4480_v41 = vpop.permute.xlu1 %584  ;;  %v4482_v42 = vpop.permute.xlu0 %579 }
 0x192   :  { %1203 = vperm.xlu1 %3380, %v1528_v44   ;;  %2099 = vst.msk [vmem:[#allocation3 + $0xe] sm:$0x7f] %vm1043_vm1, %v2098_v25  ;;  %v1729_v44 = vadd.f32 %v1699_v57, %v1484_v56  ;;  %v5443_v57 = vld [vmem:[#allocation31_spill] sm:$0xff]  ;;  %v684_v13 = vmul.f32 %v4143_v17, %v4480_v41  ;;  %v683_v7 = vmul.f32 %v4143_v17, %v4482_v42 }
 0x193   :  { %1198 = vperm.xlu0 %3379, %v1527_v14   ;;  %v1728_v14 = vadd.f32 %v1698_v46, %v1483_v61  ;;  %v439_v46 = vmul.f32 %v4129_v32, %v5443_v57  ;;  %v5445_v56 = vld [vmem:[#allocation11_spill] sm:$0xff] }
 0x194   :  { %v224_v61 = vmul.f32 %v4138_v48, %v5445_v56  ;;  %v510_v41 = vld [vmem:[%s5354_s0 + $0xd0] sm:$0xff] }
 0x195   :  { %v4499_v50 = vpop.permute.xlu1 %594  ;;  %v4501_v53 = vpop.permute.xlu0 %589 }
 0x196   :  { %1213 = vperm.xlu1 %3380, %v4488_v49  }
 0x197   :  { %1208 = vperm.xlu0 %3379, %v4497_v29  }
 0x199   :  { %v1829_v63 = vpop.permute.xlu1 %1828  ;;  %v1824_v1 = vpop.permute.xlu0 %1823  ;;  %v4531_v43 = vld [vmem:[#allocation3 + $0x8] sm:$0xff] }
 0x19a   :  { %v1944_v27 = vmul.f32 %v4180_v3, %v1829_v63  ;;  %v1943_v45 = vmul.f32 %v4180_v3, %v1824_v1  ;;  %1418 = vperm.xlu1 %3380, %v1285_v38   ;;  %2255 = vst.msk [vmem:[#allocation4 + $0x8] sm:$0xff] %vm1013_vm0, %v4531_v43  ;;  %v511_v63 = vld [vmem:[%s5354_s0 + $0xd8] sm:$0xff]  ;;  %v469_v1 = vadd.f32 %v439_v46, %v224_v61 }
 0x19b   :  { %1413 = vperm.xlu0 %3379, %v1284_v36  }
 0x19c   :  { %v1974_v2 = vadd.f32 %v1944_v27, %v1729_v44  ;;  %v1973_v33 = vadd.f32 %v1943_v45, %v1728_v14  ;;  %v5449_v14 = vld [vmem:[#allocation13_spill] sm:$0xff]  ;;  %v686_v45 = vmul.f32 %v4143_v17, %v4499_v50 }
 0x19d   :  { %v1839_v21 = vpop.permute.xlu1 %1838  ;;  %v1834_v58 = vpop.permute.xlu0 %1833  ;;  %v226_v42 = vmul.f32 %v4138_v48, %v5449_v14 }
 0x19e   :  { %v2011_v4 = vadd.f32 %v4205_v15, %v1974_v2  ;;  %v2010_v25 = vadd.f32 %v4205_v15, %v1973_v33  ;;  %v1946_v0 = vmul.f32 %v4180_v3, %v1839_v21  ;;  %v1945_v60 = vmul.f32 %v4180_v3, %v1834_v58  ;;  %1428 = vperm.xlu1 %3380, %v4540_v34   ;;  %v513_v2 = vld [vmem:[%s5354_s0 + $0xe8] sm:$0xff] }
 0x19f   :  { %1423 = vperm.xlu0 %3379, %v4545_v16   ;;  %v714_v33 = vadd.f32 %v684_v13, %v469_v1 }
 0x1a0   :  { %2041 = vst.msk [vmem:[#allocation2 + $0x148] sm:$0xff] %vm1013_vm0, %v2011_v4  ;;  %2040 = vst.msk [vmem:[#allocation2 + $0x140] sm:$0xff] %vm1013_vm0, %v2010_v25  ;;  %v1976_v31 = vadd.f32 %v1946_v0, %v1731_v37  ;;  %v1975_v26 = vadd.f32 %v1945_v60, %v1730_v18  ;;  %v471_v25 = vadd.f32 %v441_v8, %v226_v42 }
 0x1a1   :  { %v4555_v62 = vpop.permute.xlu1 %1603  ;;  %v4557_v23 = vpop.permute.xlu0 %1598 }
 0x1a2   :  { %v2013_v28 = vadd.f32 %v4205_v15, %v1976_v31  ;;  %v2012_v6 = vadd.f32 %v4205_v15, %v1975_v26  ;;  %1888 = vperm.xlu1 %3380, %v4351_v47   ;;  %v5446_v47 = vld [vmem:[#allocation12_spill] sm:$0xff]  ;;  %v512_v26 = vld [vmem:[%s5354_s0 + $0xe0] sm:$0xff] }
 0x1a3   :  { %1883 = vperm.xlu0 %3379, %v4366_v20   ;;  %v223_v20 = vmul.f32 %v4138_v48, %v5446_v47 }
 0x1a4   :  { %2043 = vst.msk [vmem:[#allocation2 + $0x158] sm:$0xff] %vm1013_vm0, %v2013_v28  ;;  %2042 = vst.msk [vmem:[#allocation2 + $0x150] sm:$0xff] %vm1013_vm0, %v2012_v6  ;;  %v716_v6 = vadd.f32 %v686_v45, %v471_v25  ;;  %v1243_v25 = vmul.f32 %v4138_v48, %v4439_v54  ;;  %v1459_v54 = vmul.f32 %v4129_v32, %v4478_v22 }
 0x1a5   :  { %v4569_v24 = vpop.permute.xlu1 %1613  ;;  %v4571_v52 = vpop.permute.xlu0 %1608  ;;  %v468_v44 = vadd.f32 %v438_v19, %v223_v20 }
 0x1a6   :  { %1898 = vperm.xlu1 %3380, %v1285_v38   ;;  %v5450_v38 = vld [vmem:[#allocation14_spill] sm:$0xff] }
 0x1a7   :  { %1893 = vperm.xlu0 %3379, %v1284_v36   ;;  %v225_v27 = vmul.f32 %v4138_v48, %v5450_v38  ;;  %v685_v36 = vmul.f32 %v4143_v17, %v4501_v53  ;;  %v713_v37 = vadd.f32 %v683_v7, %v468_v44  ;;  %v2179_v18 = vld [vmem:[#allocation2 + $0x140] ss:$2 sm:$0x7f]  ;;  %v2181_v21 = vld [vmem:[#allocation2 + $0x141] ss:$2 sm:$0x7f] }
 0x1a8   :  { %v2186_v19 = vmax.f32 %v2179_v18, %v2181_v21  ;;  %v1532_v44 = vld [vmem:[%s5354_s0 + $0x1e8] sm:$0xff]  ;;  %v1457_v18 = vmul.f32 %v4129_v32, %v4468_v40  ;;  %v1702_v40 = vmul.f32 %v4143_v17, %v4557_v23  ;;  %v1705_v23 = vmul.f32 %v4143_v17, %v4569_v24 }
 0x1a9   :  { %v830_v11 = vpop.permute.xlu1 %829  ;;  %v825_v12 = vpop.permute.xlu0 %824  ;;  %v470_v50 = vadd.f32 %v440_v30, %v225_v27  ;;  %v757_v21 = vld [vmem:[%s5354_s0 + $0xe1] sm:$0xff] }
 0x1aa   :  { %v929_v58 = vmul.f32 %v4180_v3, %v830_v11  ;;  %v928_v4 = vmul.f32 %v4180_v3, %v825_v12  ;;  %644 = vperm.xlu1 %3380, %v511_v63   ;;  %v758_v11 = vld [vmem:[%s5354_s0 + $0xe9] sm:$0xff] }
 0x1ab   :  { %v2183_v0 = vld [vmem:[#allocation2 + $0x150] ss:$2 sm:$0x7f]  ;;  %v2185_v60 = vld [vmem:[#allocation2 + $0x151] ss:$2 sm:$0x7f]  ;;  %639 = vperm.xlu0 %3379, %v510_v41   ;;  %v715_v57 = vadd.f32 %v685_v36, %v470_v50 }
 0x1ac   :  { %v959_v53 = vadd.f32 %v929_v58, %v714_v33  ;;  %v958_v31 = vadd.f32 %v928_v4, %v713_v37  ;;  %v2187_v28 = vmax.f32 %v2183_v0, %v2185_v60  ;;  %v1531_v41 = vld [vmem:[%s5354_s0 + $0x1e0] sm:$0xff]  ;;  %v1458_v37 = vmul.f32 %v4129_v32, %v4466_v35 }
 0x1ad   :  { %v840_v46 = vpop.permute.xlu1 %839  ;;  %v835_v5 = vpop.permute.xlu0 %834  ;;  %v1242_v60 = vmul.f32 %v4138_v48, %v4441_v51  ;;  %v1703_v35 = vmul.f32 %v4143_v17, %v4555_v62  ;;  %v1245_v51 = vmul.f32 %v4138_v48, %v4456_v39  ;;  %v1244_v62 = vmul.f32 %v4138_v48, %v4458_v59 }
 0x1ae   :  { %v996_v56 = vadd.f32 %v4205_v15, %v959_v53  ;;  %v995_v61 = vadd.f32 %v4205_v15, %v958_v31  ;;  %v931_v47 = vmul.f32 %v4180_v3, %v840_v46  ;;  %v930_v20 = vmul.f32 %v4180_v3, %v835_v5  ;;  %654 = vperm.xlu1 %3380, %v513_v2  }
 0x1af   :  { %649 = vperm.xlu0 %3379, %v512_v26   ;;  %v2188_v13 = vmax.f32 %v2186_v19, %v2187_v28  ;;  %v1460_v31 = vmul.f32 %v4129_v32, %v4476_v9  ;;  %v1488_v26 = vadd.f32 %v1458_v37, %v1243_v25  ;;  %v1487_v28 = vadd.f32 %v1457_v18, %v1242_v60  ;;  %v4720_v60 = vld [vmem:[%s5355_s1 + $0x1] ss:$0 sm:$0xff] }
 0x1b0   :  { %1027 = vst.msk [vmem:[#allocation2 + $0x68] sm:$0xff] %vm1013_vm0, %v996_v56  ;;  %1026 = vst.msk [vmem:[#allocation2 + $0x60] sm:$0xff] %vm1013_vm0, %v995_v61  ;;  %v961_v7 = vadd.f32 %v931_v47, %v716_v6  ;;  %v960_v55 = vadd.f32 %v930_v20, %v715_v57  ;;  %v1704_v57 = vmul.f32 %v4143_v17, %v4571_v52  ;;  %v1777_v17 = vld [vmem:[%s5354_s0 + $0x1e9] sm:$0xff]  ;;  %v1776_v52 = vld [vmem:[%s5354_s0 + $0x1e1] sm:$0xff] }
 0x1b1   :  { %v4613_v8 = vpop.permute.xlu1 %1163  ;;  %v4615_v10 = vpop.permute.xlu0 %1158  ;;  %v2189_v30 = vmax.f32 %v2188_v13, 0.0  ;;  %v1733_v5 = vadd.f32 %v1703_v35, %v1488_v26  ;;  %v1732_v32 = vadd.f32 %v1702_v40, %v1487_v28  ;;  %v1490_v39 = vadd.f32 %v1460_v31, %v1245_v51  ;;  %v5451_v35 = vld [vmem:[#allocation35_spill] sm:$0xff] }
 0x1b2   :  { %v998_v63 = vadd.f32 %v4205_v15, %v961_v7  ;;  %v997_v1 = vadd.f32 %v4205_v15, %v960_v55  ;;  %1663 = vperm.xlu1 %3380, %v4488_v49   ;;  %v756_v49 = vld [vmem:[%s5354_s0 + $0xd9] sm:$0xff]  ;;  %v1489_v48 = vadd.f32 %v1459_v54, %v1244_v62  ;;  %v443_v40 = vmul.f32 %v4720_v60, %v5451_v35  ;;  %v5453_v51 = vld [vmem:[#allocation15_spill] sm:$0xff] }
 0x1b3   :  { %1658 = vperm.xlu0 %3379, %v4497_v29   ;;  %2190 = vst.msk [vmem:[#allocation3 + $0x3f] sm:$0x7f] %vm1043_vm1, %v2189_v30  ;;  %v755_v29 = vld [vmem:[%s5354_s0 + $0xd1] sm:$0xff]  ;;  %v1735_v56 = vadd.f32 %v1705_v23, %v1490_v39  ;;  %v4738_v23 = vld [vmem:[%s5355_s1 + $0x2] ss:$0 sm:$0xff]  ;;  %v5455_v39 = vld [vmem:[#allocation37_spill] sm:$0xff] }
 0x1b4   :  { %1029 = vst.msk [vmem:[#allocation2 + $0x78] sm:$0xff] %vm1013_vm0, %v998_v63  ;;  %1028 = vst.msk [vmem:[#allocation2 + $0x70] sm:$0xff] %vm1013_vm0, %v997_v1  ;;  %v1734_v61 = vadd.f32 %v1704_v57, %v1489_v48  ;;  %v5452_v54 = vld [vmem:[#allocation36_spill] sm:$0xff]  ;;  %v445_v48 = vmul.f32 %v4720_v60, %v5455_v39 }
 0x1b5   :  { %v4630_v14 = vpop.permute.xlu1 %1173  ;;  %v4632_v42 = vpop.permute.xlu0 %1168  ;;  %v442_v26 = vmul.f32 %v4720_v60, %v5452_v54 }
 0x1b6   :  { %1673 = vperm.xlu1 %3380, %v1532_v44   ;;  %v2272_v44 = vld [vmem:[#allocation3 + $0x31] sm:$0xff] }
 0x1b7   :  { %1668 = vperm.xlu0 %3379, %v1531_v41   ;;  %v2101_v38 = vld [vmem:[#allocation2 + $0x60] ss:$2 sm:$0x7f]  ;;  %v2103_v27 = vld [vmem:[#allocation2 + $0x61] ss:$2 sm:$0x7f] }
 0x1b8   :  { %v2108_v58 = vmax.f32 %v2101_v38, %v2103_v27 }
 0x1b9   :  { %v4640_v45 = vpop.permute.xlu1 %1378  ;;  %v4642_v36 = vpop.permute.xlu0 %1373 }
 0x1ba   :  { %889 = vperm.xlu1 %3380, %v756_v49   ;;  %v4647_v12 = vld [vmem:[#allocation3 + $0x38] sm:$0xff] }
 0x1bb   :  { %v2105_v2 = vld [vmem:[#allocation2 + $0x70] ss:$2 sm:$0x7f]  ;;  %v2107_v33 = vld [vmem:[#allocation2 + $0x71] ss:$2 sm:$0x7f]  ;;  %884 = vperm.xlu0 %3379, %v755_v29  }
 0x1bc   :  { %2261 = vst.msk [vmem:[#allocation4 + $0x38] sm:$0xff] %vm1013_vm0, %v4647_v12  ;;  %v2109_v4 = vmax.f32 %v2105_v2, %v2107_v33  ;;  %v2408_v2 = vld [vmem:[#allocation3 + $0x37] sm:$0xff] }
 0x1bd   :  { %v4660_v50 = vpop.permute.xlu1 %1388  ;;  %v4662_v0 = vpop.permute.xlu0 %1383 }
 0x1be   :  { %899 = vperm.xlu1 %3380, %v758_v11   ;;  %v2110_v53 = vmax.f32 %v2108_v58, %v2109_v4  ;;  %v2340_v11 = vld [vmem:[#allocation3 + $0x32] sm:$0xff]  ;;  %v2402_v58 = vld [vmem:[#allocation3 + $0x7] sm:$0xff] }
 0x1bf   :  { %894 = vperm.xlu0 %3379, %v757_v21  }
 0x1c0   :  { %v2111_v6 = vmax.f32 %v2110_v53, 0.0 }
 0x1c1   :  { %v1849_v9 = vpop.permute.xlu1 %1848  ;;  %v1844_v46 = vpop.permute.xlu0 %1843 }
 0x1c2   :  { %v1948_v22 = vmul.f32 %v4180_v3, %v1849_v9  ;;  %v1947_v19 = vmul.f32 %v4180_v3, %v1844_v46  ;;  %1908 = vperm.xlu1 %3380, %v4540_v34   ;;  %2112 = vst.msk [vmem:[#allocation3 + $0x15] sm:$0x7f] %vm1043_vm1, %v2111_v6  ;;  %v4731_v6 = vld [vmem:[%s5355_s1] ss:$0 sm:$0xff] }
 0x1c3   :  { %1903 = vperm.xlu0 %3379, %v4545_v16   ;;  %v228_v62 = vmul.f32 %v4731_v6, %v5453_v51 }
 0x1c4   :  { %v1978_v59 = vadd.f32 %v1948_v22, %v1733_v5  ;;  %v1977_v24 = vadd.f32 %v1947_v19, %v1732_v32  ;;  %v5454_v5 = vld [vmem:[#allocation16_spill] sm:$0xff] }
 0x1c5   :  { %v1859_v47 = vpop.permute.xlu1 %1858  ;;  %v1854_v34 = vpop.permute.xlu0 %1853  ;;  %v227_v32 = vmul.f32 %v4731_v6, %v5454_v5  ;;  %v473_v19 = vadd.f32 %v443_v40, %v228_v62  ;;  %v2335_v62 = vld [vmem:[#allocation3 + $0xa] sm:$0xff]  ;;  %v2612_v5 = vld [vmem:[#allocation3 + $0x3e] sm:$0xff] }
 0x1c6   :  { %v2015_v20 = vadd.f32 %v4205_v15, %v1978_v59  ;;  %v2014_v13 = vadd.f32 %v4205_v15, %v1977_v24  ;;  %v1950_v16 = vmul.f32 %v4180_v3, %v1859_v47  ;;  %v1949_v7 = vmul.f32 %v4180_v3, %v1854_v34  ;;  %1918 = vperm.xlu1 %3380, %v1777_v17   ;;  %v2266_v3 = vld [vmem:[#allocation3 + $0x1] sm:$0xff]  ;;  %v5456_v24 = vld [vmem:[#allocation38_spill] sm:$0xff] }
 0x1c7   :  { %1913 = vperm.xlu0 %3379, %v1776_v52   ;;  %v472_v59 = vadd.f32 %v442_v26, %v227_v32  ;;  %v444_v52 = vmul.f32 %v4720_v60, %v5456_v24 }
 0x1c8   :  { %2045 = vst.msk [vmem:[#allocation2 + $0x168] sm:$0xff] %vm1013_vm0, %v2015_v20  ;;  %2044 = vst.msk [vmem:[#allocation2 + $0x160] sm:$0xff] %vm1013_vm0, %v2014_v13  ;;  %v1980_v55 = vadd.f32 %v1950_v16, %v1735_v56  ;;  %v1979_v30 = vadd.f32 %v1949_v7, %v1734_v61  ;;  %v5457_v61 = vld [vmem:[#allocation17_spill] sm:$0xff] }
 0x1c9   :  { %v605_v63 = vpop.permute.xlu1 %604  ;;  %v600_v1 = vpop.permute.xlu0 %599  ;;  %v4699_v41 = vld [vmem:[#allocation3 + $0x10] sm:$0xff]  ;;  %v230_v47 = vmul.f32 %v4731_v6, %v5457_v61  ;;  %v1461_v61 = vmul.f32 %v4720_v60, %v4642_v36 }
 0x1ca   :  { %v2017_v49 = vadd.f32 %v4205_v15, %v1980_v55  ;;  %v2016_v29 = vadd.f32 %v4205_v15, %v1979_v30  ;;  %2300 = vrot.lane.b32.xlu1 %v2272_v44, %s3396_s23  ;;  %2256 = vst.msk [vmem:[#allocation4 + $0x10] sm:$0xff] %vm1013_vm0, %v4699_v41  ;;  %v2334_v15 = vld [vmem:[#allocation3 + $0x2] sm:$0xff]  ;;  %v688_v57 = vmul.f32 %v4738_v23, %v605_v63  ;;  %v5458_v55 = vld [vmem:[#allocation18_spill] sm:$0xff] }
 0x1cb   :  { %2288 = vrot.lane.b32.xlu0 %v2266_v3, %s3396_s23  ;;  %v687_v22 = vmul.f32 %v4738_v23, %v600_v1  ;;  %v2267_v7 = vld [vmem:[#allocation3 + $0x9] sm:$0xff]  ;;  %v229_v30 = vmul.f32 %v4731_v6, %v5458_v55 }
 0x1cc   :  { %2047 = vst.msk [vmem:[#allocation2 + $0x178] sm:$0xff] %vm1013_vm0, %v2017_v49  ;;  %2046 = vst.msk [vmem:[#allocation2 + $0x170] sm:$0xff] %vm1013_vm0, %v2016_v29  ;;  %v718_v34 = vadd.f32 %v688_v57, %v473_v19  ;;  %v475_v49 = vadd.f32 %v445_v48, %v230_v47  ;;  %v2403_v39 = vld [vmem:[#allocation3 + $0xf] sm:$0xff] }
 0x1cd   :  { %v615_v38 = vpop.permute.xlu1 %614  ;;  %v610_v27 = vpop.permute.xlu0 %609  ;;  %v717_v63 = vadd.f32 %v687_v22, %v472_v59  ;;  %v474_v3 = vadd.f32 %v444_v52, %v229_v30  ;;  %v2606_v22 = vld [vmem:[#allocation3 + $0xe] sm:$0xff]  ;;  %v1462_v52 = vmul.f32 %v4720_v60, %v4640_v45  ;;  %v1246_v45 = vmul.f32 %v4731_v6, %v4615_v10 }
 0x1ce   :  { %2368 = vrot.lane.b32.xlu1 %v2340_v11, %s3397_s24  ;;  %v690_v20 = vmul.f32 %v4738_v23, %v615_v38  ;;  %v689_v1 = vmul.f32 %v4738_v23, %v610_v27  ;;  %v1248_v10 = vmul.f32 %v4731_v6, %v4632_v42  ;;  %v2821_v42 = vld [vmem:[%s5357_s3] sm:$0xff] }
 0x1cf   :  { %2356 = vrot.lane.b32.xlu0 %v2334_v15, %s3397_s24  ;;  %v2192_v33 = vld [vmem:[#allocation2 + $0x160] ss:$2 sm:$0x7f]  ;;  %v2194_v37 = vld [vmem:[#allocation2 + $0x161] ss:$2 sm:$0x7f] }
 0x1d0   :  { %v2199_v53 = vmax.f32 %v2192_v33, %v2194_v37  ;;  %v720_v15 = vadd.f32 %v690_v20, %v475_v49 }
 0x1d1   :  { %v4711_v18 = vpop.permute.xlu1 %1623  ;;  %v4713_v21 = vpop.permute.xlu0 %1618 }
 0x1d2   :  { %2436 = vrot.lane.b32.xlu1 %v2408_v2, %s3398_s25  ;;  %v4773_v2 = vld [vmem:[%s5356_s2] ss:$0 sm:$0xff]  ;;  %s3401_s2 = smov 30   ;;  %v1706_v36 = vmul.f32 %v4738_v23, %v4713_v21 }
 0x1d3   :  { %v2196_v4 = vld [vmem:[#allocation2 + $0x170] ss:$2 sm:$0x7f]  ;;  %v2198_v25 = vld [vmem:[#allocation2 + $0x171] ss:$2 sm:$0x7f]  ;;  %2424 = vrot.lane.b32.xlu0 %v2402_v58, %s3398_s25  ;;  %v719_v58 = vadd.f32 %v689_v1, %v474_v3  ;;  %v1463_v1 = vmul.f32 %v4720_v60, %v4662_v0 }
 0x1d4   :  { %v2200_v31 = vmax.f32 %v2196_v4, %v2198_v25 }
 0x1d5   :  { %v4726_v28 = vpop.permute.xlu1 %1633 }
 0x1d6   :  { %v4741_v9 = vpop.permute.xlu0 %1628  ;;  %2504 = vrot.lane.b32.xlu1 %v4647_v12, %s3399_s9  ;;  %v2201_v46 = vmax.f32 %v2199_v53, %v2200_v31  ;;  %v2273_v12 = vld [vmem:[#allocation3 + $0x39] sm:$0xff] }
 0x1d7   :  { %2492 = vrot.lane.b32.xlu0 %v4531_v43, %s3399_s9  ;;  %v4760_v43 = vld [vmem:[%s5355_s1 + $0x3] ss:$0 sm:$0xff]  ;;  %v2341_v31 = vld [vmem:[#allocation3 + $0x3a] sm:$0xff] }
 0x1d8   :  { %v2202_v17 = vmax.f32 %v2201_v46, 0.0 }
 0x1d9   :  { %v850_v56 = vpop.permute.xlu1 %849 }
 0x1da   :  { %v933_v13 = vmul.f32 %v4760_v43, %v850_v56  ;;  %v845_v16 = vpop.permute.xlu0 %844  ;;  %2302 = vrot.lane.b32.xlu1 %v2273_v12, %s3396_s23  ;;  %2203 = vst.msk [vmem:[#allocation3 + $0x46] sm:$0x7f] %vm1043_vm1, %v2202_v17 }
 0x1db   :  { %v932_v44 = vmul.f32 %v4760_v43, %v845_v16  ;;  %2290 = vrot.lane.b32.xlu0 %v2267_v7, %s3396_s23  ;;  %v1707_v16 = vmul.f32 %v4738_v23, %v4711_v18  ;;  %v1249_v18 = vmul.f32 %v4731_v6, %v4630_v14 }
 0x1dc   :  { %v963_v29 = vadd.f32 %v933_v13, %v718_v34  ;;  %v1247_v13 = vmul.f32 %v4731_v6, %v4613_v8  ;;  %v1464_v8 = vmul.f32 %v4720_v60, %v4660_v50  ;;  %v1708_v50 = vmul.f32 %v4738_v23, %v4741_v9 }
 0x1dd   :  { %v962_v38 = vadd.f32 %v932_v44, %v717_v63  ;;  %v860_v11 = vpop.permute.xlu1 %859  ;;  %v1491_v63 = vadd.f32 %v1461_v61, %v1246_v45  ;;  %v2825_v61 = vld [vmem:[%s5357_s3 + $0x20] sm:$0xff] }
 0x1de   :  { %v1000_v33 = vadd.f32 %v4773_v2, %v963_v29  ;;  %v935_v37 = vmul.f32 %v4760_v43, %v860_v11  ;;  %v855_v27 = vpop.permute.xlu0 %854  ;;  %2572 = vrot.lane.b32.xlu1 %v2273_v12, %s3400_s13  ;;  %v1492_v30 = vadd.f32 %v1462_v52, %v1247_v13  ;;  %v1709_v29 = vmul.f32 %v4738_v23, %v4726_v28  ;;  %v2822_v28 = vld [vmem:[%s5357_s3 + $0x8] sm:$0xff] }
 0x1df   :  { %v999_v4 = vadd.f32 %v4773_v2, %v962_v38  ;;  %v934_v25 = vmul.f32 %v4760_v43, %v855_v27  ;;  %2560 = vrot.lane.b32.xlu0 %v2267_v7, %s3400_s13  ;;  %v1736_v14 = vadd.f32 %v1706_v36, %v1491_v63  ;;  %v1494_v11 = vadd.f32 %v1464_v8, %v1249_v18  ;;  %v2268_v52 = vld [vmem:[#allocation3 + $0x11] sm:$0xff] }
 0x1e0   :  { %1031 = vst.msk [vmem:[#allocation2 + $0x88] sm:$0xff] %vm1013_vm0, %v1000_v33  ;;  %v965_v35 = vadd.f32 %v935_v37, %v720_v15  ;;  %v1737_v21 = vadd.f32 %v1707_v16, %v1492_v30  ;;  %v3403_v33 = vmov 0.0|0.0   ;;  %v3345_v9 = vpack.c.bf16 %v2822_v28, %v2821_v42 }
 0x1e1   :  { %1030 = vst.msk [vmem:[#allocation2 + $0x80] sm:$0xff] %vm1013_vm0, %v999_v4  ;;  %v964_v40 = vadd.f32 %v934_v25, %v719_v58  ;;  %v4783_v53 = vpop.permute.xlu1 %1183  ;;  %v4785_v54 = vld [vmem:[#allocation3 + $0x40] sm:$0xff]  ;;  %3344 = vmatprep.subr.bf16.mxu0 %v3403_v33  ;;  %3360 = vmatprep.subr.bf16.mxu1 %v3403_v33  ;;  %v1493_v37 = vadd.f32 %v1463_v1, %v1248_v10  ;;  %v3407_v16 = vmov 0.0  }
 0x1e2   :  { %v1002_v26 = vadd.f32 %v4773_v2, %v965_v35  ;;  %v4788_v51 = vpop.permute.xlu0 %1178  ;;  %2370 = vrot.lane.b32.xlu1 %v2341_v31, %s3397_s24  ;;  %2262 = vst.msk [vmem:[#allocation4 + $0x40] sm:$0xff] %vm1013_vm0, %v4785_v54  ;;  %v2409_v48 = vld [vmem:[#allocation3 + $0x3f] sm:$0xff]  ;;  %v1739_v4 = vadd.f32 %v1709_v29, %v1494_v11  ;;  %3346 = vmatpush3.bf16.msra.mxu0 %v3345_v9 }
 0x1e3   :  { %v1001_v57 = vadd.f32 %v4773_v2, %v964_v40  ;;  %2358 = vrot.lane.b32.xlu0 %v2335_v62, %s3397_s24  ;;  %v1738_v31 = vadd.f32 %v1708_v50, %v1493_v37  ;;  %3363 = vmatpush3.bf16.msra.mxu1 %v3345_v9  ;;  %v2342_v30 = vld [vmem:[#allocation3 + $0x42] sm:$0xff]  ;;  %v5459_v1 = vld [vmem:[#allocation39_spill] sm:$0xff] }
 0x1e4   :  { %1033 = vst.msk [vmem:[#allocation2 + $0x98] sm:$0xff] %vm1013_vm0, %v1002_v26  ;;  %3347 = vmatprep.subr.bf16.mxu0 %v3403_v33  ;;  %3361 = vmatprep.subr.bf16.mxu1 %v3403_v33  ;;  %v5461_v50 = vld [vmem:[#allocation19_spill] sm:$0xff] }
 0x1e5   :  { %1032 = vst.msk [vmem:[#allocation2 + $0x90] sm:$0xff] %vm1013_vm0, %v1001_v57  ;;  %v4797_v46 = vpop.permute.xlu1 %1193  ;;  %v2823_v57 = vld [vmem:[%s5357_s3 + $0x10] sm:$0xff]  ;;  %3298 = vmatprep.mubr.msk.f32.mxu0 %vm3406_vm5, %v3407_v16  ;;  %3316 = vmatprep.mubr.msk.f32.mxu1 %vm3406_vm5, %v3407_v16 }
 0x1e6   :  { %v4799_v32 = vpop.permute.xlu0 %1188  ;;  %2640 = vrot.lane.b32.xlu1 %v2612_v5, %s3401_s2  ;;  %v2824_v5 = vld [vmem:[%s5357_s3 + $0x18] sm:$0xff] }
 0x1e7   :  { %2628 = vrot.lane.b32.xlu0 %v2606_v22, %s3401_s2  ;;  %v3348_v22 = vpack.c.bf16 %v2824_v5, %v2823_v57  ;;  %v5465_v57 = vld [vmem:[#allocation21_spill] sm:$0xff] }
 0x1e8   :  { %v2114_v17 = vld [vmem:[#allocation2 + $0x80] ss:$2 sm:$0x7f]  ;;  %v2116_v59 = vld [vmem:[#allocation2 + $0x81] ss:$2 sm:$0x7f]  ;;  %v234_v5 = vmul.f32 %v4731_v6, %v5465_v57 }
 0x1e9   :  { %v4803_v19 = vpop.permute.xlu1 %1398  ;;  %v2121_v34 = vmax.f32 %v2114_v17, %v2116_v59  ;;  %3349 = vmatpush3.bf16.msra.mxu0 %v3348_v22  ;;  %3364 = vmatpush3.bf16.msra.mxu1 %v3348_v22 }
 0x1ea   :  { %v4805_v24 = vpop.permute.xlu0 %1393  ;;  %2438 = vrot.lane.b32.xlu1 %v2409_v48, %s3398_s25  ;;  %3350 = vmatprep.subr.bf16.mxu0 %v3403_v33 }
 0x1eb   :  { %2426 = vrot.lane.b32.xlu0 %v2403_v39, %s3398_s25  ;;  %3362 = vmatprep.subr.bf16.mxu1 %v3403_v33 }
 0x1ec   :  { %v2118_v56 = vld [vmem:[#allocation2 + $0x90] ss:$2 sm:$0x7f]  ;;  %v2120_v12 = vld [vmem:[#allocation2 + $0x91] ss:$2 sm:$0x7f] }
 0x1ed   :  { %v4813_v47 = vpop.permute.xlu1 %1408  ;;  %v2122_v20 = vmax.f32 %v2118_v56, %v2120_v12 }
 0x1ee   :  { %v4819_v7 = vpop.permute.xlu0 %1403  ;;  %2708 = vrot.lane.b32.xlu1 %v2409_v48, %s3402_s14  ;;  %v2274_v48 = vld [vmem:[#allocation3 + $0x41] sm:$0xff] }
 0x1ef   :  { %2696 = vrot.lane.b32.xlu0 %v2403_v39, %s3402_s14  ;;  %v2123_v55 = vmax.f32 %v2121_v34, %v2122_v20  ;;  %v2826_v34 = vld [vmem:[%s5357_s3 + $0x28] sm:$0x1f] }
 0x1f0   :  { %v3351_v13 = vpack.c.bf16 %v2826_v34, %v2825_v61 }
 0x1f1   :  { %v1869_v44 = vpop.permute.xlu1 %1868  ;;  %v2124_v49 = vmax.f32 %v2123_v55, 0.0  ;;  %v2336_v55 = vld [vmem:[#allocation3 + $0x12] sm:$0xff] }
 0x1f2   :  { %v1952_v3 = vmul.f32 %v4760_v43, %v1869_v44  ;;  %v1864_v38 = vpop.permute.xlu0 %1863  ;;  %2506 = vrot.lane.b32.xlu1 %v4785_v54, %s3399_s9  ;;  %3353 = vmatpush3.bf16.msk.msra.mxu0 %vm3352_vm4, %v3351_v13  ;;  %v447_v44 = vmul.f32 %v4720_v60, %v5459_v1 }
 0x1f3   :  { %v1951_v0 = vmul.f32 %v4760_v43, %v1864_v38  ;;  %2494 = vrot.lane.b32.xlu0 %v4699_v41, %s3399_s9  ;;  %2125 = vst.msk [vmem:[#allocation3 + $0x1c] sm:$0x7f] %vm1043_vm1, %v2124_v49  ;;  %3365 = vmatpush3.bf16.msk.msra.mxu1 %vm3352_vm4, %v3351_v13  ;;  %vm2604_vm4 = vcmask 238792  }
 0x1f4   :  { %v1982_v15 = vadd.f32 %v1952_v3, %v1737_v21  ;;  %3354 = vmatprep.subr.bf16.mxu1 %v3403_v33  ;;  %v5460_v21 = vld [vmem:[#allocation40_spill] sm:$0xff] }
 0x1f5   :  { %v1981_v27 = vadd.f32 %v1951_v0, %v1736_v14  ;;  %v1879_v58 = vpop.permute.xlu1 %1878  ;;  %v446_v29 = vmul.f32 %v4720_v60, %v5460_v21  ;;  %v232_v0 = vmul.f32 %v4731_v6, %v5461_v50 }
 0x1f6   :  { %v2019_v25 = vadd.f32 %v4773_v2, %v1982_v15  ;;  %v1954_v35 = vmul.f32 %v4760_v43, %v1879_v58  ;;  %v1874_v40 = vpop.permute.xlu0 %1873  ;;  %2776 = vrot.lane.b32.xlu1 %v4785_v54, %s3404_s19  ;;  %v5462_v15 = vld [vmem:[#allocation20_spill] sm:$0xff] }
 0x1f7   :  { %v2018_v26 = vadd.f32 %v4773_v2, %v1981_v27  ;;  %v1953_v62 = vmul.f32 %v4760_v43, %v1874_v40  ;;  %2764 = vrot.lane.b32.xlu0 %v4699_v41, %s3404_s19  ;;  %v231_v9 = vmul.f32 %v4731_v6, %v5462_v15  ;;  %v477_v58 = vadd.f32 %v447_v44, %v232_v0  ;;  %v5464_v40 = vld [vmem:[#allocation42_spill] sm:$0xff] }
 0x1f8   :  { %2049 = vst.msk [vmem:[#allocation2 + $0x188] sm:$0xff] %vm1013_vm0, %v2019_v25  ;;  %v1984_v54 = vadd.f32 %v1954_v35, %v1739_v4  ;;  %v5463_v4 = vld [vmem:[#allocation41_spill] sm:$0xff] }
 0x1f9   :  { %2048 = vst.msk [vmem:[#allocation2 + $0x180] sm:$0xff] %vm1013_vm0, %v2018_v26  ;;  %v1983_v41 = vadd.f32 %v1953_v62, %v1738_v31  ;;  %v625_v39 = vpop.permute.xlu1 %624  ;;  %v449_v25 = vmul.f32 %v4720_v60, %v5463_v4  ;;  %v476_v35 = vadd.f32 %v446_v29, %v231_v9  ;;  %v448_v31 = vmul.f32 %v4720_v60, %v5464_v40 }
 0x1fa   :  { %v2021_v17 = vadd.f32 %v4773_v2, %v1984_v54  ;;  %v620_v59 = vpop.permute.xlu0 %619  ;;  %2304 = vrot.lane.b32.xlu1 %v2274_v48, %s3396_s23  ;;  %v4874_v56 = vld [vmem:[#allocation3 + $0x18] sm:$0xff]  ;;  %v692_v42 = vmul.f32 %v4738_v23, %v625_v39 }
 0x1fb   :  { %v2020_v12 = vadd.f32 %v4773_v2, %v1983_v41  ;;  %2292 = vrot.lane.b32.xlu0 %v2268_v52, %s3396_s23  ;;  %2257 = vst.msk [vmem:[#allocation4 + $0x18] sm:$0xff] %vm1013_vm0, %v4874_v56  ;;  %v2607_v11 = vld [vmem:[#allocation3 + $0x16] sm:$0xff]  ;;  %v691_v37 = vmul.f32 %v4738_v23, %v620_v59  ;;  %v479_v34 = vadd.f32 %v449_v25, %v234_v5 }
 0x1fc   :  { %2051 = vst.msk [vmem:[#allocation2 + $0x198] sm:$0xff] %vm1013_vm0, %v2021_v17  ;;  %v722_v54 = vadd.f32 %v692_v42, %v477_v58  ;;  %v5466_v17 = vld [vmem:[#allocation22_spill] sm:$0xff] }
 0x1fd   :  { %2050 = vst.msk [vmem:[#allocation2 + $0x190] sm:$0xff] %vm1013_vm0, %v2020_v12  ;;  %v635_v20 = vpop.permute.xlu1 %634  ;;  %v233_v59 = vmul.f32 %v4731_v6, %v5466_v17  ;;  %v2269_v4 = vld [vmem:[#allocation3 + $0x19] sm:$0xff] }
 0x1fe   :  { %v630_v45 = vpop.permute.xlu0 %629  ;;  %2574 = vrot.lane.b32.xlu1 %v2274_v48, %s3400_s13  ;;  %v694_v22 = vmul.f32 %v4738_v23, %v635_v20  ;;  %v2404_v48 = vld [vmem:[#allocation3 + $0x17] sm:$0xff] }
 0x1ff   :  { %2562 = vrot.lane.b32.xlu0 %v2268_v52, %s3400_s13  ;;  %v721_v52 = vadd.f32 %v691_v37, %v476_v35  ;;  %v693_v12 = vmul.f32 %v4738_v23, %v630_v45 }
 0x200   :  { %v2205_v8 = vld [vmem:[#allocation2 + $0x180] ss:$2 sm:$0x7f]  ;;  %v2207_v18 = vld [vmem:[#allocation2 + $0x181] ss:$2 sm:$0x7f] }
 0x201   :  { %v4896_v36 = vpop.permute.xlu1 %1643  ;;  %v2212_v38 = vmax.f32 %v2205_v8, %v2207_v18  ;;  %v724_v8 = vadd.f32 %v694_v22, %v479_v34  ;;  %v1251_v22 = vmul.f32 %v4731_v6, %v4783_v53  ;;  %v1468_v53 = vmul.f32 %v4720_v60, %v4813_v47  ;;  %v2337_v47 = vld [vmem:[#allocation3 + $0x1a] sm:$0xff] }
 0x202   :  { %v4899_v63 = vpop.permute.xlu0 %1638  ;;  %2372 = vrot.lane.b32.xlu1 %v2342_v30, %s3397_s24 }
 0x203   :  { %2360 = vrot.lane.b32.xlu0 %v2336_v55, %s3397_s24  ;;  %v478_v55 = vadd.f32 %v448_v31, %v233_v59  ;;  %v1466_v31 = vmul.f32 %v4720_v60, %v4803_v19  ;;  %v1250_v19 = vmul.f32 %v4731_v6, %v4788_v51 }
 0x204   :  { %v2209_v49 = vld [vmem:[#allocation2 + $0x190] ss:$2 sm:$0x7f]  ;;  %v2211_v10 = vld [vmem:[#allocation2 + $0x191] ss:$2 sm:$0x7f] }
 0x205   :  { %v4907_v3 = vpop.permute.xlu1 %1653  ;;  %v2213_v14 = vmax.f32 %v2209_v49, %v2211_v10  ;;  %v723_v49 = vadd.f32 %v693_v12, %v478_v55  ;;  %v1496_v17 = vadd.f32 %v1466_v31, %v1251_v22 }
 0x206   :  { %v4912_v28 = vpop.permute.xlu0 %1648  ;;  %v1713_v34 = vmul.f32 %v4738_v23, %v4907_v3 }
 0x207   :  { %2630 = vrot.lane.b32.xlu0 %v2607_v11, %s3401_s2  ;;  %v2214_v27 = vmax.f32 %v2212_v38, %v2213_v14 }
 0x209   :  { %v870_v26 = vpop.permute.xlu1 %869  ;;  %v2215_v62 = vmax.f32 %v2214_v27, 0.0 }
 0x20a   :  { %v937_v41 = vmul.f32 %v4760_v43, %v870_v26  ;;  %v865_v39 = vpop.permute.xlu0 %864 }
 0x20b   :  { %v936_v61 = vmul.f32 %v4760_v43, %v865_v39  ;;  %2428 = vrot.lane.b32.xlu0 %v2404_v48, %s3398_s25  ;;  %2216 = vst.msk [vmem:[#allocation3 + $0x4d] sm:$0x7f] %vm1043_vm1, %v2215_v62 }
 0x20c   :  { %v967_v13 = vadd.f32 %v937_v41, %v722_v54  ;;  %v1711_v41 = vmul.f32 %v4738_v23, %v4896_v36  ;;  %v1253_v36 = vmul.f32 %v4731_v6, %v4797_v46  ;;  %v1712_v46 = vmul.f32 %v4738_v23, %v4912_v28 }
 0x20d   :  { %v966_v20 = vadd.f32 %v936_v61, %v721_v52  ;;  %v880_v30 = vpop.permute.xlu1 %879  ;;  %v1467_v52 = vmul.f32 %v4720_v60, %v4819_v7 }
 0x20e   :  { %v1004_v18 = vadd.f32 %v4773_v2, %v967_v13  ;;  %v939_v1 = vmul.f32 %v4760_v43, %v880_v30  ;;  %v875_v44 = vpop.permute.xlu0 %874  ;;  %v1741_v61 = vadd.f32 %v1711_v41, %v1496_v17  ;;  %v5467_v41 = vld [vmem:[#allocation43_spill] sm:$0xff]  ;;  %v5468_v17 = vld [vmem:[#allocation44_spill] sm:$0xff] }
 0x20f   :  { %v1003_v45 = vadd.f32 %v4773_v2, %v966_v20  ;;  %v938_v10 = vmul.f32 %v4760_v43, %v875_v44  ;;  %2698 = vrot.lane.b32.xlu0 %v2404_v48, %s3402_s14  ;;  %v1710_v48 = vmul.f32 %v4738_v23, %v4899_v63  ;;  %v1252_v63 = vmul.f32 %v4731_v6, %v4799_v32 }
 0x210   :  { %1035 = vst.msk [vmem:[#allocation2 + $0xa8] sm:$0xff] %vm1013_vm0, %v1004_v18  ;;  %v969_v21 = vadd.f32 %v939_v1, %v724_v8  ;;  %v1498_v32 = vadd.f32 %v1468_v53, %v1253_v36  ;;  %v450_v53 = vmul.f32 %v4720_v60, %v5468_v17 }
 0x211   :  { %1034 = vst.msk [vmem:[#allocation2 + $0xa0] sm:$0xff] %vm1013_vm0, %v1003_v45  ;;  %v968_v29 = vadd.f32 %v938_v10, %v723_v49  ;;  %v4939_v38 = vpop.permute.xlu1 %1203  ;;  %v1497_v8 = vadd.f32 %v1467_v52, %v1252_v63 }
 0x212   :  { %v1006_v14 = vadd.f32 %v4773_v2, %v969_v21  ;;  %v4942_v50 = vpop.permute.xlu0 %1198  ;;  %v2613_v0 = vld [vmem:[#allocation3 + $0x46] sm:$0xff]  ;;  %v2253_v15 = vld [vmem:[#allocation3 + $0x50] sm:$0x3]  ;;  %v1743_v1 = vadd.f32 %v1713_v34, %v1498_v32 }
 0x213   :  { %v2478_v42 = vld [vmem:[#allocation3 + $0x48] sm:$0xff]  ;;  %v1005_v11 = vadd.f32 %v4773_v2, %v968_v29  ;;  %2496 = vrot.lane.b32.xlu0 %v4874_v56, %s3399_s9  ;;  %2642 = vrot.lane.b32.xlu1 %v2613_v0, %s3401_s2  ;;  %2265 = vst.msk [vmem:[#allocation4 + $0x50] sm:$0x3] %vm2264_vm6, %v2253_v15  ;;  %v1742_v10 = vadd.f32 %v1712_v46, %v1497_v8  ;;  %vm2672_vm6 = vcmask 279792  }
 0x214   :  { %2263 = vst.msk [vmem:[#allocation4 + $0x48] sm:$0xff] %vm1013_vm0, %v2478_v42  ;;  %1037 = vst.msk [vmem:[#allocation2 + $0xb8] sm:$0xff] %vm1013_vm0, %v1006_v14  ;;  %v2410_v27 = vld [vmem:[#allocation3 + $0x47] sm:$0xff] }
 0x215   :  { %1036 = vst.msk [vmem:[#allocation2 + $0xb0] sm:$0xff] %vm1013_vm0, %v1005_v11  ;;  %v4951_v9 = vpop.permute.xlu1 %1213  ;;  %v2275_v28 = vld [vmem:[#allocation3 + $0x49] sm:$0xff] }
 0x216   :  { %v4953_v37 = vpop.permute.xlu0 %1208 }
 0x217   :  { %2766 = vrot.lane.b32.xlu0 %v4874_v56, %s3404_s19  ;;  %2440 = vrot.lane.b32.xlu1 %v2410_v27, %s3398_s25  ;;  %v1465_v56 = vmul.f32 %v4720_v60, %v4805_v24 }
 0x218   :  { %v2127_v25 = vld [vmem:[#allocation2 + $0xa0] ss:$2 sm:$0x7f]  ;;  %v2129_v35 = vld [vmem:[#allocation2 + $0xa1] ss:$2 sm:$0x7f] }
 0x219   :  { %v4958_v58 = vpop.permute.xlu1 %1418  ;;  %v2134_v5 = vmax.f32 %v2127_v25, %v2129_v35  ;;  %v1495_v59 = vadd.f32 %v1465_v56, %v1250_v19  ;;  %v451_v19 = vmul.f32 %v4720_v60, %v5467_v41 }
 0x21a   :  { %v4960_v40 = vpop.permute.xlu0 %1413 }
 0x21b   :  { %2294 = vrot.lane.b32.xlu0 %v2269_v4, %s3396_s23  ;;  %2710 = vrot.lane.b32.xlu1 %v2410_v27, %s3402_s14  ;;  %v1740_v20 = vadd.f32 %v1710_v48, %v1495_v59 }
 0x21c   :  { %v2131_v26 = vld [vmem:[#allocation2 + $0xb0] ss:$2 sm:$0x7f]  ;;  %v2133_v62 = vld [vmem:[#allocation2 + $0xb1] ss:$2 sm:$0x7f] }
 0x21d   :  { %v4968_v57 = vpop.permute.xlu1 %1428  ;;  %v2135_v54 = vmax.f32 %v2131_v26, %v2133_v62  ;;  %v2343_v26 = vld [vmem:[#allocation3 + $0x4a] sm:$0xff] }
 0x21e   :  { %v4974_v39 = vpop.permute.xlu0 %1423 }
 0x21f   :  { %2564 = vrot.lane.b32.xlu0 %v2269_v4, %s3400_s13  ;;  %2508 = vrot.lane.b32.xlu1 %v2478_v42, %s3399_s9  ;;  %v2136_v24 = vmax.f32 %v2134_v5, %v2135_v54 }
 0x221   :  { %v1889_v51 = vpop.permute.xlu1 %1888  ;;  %v2137_v12 = vmax.f32 %v2136_v24, 0.0 }
 0x222   :  { %v1956_v13 = vmul.f32 %v4760_v43, %v1889_v51  ;;  %v1884_v55 = vpop.permute.xlu0 %1883  ;;  %v5469_v51 = vld [vmem:[#allocation23_spill] sm:$0xff] }
 0x223   :  { %v1955_v30 = vmul.f32 %v4760_v43, %v1884_v55  ;;  %2362 = vrot.lane.b32.xlu0 %v2337_v47, %s3397_s24  ;;  %2778 = vrot.lane.b32.xlu1 %v2478_v42, %s3404_s19  ;;  %2138 = vst.msk [vmem:[#allocation3 + $0x23] sm:$0x7f] %vm1043_vm1, %v2137_v12  ;;  %v236_v12 = vmul.f32 %v4731_v6, %v5469_v51 }
 0x224   :  { %v1986_v7 = vadd.f32 %v1956_v13, %v1741_v61  ;;  %v5470_v13 = vld [vmem:[#allocation24_spill] sm:$0xff] }
 0x225   :  { %v1985_v3 = vadd.f32 %v1955_v30, %v1740_v20  ;;  %v1899_v18 = vpop.permute.xlu1 %1898  ;;  %v235_v55 = vmul.f32 %v4731_v6, %v5470_v13  ;;  %v481_v46 = vadd.f32 %v451_v19, %v236_v12  ;;  %v5471_v30 = vld [vmem:[#allocation45_spill] sm:$0xff]  ;;  %v1471_v12 = vmul.f32 %v4720_v60, %v4974_v39 }
 0x226   :  { %v2023_v44 = vadd.f32 %v4773_v2, %v1986_v7  ;;  %v1958_v49 = vmul.f32 %v4760_v43, %v1899_v18  ;;  %v1894_v45 = vpop.permute.xlu0 %1893  ;;  %v453_v32 = vmul.f32 %v4720_v60, %v5471_v30  ;;  %v5472_v7 = vld [vmem:[#allocation46_spill] sm:$0xff] }
 0x227   :  { %v2022_v21 = vadd.f32 %v4773_v2, %v1985_v3  ;;  %v1957_v29 = vmul.f32 %v4760_v43, %v1894_v45  ;;  %2306 = vrot.lane.b32.xlu1 %v2275_v28, %s3396_s23  ;;  %v452_v8 = vmul.f32 %v4720_v60, %v5472_v7  ;;  %v5473_v3 = vld [vmem:[#allocation25_spill] sm:$0xff]  ;;  %v5474_v45 = vld [vmem:[#allocation26_spill] sm:$0xff] }
 0x228   :  { %2053 = vst.msk [vmem:[#allocation2 + $0x1a8] sm:$0xff] %vm1013_vm0, %v2023_v44  ;;  %v1988_v14 = vadd.f32 %v1958_v49, %v1743_v1  ;;  %v238_v18 = vmul.f32 %v4731_v6, %v5473_v3  ;;  %v480_v1 = vadd.f32 %v450_v53, %v235_v55 }
 0x229   :  { %2052 = vst.msk [vmem:[#allocation2 + $0x1a0] sm:$0xff] %vm1013_vm0, %v2022_v21  ;;  %v1987_v0 = vadd.f32 %v1957_v29, %v1742_v10  ;;  %v645_v42 = vpop.permute.xlu1 %644 }
 0x22a   :  { %v2025_v11 = vadd.f32 %v4773_v2, %v1988_v14  ;;  %v640_v15 = vpop.permute.xlu0 %639  ;;  %v2608_v27 = vld [vmem:[#allocation3 + $0x1e] sm:$0xff]  ;;  %v696_v63 = vmul.f32 %v4738_v23, %v645_v42 }
 0x22b   :  { %v2024_v4 = vadd.f32 %v4773_v2, %v1987_v0  ;;  %2576 = vrot.lane.b32.xlu1 %v2275_v28, %s3400_s13  ;;  %2632 = vrot.lane.b32.xlu0 %v2608_v27, %s3401_s2  ;;  %v2247_v25 = vld [vmem:[#allocation3 + $0x20] sm:$0xff]  ;;  %v695_v47 = vmul.f32 %v4738_v23, %v640_v15  ;;  %v237_v28 = vmul.f32 %v4731_v6, %v5474_v45 }
 0x22c   :  { %2055 = vst.msk [vmem:[#allocation2 + $0x1b8] sm:$0xff] %vm1013_vm0, %v2025_v11  ;;  %2258 = vst.msk [vmem:[#allocation4 + $0x20] sm:$0xff] %vm1013_vm0, %v2247_v25  ;;  %v2405_v62 = vld [vmem:[#allocation3 + $0x1f] sm:$0xff]  ;;  %v726_v10 = vadd.f32 %v696_v63, %v481_v46  ;;  %v483_v15 = vadd.f32 %v453_v32, %v238_v18 }
 0x22d   :  { %2054 = vst.msk [vmem:[#allocation2 + $0x1b0] sm:$0xff] %vm1013_vm0, %v2024_v4  ;;  %v655_v35 = vpop.permute.xlu1 %654  ;;  %v2473_v34 = vld [vmem:[#allocation3 + $0x20] sm:$0xff]  ;;  %v725_v0 = vadd.f32 %v695_v47, %v480_v1  ;;  %v482_v27 = vadd.f32 %v452_v8, %v237_v28  ;;  %v1470_v4 = vmul.f32 %v4720_v60, %v4958_v58 }
 0x22e   :  { %v650_v31 = vpop.permute.xlu0 %649  ;;  %v698_v21 = vmul.f32 %v4738_v23, %v655_v35  ;;  %v1255_v35 = vmul.f32 %v4731_v6, %v4939_v38 }
 0x22f   :  { %2374 = vrot.lane.b32.xlu1 %v2343_v26, %s3397_s24  ;;  %2430 = vrot.lane.b32.xlu0 %v2405_v62, %s3398_s25  ;;  %v697_v42 = vmul.f32 %v4738_v23, %v650_v31  ;;  %v1254_v26 = vmul.f32 %v4731_v6, %v4942_v50  ;;  %v1469_v31 = vmul.f32 %v4720_v60, %v4960_v40 }
 0x230   :  { %v2218_v5 = vld [vmem:[#allocation2 + $0x1a0] ss:$2 sm:$0x7f]  ;;  %v2220_v54 = vld [vmem:[#allocation2 + $0x1a1] ss:$2 sm:$0x7f]  ;;  %v1257_v40 = vmul.f32 %v4731_v6, %v4951_v9 }
 0x231   :  { %v1664_v56 = vpop.permute.xlu1 %1663  ;;  %v2225_v59 = vmax.f32 %v2218_v5, %v2220_v54  ;;  %v728_v54 = vadd.f32 %v698_v21, %v483_v15  ;;  %v727_v17 = vadd.f32 %v697_v42, %v482_v27  ;;  %v1499_v51 = vadd.f32 %v1469_v31, %v1254_v26 }
 0x232   :  { %v1659_v22 = vpop.permute.xlu0 %1658  ;;  %v1715_v41 = vmul.f32 %v4738_v23, %v1664_v56  ;;  %v1500_v56 = vadd.f32 %v1470_v4, %v1255_v35 }
 0x233   :  { %2700 = vrot.lane.b32.xlu0 %v2405_v62, %s3402_s14  ;;  %v1714_v38 = vmul.f32 %v4738_v23, %v1659_v22  ;;  %v1256_v22 = vmul.f32 %v4731_v6, %v4953_v37 }
 0x234   :  { %v2222_v48 = vld [vmem:[#allocation2 + $0x1b0] ss:$2 sm:$0x7f]  ;;  %v2224_v24 = vld [vmem:[#allocation2 + $0x1b1] ss:$2 sm:$0x7f]  ;;  %v1745_v13 = vadd.f32 %v1715_v41, %v1500_v56 }
 0x235   :  { %v1674_v36 = vpop.permute.xlu1 %1673  ;;  %v2226_v52 = vmax.f32 %v2222_v48, %v2224_v24  ;;  %v5052_v24 = vld [vmem:[#allocation3 + $0x21] sm:$0xff]  ;;  %v1744_v46 = vadd.f32 %v1714_v38, %v1499_v51 }
 0x236   :  { %v1669_v61 = vpop.permute.xlu0 %1668  ;;  %v1717_v9 = vmul.f32 %v4738_v23, %v1674_v36  ;;  %v1501_v36 = vadd.f32 %v1471_v12, %v1256_v22 }
 0x237   :  { %2498 = vrot.lane.b32.xlu0 %v2473_v34, %s3399_s9  ;;  %v2227_v20 = vmax.f32 %v2225_v59, %v2226_v52  ;;  %v1472_v59 = vmul.f32 %v4720_v60, %v4968_v57  ;;  %v1716_v6 = vmul.f32 %v4738_v23, %v1669_v61 }
 0x239   :  { %v890_v44 = vpop.permute.xlu1 %889  ;;  %v2228_v49 = vmax.f32 %v2227_v20, 0.0  ;;  %v1502_v39 = vadd.f32 %v1472_v59, %v1257_v40  ;;  %v1746_v1 = vadd.f32 %v1716_v6, %v1501_v36 }
 0x23a   :  { %v941_v29 = vmul.f32 %v4760_v43, %v890_v44  ;;  %v885_v14 = vpop.permute.xlu0 %884 }
 0x23b   :  { %v940_v11 = vmul.f32 %v4760_v43, %v885_v14  ;;  %2768 = vrot.lane.b32.xlu0 %v2473_v34, %s3404_s19  ;;  %2229 = vst.msk [vmem:[#allocation3 + $0x54] sm:$0x7f] %vm1043_vm1, %v2228_v49  ;;  %v1747_v8 = vadd.f32 %v1717_v9, %v1502_v39 }
 0x23c   :  { %v971_v25 = vadd.f32 %v941_v29, %v726_v10 }
 0x23d   :  { %v970_v62 = vadd.f32 %v940_v11, %v725_v0  ;;  %v900_v5 = vpop.permute.xlu1 %899 }
 0x23e   :  { %v1008_v19 = vadd.f32 %v4773_v2, %v971_v25  ;;  %v943_v48 = vmul.f32 %v4760_v43, %v900_v5  ;;  %v895_v58 = vpop.permute.xlu0 %894 }
 0x23f   :  { %v1007_v50 = vadd.f32 %v4773_v2, %v970_v62  ;;  %v942_v53 = vmul.f32 %v4760_v43, %v895_v58  ;;  %2566 = vrot.lane.b32.xlu0 %v5052_v24, %s3400_s13 }
 0x240   :  { %1039 = vst.msk [vmem:[#allocation2 + $0xc8] sm:$0xff] %vm1013_vm0, %v1008_v19  ;;  %v973_v52 = vadd.f32 %v943_v48, %v728_v54 }
 0x241   :  { %1038 = vst.msk [vmem:[#allocation2 + $0xc0] sm:$0xff] %vm1013_vm0, %v1007_v50  ;;  %v972_v63 = vadd.f32 %v942_v53, %v727_v17  ;;  %v1909_v34 = vpop.permute.xlu1 %1908 }
 0x242   :  { %v1010_v55 = vadd.f32 %v4773_v2, %v973_v52  ;;  %v1960_v57 = vmul.f32 %v4760_v43, %v1909_v34  ;;  %v1904_v47 = vpop.permute.xlu0 %1903  ;;  %v2614_v20 = vld [vmem:[#allocation3 + $0x4e] sm:$0xff] }
 0x243   :  { %v1009_v37 = vadd.f32 %v4773_v2, %v972_v63  ;;  %v1959_v60 = vmul.f32 %v4760_v43, %v1904_v47  ;;  %2644 = vrot.lane.b32.xlu1 %v2614_v20, %s3401_s2  ;;  %v2411_v18 = vld [vmem:[#allocation3 + $0x4f] sm:$0xff] }
 0x244   :  { %1041 = vst.msk [vmem:[#allocation2 + $0xd8] sm:$0xff] %vm1013_vm0, %v1010_v55  ;;  %v1990_v30 = vadd.f32 %v1960_v57, %v1745_v13  ;;  %v2479_v35 = vld [vmem:[#allocation3 + $0x50] sm:$0xff] }
 0x245   :  { %1040 = vst.msk [vmem:[#allocation2 + $0xd0] sm:$0xff] %vm1013_vm0, %v1009_v37  ;;  %v1989_v32 = vadd.f32 %v1959_v60, %v1744_v46  ;;  %v1919_v7 = vpop.permute.xlu1 %1918  ;;  %v2547_v50 = vld [vmem:[#allocation3 + $0x51] sm:$0xff] }
 0x246   :  { %v2027_v3 = vadd.f32 %v4773_v2, %v1990_v30  ;;  %v1962_v23 = vmul.f32 %v4760_v43, %v1919_v7  ;;  %v1914_v61 = vpop.permute.xlu0 %1913  ;;  %v2276_v20 = vld [vmem:[#allocation3 + $0x51] sm:$0x3]  ;;  %v2412_v60 = vld [vmem:[#allocation3 + $0x57] sm:$0x3] }
 0x247   :  { %v2026_v44 = vadd.f32 %v4773_v2, %v1989_v32  ;;  %v1961_v49 = vmul.f32 %v4760_v43, %v1914_v61  ;;  %2442 = vrot.lane.b32.xlu1 %v2411_v18, %s3398_s25  ;;  %v2548_v32 = vld [vmem:[#allocation3 + $0x59] sm:$0x3]  ;;  %v2344_v7 = vld [vmem:[#allocation3 + $0x52] sm:$0x3] }
 0x248   :  { %2057 = vst.msk [vmem:[#allocation2 + $0x1c8] sm:$0xff] %vm1013_vm0, %v2027_v3  ;;  %v1992_v45 = vadd.f32 %v1962_v23, %v1747_v8  ;;  %v2140_v21 = vld [vmem:[#allocation2 + $0xc0] ss:$2 sm:$0x7f] }
 0x249   :  { %2056 = vst.msk [vmem:[#allocation2 + $0x1c0] sm:$0xff] %vm1013_vm0, %v2026_v44  ;;  %v1991_v28 = vadd.f32 %v1961_v49, %v1746_v1  ;;  %v2301_v10 = vpop.permute.xlu1 %2300  ;;  %v2142_v29 = vld [vmem:[#allocation2 + $0xc1] ss:$2 sm:$0x7f] }
 0x24a   :  { %v2029_v14 = vadd.f32 %v4773_v2, %v1992_v45  ;;  %v2289_v0 = vpop.permute.xlu0 %2288  ;;  %v2147_v15 = vmax.f32 %v2140_v21, %v2142_v29  ;;  %v2480_v61 = vld [vmem:[#allocation3 + $0x58] sm:$0x3] }
 0x24b   :  { %v2028_v42 = vadd.f32 %v4773_v2, %v1991_v28  ;;  %2322 = vst.msk [vmem:[#allocation4] sm:$0xff] %vm2321_vm7, %v2289_v0  ;;  %2712 = vrot.lane.b32.xlu1 %v2411_v18, %s3402_s14 }
 0x24c   :  { %v2144_v43 = vld [vmem:[#allocation2 + $0xd0] ss:$2 sm:$0x7f]  ;;  %v2146_v11 = vld [vmem:[#allocation2 + $0xd1] ss:$2 sm:$0x7f] }
 0x24d   :  { %2059 = vst.msk [vmem:[#allocation2 + $0x1d8] sm:$0xff] %vm1013_vm0, %v2029_v14  ;;  %v2148_v27 = vmax.f32 %v2144_v43, %v2146_v11  ;;  %2058 = vst.msk [vmem:[#allocation2 + $0x1d0] sm:$0xff] %vm1013_vm0, %v2028_v42  ;;  %v2369_v4 = vpop.permute.xlu1 %2368 }
 0x24e   :  { %v2357_v25 = vpop.permute.xlu0 %2356 }
 0x24f   :  { %v2149_v26 = vmax.f32 %v2147_v15, %v2148_v27  ;;  %2390 = vst.msk [vmem:[#allocation4] sm:$0xff] %vm2389_vm8, %v2357_v25  ;;  %2510 = vrot.lane.b32.xlu1 %v2479_v35, %s3399_s9 }
 0x250   :  { %v2231_v62 = vld [vmem:[#allocation2 + $0x1c0] ss:$2 sm:$0x7f]  ;;  %v2233_v5 = vld [vmem:[#allocation2 + $0x1c1] ss:$2 sm:$0x7f] }
 0x251   :  { %v2150_v2 = vmax.f32 %v2149_v26, 0.0  ;;  %v2437_v31 = vpop.permute.xlu1 %2436  ;;  %v2238_v58 = vmax.f32 %v2231_v62, %v2233_v5 }
 0x252   :  { %v2425_v54 = vpop.permute.xlu0 %2424 }
 0x253   :  { %2151 = vst.msk [vmem:[#allocation3 + $0x2a] sm:$0x7f] %vm1043_vm1, %v2150_v2  ;;  %2780 = vrot.lane.b32.xlu1 %v2479_v35, %s3404_s19 }
 0x254   :  { %2458 = vst.msk [vmem:[#allocation4] sm:$0xff] %vm2457_vm9, %v2425_v54  ;;  %v2235_v41 = vld [vmem:[#allocation2 + $0x1d0] ss:$2 sm:$0x7f] }
 0x255   :  { %v2237_v19 = vld [vmem:[#allocation2 + $0x1d1] ss:$2 sm:$0x7f]  ;;  %v2505_v48 = vpop.permute.xlu1 %2504 }
 0x256   :  { %v2239_v17 = vmax.f32 %v2235_v41, %v2237_v19  ;;  %v2493_v38 = vpop.permute.xlu0 %2492 }
 0x257   :  { %2526 = vst.msk [vmem:[#allocation4] sm:$0xff] %vm2525_vm10, %v2493_v38  ;;  %2578 = vrot.lane.b32.xlu1 %v2547_v50, %s3400_s13 }
 0x258   :  { %v2240_v53 = vmax.f32 %v2238_v58, %v2239_v17 }
 0x259   :  { %v2303_v40 = vpop.permute.xlu1 %2302 }
 0x25a   :  { %v2241_v56 = vmax.f32 %v2240_v53, 0.0  ;;  %v5098_v59 = vld [vmem:[#allocation3 + $0x30] sm:$0xff]  ;;  %2329 = vst.msk [vmem:[#allocation4 + $0x38] sm:$0xff] %vm2321_vm7, %v2303_v40  ;;  %v2291_v52 = vpop.permute.xlu0 %2290  ;;  %v2609_v22 = vld [vmem:[#allocation3 + $0x26] sm:$0xff] }
 0x25b   :  { %2260 = vst.msk [vmem:[#allocation4 + $0x30] sm:$0xff] %vm1013_vm0, %v5098_v59  ;;  %2634 = vrot.lane.b32.xlu0 %v2609_v22, %s3401_s2  ;;  %v5105_v51 = vld [vmem:[#allocation3 + $0x28] sm:$0xff] }
 0x25c   :  { %2323 = vst.msk [vmem:[#allocation4 + $0x8] sm:$0xff] %vm2321_vm7, %v2291_v52  ;;  %2328 = vst.msk [vmem:[#allocation4 + $0x30] sm:$0xff] %vm2321_vm7, %v2301_v10  ;;  %v5113_v34 = vld [vmem:[#allocation3 + $0x27] sm:$0xff] }
 0x25d   :  { %2242 = vst.msk [vmem:[#allocation3 + $0x5b] sm:$0x7f] %vm1043_vm1, %v2241_v56  ;;  %v2573_v12 = vpop.permute.xlu1 %2572  ;;  %vm2400_vm1 = vcmask 115792  }
 0x25e   :  { %2259 = vst.msk [vmem:[#allocation4 + $0x28] sm:$0xff] %vm1013_vm0, %v5105_v51  ;;  %v2561_v63 = vpop.permute.xlu0 %2560  ;;  %vm2332_vm0 = vcmask 74792  }
 0x25f   :  { %2396 = vst.msk [vmem:[#allocation4 + $0x30] sm:$0xff] %vm2389_vm8, %v2369_v4  ;;  %2702 = vrot.lane.b32.xlu0 %v5113_v34, %s3402_s14 }
 0x260   :  { %2464 = vst.msk [vmem:[#allocation4 + $0x30] sm:$0xff] %vm2457_vm9, %v2437_v31 }
 0x261   :  { %2532 = vst.msk [vmem:[#allocation4 + $0x30] sm:$0xff] %vm2525_vm10, %v2505_v48  ;;  %v2371_v13 = vpop.permute.xlu1 %2370 }
 0x262   :  { %2594 = vst.msk [vmem:[#allocation4] sm:$0xff] %vm2593_vm11, %v2561_v63  ;;  %2600 = vst.msk [vmem:[#allocation4 + $0x30] sm:$0xff] %vm2593_vm11, %v2573_v12  ;;  %v2359_v9 = vpop.permute.xlu0 %2358 }
 0x263   :  { %2397 = vst.msk [vmem:[#allocation4 + $0x38] sm:$0xff] %vm2389_vm8, %v2371_v13  ;;  %2391 = vst.msk [vmem:[#allocation4 + $0x8] sm:$0xff] %vm2389_vm8, %v2359_v9  ;;  %2770 = vrot.lane.b32.xlu0 %v5105_v51, %s3404_s19 }
 0x264   :  { %v2615_v55 = vld [vmem:[#allocation3 + $0x56] sm:$0xff]  ;;  %v2684_v23 = vld [vmem:[#allocation3 + $0x5f] sm:$0x3] }
 0x265   :  { %2646 = vrot.lane.b32.xlu1 %v2615_v55, %s3401_s2  ;;  %v2641_v57 = vpop.permute.xlu1 %2640  ;;  %v2683_v46 = vld [vmem:[#allocation3 + $0x57] sm:$0xff]  ;;  %v2752_v28 = vld [vmem:[#allocation3 + $0x60] sm:$0x3] }
 0x266   :  { %2668 = vst.msk [vmem:[#allocation4 + $0x30] sm:$0xff] %vm2661_vm12, %v2641_v57  ;;  %v2629_v47 = vpop.permute.xlu0 %2628  ;;  %v2751_v39 = vld [vmem:[#allocation3 + $0x58] sm:$0xff] }
 0x267   :  { %2662 = vst.msk [vmem:[#allocation4] sm:$0xff] %vm2661_vm12, %v2629_v47  ;;  %2308 = vrot.lane.b32.xlu0 %v2276_v20, %s3396_s23  ;;  %v2616_v44 = vld [vmem:[#allocation3 + $0x5e] sm:$0x3] }
 0x269   :  { %2714 = vrot.lane.b32.xlu1 %v2683_v46, %s3402_s14  ;;  %v2439_v6 = vpop.permute.xlu1 %2438 }
 0x26a   :  { %2465 = vst.msk [vmem:[#allocation4 + $0x38] sm:$0xff] %vm2457_vm9, %v2439_v6  ;;  %v2427_v37 = vpop.permute.xlu0 %2426 }
 0x26b   :  { %2459 = vst.msk [vmem:[#allocation4 + $0x8] sm:$0xff] %vm2457_vm9, %v2427_v37  ;;  %2444 = vrot.lane.b32.xlu0 %v2412_v60, %s3398_s25 }
 0x26d   :  { %2782 = vrot.lane.b32.xlu1 %v2751_v39, %s3404_s19  ;;  %v2709_v30 = vpop.permute.xlu1 %2708 }
 0x26e   :  { %2736 = vst.msk [vmem:[#allocation4 + $0x30] sm:$0xff] %vm2729_vm13, %v2709_v30  ;;  %v2697_v36 = vpop.permute.xlu0 %2696 }
 0x26f   :  { %2730 = vst.msk [vmem:[#allocation4] sm:$0xff] %vm2729_vm13, %v2697_v36  ;;  %2580 = vrot.lane.b32.xlu0 %v2548_v32, %s3400_s13 }
 0x271   :  { %2376 = vrot.lane.b32.xlu1 %v2344_v7, %s3397_s24  ;;  %v2507_v8 = vpop.permute.xlu1 %2506 }
 0x272   :  { %2533 = vst.msk [vmem:[#allocation4 + $0x38] sm:$0xff] %vm2525_vm10, %v2507_v8  ;;  %v2495_v3 = vpop.permute.xlu0 %2494 }
 0x273   :  { %2527 = vst.msk [vmem:[#allocation4 + $0x8] sm:$0xff] %vm2525_vm10, %v2495_v3  ;;  %2716 = vrot.lane.b32.xlu0 %v2684_v23, %s3402_s14 }
 0x275   :  { %2512 = vrot.lane.b32.xlu1 %v2480_v61, %s3399_s9  ;;  %v2777_v18 = vpop.permute.xlu1 %2776 }
 0x276   :  { %2804 = vst.msk [vmem:[#allocation4 + $0x30] sm:$0xff] %vm5364_vm14, %v2777_v18  ;;  %v2765_v1 = vpop.permute.xlu0 %2764 }
 0x277   :  { %2798 = vst.msk [vmem:[#allocation4] sm:$0xff] %vm5364_vm14, %v2765_v1 }
 0x279   :  { %2648 = vrot.lane.b32.xlu1 %v2616_v44, %s3401_s2  ;;  %v2305_v49 = vpop.permute.xlu1 %2304 }
 0x27a   :  { %2330 = vst.msk [vmem:[#allocation4 + $0x40] sm:$0xff] %vm2321_vm7, %v2305_v49  ;;  %v2293_v45 = vpop.permute.xlu0 %2292  ;;  %v5215_v49 = vld [vmem:[%s5358_s4] ss:$0 sm:$0xff] }
 0x27b   :  { %2324 = vst.msk [vmem:[#allocation4 + $0x10] sm:$0xff] %vm2321_vm7, %v2293_v45 }
 0x27d   :  { %2784 = vrot.lane.b32.xlu1 %v2752_v28, %s3404_s19  ;;  %v2575_v10 = vpop.permute.xlu1 %2574  ;;  %v2816_v21 = vld [vmem:[#allocation4 + $0x30] sm:$0xff] }
 0x27e   :  { %2601 = vst.msk [vmem:[#allocation4 + $0x38] sm:$0xff] %vm2593_vm11, %v2575_v10  ;;  %v2563_v29 = vpop.permute.xlu0 %2562  ;;  %v2810_v14 = vld [vmem:[#allocation4] sm:$0xff]  ;;  %3317 = vmatmul.mubr.msk.f32.vlgmr.msra.gmra.mrb[0].mxu1 %vm2834_vm15, %v2816_v21 }
 0x27f   :  { %2595 = vst.msk [vmem:[#allocation4 + $0x8] sm:$0xff] %vm2593_vm11, %v2563_v29  ;;  %3299 = vmatmul.mubr.msk.f32.vlgmr.msra.gmra.mrb[0].mxu0 %vm2834_vm15, %v2810_v14  ;;  %3319 = vmatprep.mubr.msk.f32.mxu1 %vm3406_vm5, %v3407_v16 }
 0x280   :  { %3301 = vmatprep.mubr.msk.f32.mxu0 %vm3406_vm5, %v3407_v16 }
 0x281   :  { %v2373_v0 = vpop.permute.xlu1 %2372 }
 0x282   :  { %2398 = vst.msk [vmem:[#allocation4 + $0x40] sm:$0xff] %vm2389_vm8, %v2373_v0  ;;  %v2361_v42 = vpop.permute.xlu0 %2360 }
 0x283   :  { %2392 = vst.msk [vmem:[#allocation4 + $0x10] sm:$0xff] %vm2389_vm8, %v2361_v42 }
 0x285   :  { %v2643_v43 = vpop.permute.xlu1 %2642 }
 0x286   :  { %2669 = vst.msk [vmem:[#allocation4 + $0x38] sm:$0xff] %vm2661_vm12, %v2643_v43  ;;  %v2631_v11 = vpop.permute.xlu0 %2630 }
 0x287   :  { %2663 = vst.msk [vmem:[#allocation4 + $0x8] sm:$0xff] %vm2661_vm12, %v2631_v11 }
 0x289   :  { %v2441_v15 = vpop.permute.xlu1 %2440 }
 0x28a   :  { %2466 = vst.msk [vmem:[#allocation4 + $0x40] sm:$0xff] %vm2457_vm9, %v2441_v15  ;;  %v2429_v27 = vpop.permute.xlu0 %2428 }
 0x28b   :  { %2460 = vst.msk [vmem:[#allocation4 + $0x10] sm:$0xff] %vm2457_vm9, %v2429_v27 }
 0x28d   :  { %v2711_v4 = vpop.permute.xlu1 %2710 }
 0x28e   :  { %2737 = vst.msk [vmem:[#allocation4 + $0x38] sm:$0xff] %vm2729_vm13, %v2711_v4  ;;  %v2699_v25 = vpop.permute.xlu0 %2698 }
 0x28f   :  { %2731 = vst.msk [vmem:[#allocation4 + $0x8] sm:$0xff] %vm2729_vm13, %v2699_v25 }
 0x291   :  { %v2509_v35 = vpop.permute.xlu1 %2508 }
 0x292   :  { %2534 = vst.msk [vmem:[#allocation4 + $0x40] sm:$0xff] %vm2525_vm10, %v2509_v35  ;;  %v2497_v26 = vpop.permute.xlu0 %2496 }
 0x293   :  { %2528 = vst.msk [vmem:[#allocation4 + $0x10] sm:$0xff] %vm2525_vm10, %v2497_v26 }
 0x295   :  { %v2779_v2 = vpop.permute.xlu1 %2778 }
 0x296   :  { %2805 = vst.msk [vmem:[#allocation4 + $0x38] sm:$0xff] %vm5364_vm14, %v2779_v2  ;;  %v2767_v31 = vpop.permute.xlu0 %2766 }
 0x297   :  { %2799 = vst.msk [vmem:[#allocation4 + $0x8] sm:$0xff] %vm5364_vm14, %v2767_v31 }
 0x299   :  { %v2307_v62 = vpop.permute.xlu1 %2306 }
 0x29a   :  { %2331 = vst.msk [vmem:[#allocation4 + $0x48] sm:$0xff] %vm2321_vm7, %v2307_v62  ;;  %v2295_v5 = vpop.permute.xlu0 %2294 }
 0x29b   :  { %2325 = vst.msk [vmem:[#allocation4 + $0x18] sm:$0xff] %vm2321_vm7, %v2295_v5 }
 0x29d   :  { %v2577_v54 = vpop.permute.xlu1 %2576  ;;  %v2817_v41 = vld [vmem:[#allocation4 + $0x38] sm:$0xff] }
 0x29e   :  { %2602 = vst.msk [vmem:[#allocation4 + $0x40] sm:$0xff] %vm2593_vm11, %v2577_v54  ;;  %v2565_v19 = vpop.permute.xlu0 %2564  ;;  %v2811_v48 = vld [vmem:[#allocation4 + $0x8] sm:$0xff]  ;;  %3320 = vmatmul.mubr.msk.f32.gmra.mrb[2].mxu1 %vm2834_vm15, %v2817_v41 }
 0x29f   :  { %2596 = vst.msk [vmem:[#allocation4 + $0x10] sm:$0xff] %vm2593_vm11, %v2565_v19  ;;  %3302 = vmatmul.mubr.msk.f32.gmra.mrb[2].mxu0 %vm2834_vm15, %v2811_v48  ;;  %3322 = vmatprep.mubr.msk.f32.mxu1 %vm3406_vm5, %v3407_v16 }
 0x2a0   :  { %3304 = vmatprep.mubr.msk.f32.mxu0 %vm3406_vm5, %v3407_v16 }
 0x2a1   :  { %v2375_v58 = vpop.permute.xlu1 %2374 }
 0x2a2   :  { %2399 = vst.msk [vmem:[#allocation4 + $0x48] sm:$0xff] %vm2389_vm8, %v2375_v58  ;;  %v2363_v17 = vpop.permute.xlu0 %2362 }
 0x2a3   :  { %2393 = vst.msk [vmem:[#allocation4 + $0x18] sm:$0xff] %vm2389_vm8, %v2363_v17 }
 0x2a6   :  { %v2633_v38 = vpop.permute.xlu0 %2632 }
 0x2a7   :  { %2664 = vst.msk [vmem:[#allocation4 + $0x10] sm:$0xff] %vm2661_vm12, %v2633_v38 }
 0x2aa   :  { %v2431_v50 = vpop.permute.xlu0 %2430 }
 0x2ab   :  { %2461 = vst.msk [vmem:[#allocation4 + $0x18] sm:$0xff] %vm2457_vm9, %v2431_v50 }
 0x2ae   :  { %v2701_v53 = vpop.permute.xlu0 %2700 }
 0x2af   :  { %2732 = vst.msk [vmem:[#allocation4 + $0x10] sm:$0xff] %vm2729_vm13, %v2701_v53 }
 0x2b2   :  { %v2499_v40 = vpop.permute.xlu0 %2498 }
 0x2b3   :  { %2529 = vst.msk [vmem:[#allocation4 + $0x18] sm:$0xff] %vm2525_vm10, %v2499_v40 }
 0x2b5   :  { %v2645_v56 = vpop.permute.xlu1 %2644 }
 0x2b6   :  { %2670 = vst.msk [vmem:[#allocation4 + $0x40] sm:$0xff] %vm2661_vm12, %v2645_v56  ;;  %v2769_v52 = vpop.permute.xlu0 %2768 }
 0x2b7   :  { %2800 = vst.msk [vmem:[#allocation4 + $0x10] sm:$0xff] %vm5364_vm14, %v2769_v52 }
 0x2b9   :  { %v2443_v22 = vpop.permute.xlu1 %2442 }
 0x2ba   :  { %2467 = vst.msk [vmem:[#allocation4 + $0x48] sm:$0xff] %vm2457_vm9, %v2443_v22  ;;  %v2567_v12 = vpop.permute.xlu0 %2566 }
 0x2bb   :  { %2597 = vst.msk [vmem:[#allocation4 + $0x18] sm:$0xff] %vm2593_vm11, %v2567_v12 }
 0x2bd   :  { %v2713_v63 = vpop.permute.xlu1 %2712 }
 0x2be   :  { %2738 = vst.msk [vmem:[#allocation4 + $0x40] sm:$0xff] %vm2729_vm13, %v2713_v63  ;;  %v2812_v13 = vld [vmem:[#allocation4 + $0x10] sm:$0xff] }
 0x2bf   :  { %3305 = vmatmul.mubr.msk.f32.gmra.mrb[4].mxu0 %vm2834_vm15, %v2812_v13 }
 0x2c0   :  { %3307 = vmatprep.mubr.msk.f32.mxu0 %vm3406_vm5, %v3407_v16 }
 0x2c1   :  { %v2511_v9 = vpop.permute.xlu1 %2510 }
 0x2c2   :  { %2535 = vst.msk [vmem:[#allocation4 + $0x48] sm:$0xff] %vm2525_vm10, %v2511_v9 }
 0x2c5   :  { %v2781_v55 = vpop.permute.xlu1 %2780 }
 0x2c6   :  { %2806 = vst.msk [vmem:[#allocation4 + $0x40] sm:$0xff] %vm5364_vm14, %v2781_v55 }
 0x2c9   :  { %v2579_v57 = vpop.permute.xlu1 %2578 }
 0x2ca   :  { %2603 = vst.msk [vmem:[#allocation4 + $0x48] sm:$0xff] %vm2593_vm11, %v2579_v57 }
 0x2cd   :  { %v2635_v47 = vpop.permute.xlu0 %2634  ;;  %v2818_v20 = vld [vmem:[#allocation4 + $0x40] sm:$0xff] }
 0x2ce   :  { %2665 = vst.msk [vmem:[#allocation4 + $0x18] sm:$0xff] %vm2661_vm12, %v2635_v47  ;;  %3323 = vmatmul.mubr.msk.f32.gmra.mrb[4].mxu1 %vm2834_vm15, %v2818_v20 }
 0x2cf   :  { %3325 = vmatprep.mubr.msk.f32.mxu1 %vm3406_vm5, %v3407_v16 }
 0x2d1   :  { %v2703_v46 = vpop.permute.xlu0 %2702 }
 0x2d2   :  { %2733 = vst.msk [vmem:[#allocation4 + $0x18] sm:$0xff] %vm2729_vm13, %v2703_v46 }
 0x2d5   :  { %v2771_v37 = vpop.permute.xlu0 %2770 }
 0x2d6   :  { %2801 = vst.msk [vmem:[#allocation4 + $0x18] sm:$0xff] %vm5364_vm14, %v2771_v37 }
 0x2d7   :  { %v2647_v6 = vpop.permute.xlu1 %2646 }
 0x2d8   :  { %2671 = vst.msk [vmem:[#allocation4 + $0x48] sm:$0xff] %vm2661_vm12, %v2647_v6 }
 0x2d9   :  { %v2309_v39 = vpop.permute.xlu0 %2308 }
 0x2da   :  { %2333 = vst.msk [vmem:[#allocation4 + $0x50] sm:$0x3] %vm2332_vm0, %v2309_v39  ;;  %vm2740_vm0 = vcmask 320792  }
 0x2db   :  { %v2715_v60 = vpop.permute.xlu1 %2714 }
 0x2dc   :  { %2739 = vst.msk [vmem:[#allocation4 + $0x48] sm:$0xff] %vm2729_vm13, %v2715_v60 }
 0x2dd   :  { %v2813_v36 = vld [vmem:[#allocation4 + $0x18] sm:$0xff]  ;;  %v2445_v32 = vpop.permute.xlu0 %2444 }
 0x2de   :  { %3308 = vmatmul.mubr.msk.f32.gmra.mrb[6].mxu0 %vm2834_vm15, %v2813_v36 }
 0x2df   :  { %v2783_v30 = vpop.permute.xlu1 %2782  ;;  %3310 = vmatprep.mubr.msk.f32.mxu0 %vm3406_vm5, %v3407_v16 }
 0x2e0   :  { %2807 = vst.msk [vmem:[#allocation4 + $0x48] sm:$0xff] %vm5364_vm14, %v2783_v30  ;;  %vm2808_vm14 = vcmask 361792  }
 0x2e1   :  { %v2581_v8 = vpop.permute.xlu0 %2580 }
 0x2e3   :  { %v2377_v7 = vpop.permute.xlu1 %2376 }
 0x2e4   :  { %2401 = vst.msk [vmem:[#allocation4 + $0x50] sm:$0x3] %vm2400_vm1, %v2377_v7  ;;  %vm2992_vm1 = vcmask 80896  }
 0x2e5   :  { %2469 = vst.msk [vmem:[#allocation4 + $0x50] sm:$0x3] %vm2468_vm2, %v2445_v32  ;;  %v2717_v18 = vpop.permute.xlu0 %2716  ;;  %vm3016_vm2 = vcmask 73728  }
 0x2e7   :  { %v2513_v3 = vpop.permute.xlu1 %2512  ;;  %v2819_v23 = vld [vmem:[#allocation4 + $0x48] sm:$0xff] }
 0x2e8   :  { %2537 = vst.msk [vmem:[#allocation4 + $0x50] sm:$0x3] %vm2536_vm3, %v2513_v3  ;;  %3326 = vmatmul.mubr.msk.f32.gmra.mrb[6].mxu1 %vm2834_vm15, %v2819_v23  ;;  %vm3033_vm3 = vcmask 155728  }
 0x2e9   :  { %2605 = vst.msk [vmem:[#allocation4 + $0x50] sm:$0x3] %vm2604_vm4, %v2581_v8  ;;  %3328 = vmatprep.mubr.msk.f32.mxu1 %vm3406_vm5, %v3407_v16  ;;  %vm3050_vm4 = vcmask 237728  }
 0x2eb   :  { %v2649_v61 = vpop.permute.xlu1 %2648 }
 0x2ec   :  { %2673 = vst.msk [vmem:[#allocation4 + $0x50] sm:$0x3] %vm2672_vm6, %v2649_v61  ;;  %vm3067_vm6 = vcmask 319728  }
 0x2ed   :  { %2741 = vst.msk [vmem:[#allocation4 + $0x50] sm:$0x3] %vm2740_vm0, %v2717_v18  ;;  %vm3142_vm0 = vcmask 326656  }
 0x2ef   :  { %v2785_v1 = vpop.permute.xlu1 %2784 }
 0x2f0   :  { %2809 = vst.msk [vmem:[#allocation4 + $0x50] sm:$0x3] %vm2808_vm14, %v2785_v1  ;;  %vm3003_vm14 = vcmask 74752  }
 0x2f7   :  { %v2820_v44 = vld [vmem:[#allocation4 + $0x50] sm:$0x3] }
 0x2f8   :  { %3329 = vmatmul.mubr.msk.f32.gmra.mrb[8].mxu1 %vm2834_vm15, %v2820_v44 }
 0x2f9   :  { %3341 = vmatprep.mubr.msk.f32.mxu1 %vm3406_vm5, %v3407_v16 }
 0x351   :  { %v2968_v45 = vpop.f32.mrb[0].mxu1 }
 0x352   :  { %v2938_v28 = vpop.f32.mrb[0].mxu0  ;;  %v2969_v10 = vadd.f32 %v5215_v49, %v2968_v45  ;;  %v3318_v21 = vpop.f32.mrb[1].mxu1 }
 0x353   :  { %v2939_v29 = vadd.f32 %v5215_v49, %v2938_v28  ;;  %v3300_v14 = vpop.f32.mrb[1].mxu0 }
 0x354   :  { %2999 = vst.msk [vmem:[#allocation5 + $0x30] sm:$0xff] %vm2992_vm1, %v2969_v10 }
 0x355   :  { %2993 = vst.msk [vmem:[#allocation5] sm:$0xff] %vm2992_vm1, %v2939_v29 }
 0x35b   :  { %v3081_v4 = vld [vmem:[#allocation5 + $0x33] sm:$0x3]  ;;  %v3069_v25 = vld [vmem:[#allocation5 + $0x31] sm:$0x3] }
 0x35c   :  { %v3018_v26 = vld [vmem:[#allocation5 + $0x2] sm:$0x3]  ;;  %v3005_v54 = vld [vmem:[#allocation5] sm:$0x3] }
 0x371   :  { %v2973_v0 = vpop.f32.mrb[2].mxu1 }
 0x372   :  { %v2943_v42 = vpop.f32.mrb[2].mxu0  ;;  %v2974_v43 = vadd.f32 %v5215_v49, %v2973_v0  ;;  %v3321_v11 = vpop.f32.mrb[3].mxu1 }
 0x373   :  { %v2944_v15 = vadd.f32 %v5215_v49, %v2943_v42  ;;  %v3303_v27 = vpop.f32.mrb[3].mxu0 }
 0x374   :  { %3000 = vst.msk [vmem:[#allocation5 + $0x38] sm:$0xff] %vm2992_vm1, %v2974_v43 }
 0x375   :  { %2994 = vst.msk [vmem:[#allocation5 + $0x8] sm:$0xff] %vm2992_vm1, %v2944_v15 }
 0x37b   :  { %v3082_v35 = vld [vmem:[#allocation5 + $0x3a] sm:$0x3]  ;;  %v3070_v2 = vld [vmem:[#allocation5 + $0x38] sm:$0x3] }
 0x37c   :  { %v3083_v31 = vmax.f32 %v3081_v4, %v3082_v35  ;;  %v3019_v62 = vld [vmem:[#allocation5 + $0x9] sm:$0x3]  ;;  %v3071_v5 = vmax.f32 %v3069_v25, %v3070_v2  ;;  %v3006_v41 = vld [vmem:[#allocation5 + $0x7] sm:$0x3]  ;;  %v3035_v10 = vld [vmem:[#allocation5 + $0xe] sm:$0x3] }
 0x37d   :  { %v3020_v19 = vmax.f32 %v3018_v26, %v3019_v62  ;;  %v3007_v48 = vmax.f32 %v3005_v54, %v3006_v41 }
 0x37e   :  { %v3084_v58 = vsel %vm3003_vm14, %v3083_v31, -inf  ;;  %v3072_v17 = vsel %vm3003_vm14, %v3071_v5, -inf }
 0x37f   :  { %v3085_v38 = vrot.slane %v3084_v58, 4  ;;  %v3021_v50 = vsel %vm3003_vm14, %v3020_v19, -inf  ;;  %v3073_v53 = vrot.slane %v3072_v17, 4  ;;  %v3008_v40 = vsel %vm3003_vm14, %v3007_v48, -inf  ;;  %v3130_v48 = vld [vmem:[%s5359_s5] sm:$0xff] }
 0x380   :  { %v3022_v56 = vrot.slane %v3021_v50, 4  ;;  %v3009_v52 = vrot.slane %v3008_v40, 4 }
 0x381   :  { %v3086_v22 = vmax.f32 %v3084_v58, %v3085_v38  ;;  %v3074_v12 = vmax.f32 %v3072_v17, %v3073_v53  ;;  %v3131_v58 = vld [vmem:[%s5359_s5 + $0x8] sm:$0xff] }
 0x382   :  { %v3023_v63 = vmax.f32 %v3021_v50, %v3022_v56  ;;  %v3010_v13 = vmax.f32 %v3008_v40, %v3009_v52  ;;  %v3355_v50 = vpack.c.bf16 %v3131_v58, %v3130_v48 }
 0x383   :  { %v3087_v9 = vrot.slane %v3086_v22, 2  ;;  %v3075_v55 = vrot.slane %v3074_v12, 2 }
 0x384   :  { %v3024_v57 = vrot.slane %v3023_v63, 2  ;;  %v3011_v47 = vrot.slane %v3010_v13, 2  ;;  %3356 = vmatpush3.bf16.msra.mxu1 %v3355_v50 }
 0x385   :  { %v3088_v20 = vmax.f32 %v3086_v22, %v3087_v9  ;;  %v3076_v46 = vmax.f32 %v3074_v12, %v3075_v55  ;;  %3357 = vmatprep.subr.bf16.mxu1 %v3403_v33  ;;  %v3132_v33 = vld [vmem:[%s5359_s5 + $0x10] sm:$0xff] }
 0x386   :  { %v3025_v6 = vmax.f32 %v3023_v63, %v3024_v57  ;;  %v3012_v37 = vmax.f32 %v3010_v13, %v3011_v47 }
 0x387   :  { %v3089_v60 = vrot.slane %v3088_v20, 1  ;;  %v3077_v39 = vrot.slane %v3076_v46, 1 }
 0x388   :  { %v3026_v30 = vrot.slane %v3025_v6, 1  ;;  %v3013_v36 = vrot.slane %v3012_v37, 1 }
 0x389   :  { %v3090_v32 = vmax.f32 %v3088_v20, %v3089_v60  ;;  %v3078_v7 = vmax.f32 %v3076_v46, %v3077_v39 }
 0x38a   :  { %v3027_v8 = vmax.f32 %v3025_v6, %v3026_v30  ;;  %v3014_v3 = vmax.f32 %v3012_v37, %v3013_v36 }
 0x38b   :  { %v3091_v23 = vmax.f32 %v3090_v32, 0.0  ;;  %v3079_v61 = vmax.f32 %v3078_v7, 0.0 }
 0x38c   :  { %v3028_v18 = vmax.f32 %v3027_v8, 0.0  ;;  %v3015_v1 = vmax.f32 %v3014_v3, 0.0  ;;  %v3134_v3 = vld [vmem:[%s5359_s5 + $0x20] sm:$0xff] }
 0x38d   :  { %3093 = vrot.lane.b32.xlu1 %v3091_v23, %s3397_s24  ;;  %3080 = vst.msk [vmem:[#allocation6 + $0x1] sm:$0x1] %vm3016_vm2, %v3079_v61 }
 0x38e   :  { %3030 = vrot.lane.b32.xlu0 %v3028_v18, %s3397_s24  ;;  %3017 = vst.msk [vmem:[#allocation6] sm:$0x1] %vm3016_vm2, %v3015_v1 }
 0x392   :  { %v2948_v44 = vpop.f32.mrb[4].mxu0 }
 0x393   :  { %v2949_v45 = vadd.f32 %v5215_v49, %v2948_v44  ;;  %v3306_v28 = vpop.f32.mrb[5].mxu0 }
 0x395   :  { %2995 = vst.msk [vmem:[#allocation5 + $0x10] sm:$0xff] %vm2992_vm1, %v2949_v45 }
 0x39c   :  { %v3036_v21 = vld [vmem:[#allocation5 + $0x15] sm:$0x3]  ;;  %v3052_v9 = vld [vmem:[#allocation5 + $0x10] sm:$0x3] }
 0x39d   :  { %v3037_v29 = vmax.f32 %v3035_v10, %v3036_v21 }
 0x39f   :  { %v3038_v14 = vsel %vm3003_vm14, %v3037_v29, -inf }
 0x3a0   :  { %v3039_v0 = vrot.slane %v3038_v14, 4 }
 0x3a1   :  { %v2978_v42 = vpop.f32.mrb[4].mxu1 }
 0x3a2   :  { %v2979_v43 = vadd.f32 %v5215_v49, %v2978_v42  ;;  %v3324_v11 = vpop.f32.mrb[5].mxu1  ;;  %v3040_v15 = vmax.f32 %v3038_v14, %v3039_v0  ;;  %v2338_v14 = vld [vmem:[#allocation3 + $0x22] sm:$0xff]  ;;  %v2339_v42 = vld [vmem:[#allocation3 + $0x2a] sm:$0xff] }
 0x3a3   :  { %v2271_v0 = vld [vmem:[#allocation3 + $0x29] sm:$0xff]  ;;  %v2679_v11 = vld [vmem:[#allocation3 + $0x37] sm:$0xff] }
 0x3a4   :  { %3001 = vst.msk [vmem:[#allocation5 + $0x40] sm:$0xff] %vm2992_vm1, %v2979_v43  ;;  %v3041_v27 = vrot.slane %v3040_v15, 2  ;;  %v2610_v43 = vld [vmem:[#allocation3 + $0x2e] sm:$0xff] }
 0x3a6   :  { %v3042_v4 = vmax.f32 %v3040_v15, %v3041_v27  ;;  %v2747_v15 = vld [vmem:[#allocation3 + $0x38] sm:$0xff] }
 0x3a8   :  { %v3043_v25 = vrot.slane %v3042_v4, 1 }
 0x3aa   :  { %v3044_v35 = vmax.f32 %v3042_v4, %v3043_v25 }
 0x3ab   :  { %v3097_v26 = vld [vmem:[#allocation5 + $0x3f] sm:$0x3]  ;;  %v3098_v2 = vld [vmem:[#allocation5 + $0x46] sm:$0x3]  ;;  %v3113_v60 = vld [vmem:[#allocation5 + $0x41] sm:$0x3] }
 0x3ac   :  { %v3045_v31 = vmax.f32 %v3044_v35, 0.0  ;;  %v3099_v62 = vmax.f32 %v3097_v26, %v3098_v2 }
 0x3ae   :  { %3047 = vrot.lane.b32.xlu0 %v3045_v31, %s3399_s9  ;;  %v3100_v5 = vsel %vm3003_vm14, %v3099_v62, -inf }
 0x3af   :  { %v3101_v54 = vrot.slane %v3100_v5, 4 }
 0x3b1   :  { %v2953_v41 = vpop.f32.mrb[6].mxu0  ;;  %v3102_v19 = vmax.f32 %v3100_v5, %v3101_v54 }
 0x3b2   :  { %v2954_v17 = vadd.f32 %v5215_v49, %v2953_v41  ;;  %v3309_v38 = vpop.f32.mrb[7].mxu0 }
 0x3b3   :  { %v3103_v53 = vrot.slane %v3102_v19, 2 }
 0x3b4   :  { %2996 = vst.msk [vmem:[#allocation5 + $0x18] sm:$0xff] %vm2992_vm1, %v2954_v17 }
 0x3b5   :  { %v3104_v40 = vmax.f32 %v3102_v19, %v3103_v53 }
 0x3b7   :  { %v3105_v56 = vrot.slane %v3104_v40, 1 }
 0x3b9   :  { %v3106_v22 = vmax.f32 %v3104_v40, %v3105_v56 }
 0x3bb   :  { %v2983_v52 = vpop.f32.mrb[6].mxu1  ;;  %v3107_v13 = vmax.f32 %v3106_v22, 0.0  ;;  %v3053_v55 = vld [vmem:[#allocation5 + $0x17] sm:$0x3] }
 0x3bc   :  { %v2984_v12 = vadd.f32 %v5215_v49, %v2983_v52  ;;  %v3327_v63 = vpop.f32.mrb[7].mxu1  ;;  %v3054_v57 = vmax.f32 %v3052_v9, %v3053_v55  ;;  %v3133_v49 = vld [vmem:[%s5359_s5 + $0x18] sm:$0xff] }
 0x3bd   :  { %3109 = vrot.lane.b32.xlu1 %v3107_v13, %s3399_s9  ;;  %v3358_v6 = vpack.c.bf16 %v3133_v49, %v3132_v33  ;;  %v3261_v13 = vld [vmem:[%s5360_s6] ss:$0 sm:$0xff]  ;;  %v1288_v49 = vld [vmem:[%s5354_s0 + $0x1e1] sm:$0xff] }
 0x3be   :  { %3002 = vst.msk [vmem:[#allocation5 + $0x48] sm:$0xff] %vm2992_vm1, %v2984_v12  ;;  %v3055_v47 = vsel %vm3003_vm14, %v3054_v57, -inf }
 0x3bf   :  { %v3056_v20 = vrot.slane %v3055_v47, 4  ;;  %3359 = vmatpush3.bf16.msra.mxu1 %v3358_v6 }
 0x3c0   :  { %3339 = vmatprep.subr.mxu1 %v3407_v16 }
 0x3c1   :  { %v3057_v46 = vmax.f32 %v3055_v47, %v3056_v20 }
 0x3c3   :  { %v3058_v37 = vrot.slane %v3057_v46, 2  ;;  %3340 = vmatpush3.msra.mxu1 %v3134_v3 }
 0x3c5   :  { %v3114_v39 = vld [vmem:[#allocation5 + $0x48] sm:$0x3]  ;;  %v3059_v36 = vmax.f32 %v3057_v46, %v3058_v37  ;;  %v514_v46 = vld [vmem:[%s5354_s0 + $0xf0] sm:$0xff] }
 0x3c6   :  { %v3115_v30 = vmax.f32 %v3113_v60, %v3114_v39  ;;  %v1533_v60 = vld [vmem:[%s5354_s0 + $0x1f0] sm:$0xff] }
 0x3c7   :  { %v3060_v7 = vrot.slane %v3059_v36, 1  ;;  %v759_v39 = vld [vmem:[%s5354_s0 + $0xf1] sm:$0xff] }
 0x3c8   :  { %v3116_v32 = vsel %vm3003_vm14, %v3115_v30, -inf  ;;  %v1778_v30 = vld [vmem:[%s5354_s0 + $0x1f1] sm:$0xff] }
 0x3c9   :  { %v3117_v8 = vrot.slane %v3116_v32, 4  ;;  %v3061_v61 = vmax.f32 %v3059_v36, %v3060_v7 }
 0x3cb   :  { %v2988_v23 = vpop.f32.mrb[8].mxu1  ;;  %v3118_v18 = vmax.f32 %v3116_v32, %v3117_v8  ;;  %v3062_v44 = vmax.f32 %v3061_v61, 0.0 }
 0x3cc   :  { %v3330_v1 = vpop.f32.mrb[9].mxu1 }
 0x3cd   :  { %v3119_v45 = vrot.slane %v3118_v18, 2  ;;  %3064 = vrot.lane.b32.xlu0 %v3062_v44, %s3401_s2 }
 0x3cf   :  { %v3120_v28 = vmax.f32 %v3118_v18, %v3119_v45 }
 0x3d1   :  { %v3121_v10 = vrot.slane %v3120_v28, 1  ;;  %2296 = vrot.lane.b32.xlu0 %v5052_v24, %s3396_s23  ;;  %v2407_v24 = vld [vmem:[#allocation3 + $0x2f] sm:$0xff] }
 0x3d3   :  { %v3122_v21 = vmax.f32 %v3120_v28, %v3121_v10  ;;  %v1074_v28 = vld [vmem:[%s5354_s0 + $0x1e8] sm:$0x7f] }
 0x3d4   :  { %v1289_v10 = vld [vmem:[%s5354_s0 + $0x1e9] sm:$0x7f] }
 0x3d5   :  { %v3123_v29 = vmax.f32 %v3122_v21, 0.0  ;;  %2432 = vrot.lane.b32.xlu0 %v5113_v34, %s3398_s25  ;;  %v2543_v34 = vld [vmem:[#allocation3 + $0x31] sm:$0xff]  ;;  %v515_v21 = vld [vmem:[%s5354_s0 + $0xf8] sm:$0x7f] }
 0x3d7   :  { %3125 = vrot.lane.b32.xlu1 %v3123_v29, %s3401_s2  ;;  %v1534_v29 = vld [vmem:[%s5354_s0 + $0x1f8] sm:$0x7f] }
 0x3d9   :  { %2298 = vrot.lane.b32.xlu0 %v2271_v0, %s3396_s23 }
 0x3db   :  { %2364 = vrot.lane.b32.xlu1 %v2338_v14, %s3397_s24  ;;  %v760_v14 = vld [vmem:[%s5354_s0 + $0xf9] sm:$0x7f] }
 0x3dd   :  { %2366 = vrot.lane.b32.xlu0 %v2339_v42, %s3397_s24 }
 0x3df   :  { %2500 = vrot.lane.b32.xlu1 %v5105_v51, %s3399_s9  ;;  %v2611_v51 = vld [vmem:[#allocation3 + $0x36] sm:$0xff] }
 0x3e1   :  { %2434 = vrot.lane.b32.xlu0 %v2407_v24, %s3398_s25 }
 0x3e3   :  { %2568 = vrot.lane.b32.xlu1 %v2271_v0, %s3400_s13  ;;  %v1779_v0 = vld [vmem:[%s5354_s0 + $0x1f9] sm:$0x7f] }
 0x3e5   :  { %2502 = vrot.lane.b32.xlu0 %v5098_v59, %s3399_s9 }
 0x3e7   :  { %2636 = vrot.lane.b32.xlu1 %v2610_v43, %s3401_s2 }
 0x3e9   :  { %2570 = vrot.lane.b32.xlu0 %v2543_v34, %s3400_s13 }
 0x3eb   :  { %2704 = vrot.lane.b32.xlu1 %v2407_v24, %s3402_s14 }
 0x3ed   :  { %2706 = vrot.lane.b32.xlu0 %v2679_v11, %s3402_s14 }
 0x3ef   :  { %2772 = vrot.lane.b32.xlu1 %v5098_v59, %s3404_s19 }
 0x3f3   :  { %2638 = vrot.lane.b32.xlu1 %v2611_v51, %s3401_s2 }
 0x3f7   :  { %2774 = vrot.lane.b32.xlu1 %v2747_v15, %s3404_s19 }
 0x3ff   :  { %v3094_v27 = vpop.permute.xlu1 %3093 }
 0x400   :  { %3096 = vst.msk [vmem:[#allocation6 + $0x1] sm:$0x1] %vm3033_vm3, %v3094_v27  ;;  %v3031_v4 = vpop.permute.xlu0 %3030 }
 0x401   :  { %3034 = vst.msk [vmem:[#allocation6] sm:$0x1] %vm3033_vm3, %v3031_v4 }
 0x420   :  { %v3048_v25 = vpop.permute.xlu0 %3047 }
 0x421   :  { %3051 = vst.msk [vmem:[#allocation6] sm:$0x1] %vm3050_vm4, %v3048_v25 }
 0x42f   :  { %v3110_v35 = vpop.permute.xlu1 %3109 }
 0x430   :  { %3112 = vst.msk [vmem:[#allocation6 + $0x1] sm:$0x1] %vm3050_vm4, %v3110_v35 }
 0x43f   :  { %v3065_v59 = vpop.permute.xlu0 %3064 }
 0x440   :  { %3068 = vst.msk [vmem:[#allocation6] sm:$0x1] %vm3067_vm6, %v3065_v59 }
 0x443   :  { %v2297_v26 = vpop.permute.xlu0 %2296 }
 0x444   :  { %2326 = vst.msk [vmem:[#allocation4 + $0x20] sm:$0xff] %vm2321_vm7, %v2297_v26 }
 0x447   :  { %v2433_v31 = vpop.permute.xlu0 %2432 }
 0x449   :  { %v3126_v2 = vpop.permute.xlu1 %3125 }
 0x44a   :  { %3128 = vst.msk [vmem:[#allocation6 + $0x1] sm:$0x1] %vm3067_vm6, %v3126_v2 }
 0x44b   :  { %v2299_v5 = vpop.permute.xlu0 %2298 }
 0x44c   :  { %2327 = vst.msk [vmem:[#allocation4 + $0x28] sm:$0xff] %vm2321_vm7, %v2299_v5  ;;  %vm5475_vm7 = vcmask 367936  }
 0x44d   :  { %v2365_v62 = vpop.permute.xlu1 %2364 }
 0x44e   :  { %2394 = vst.msk [vmem:[#allocation4 + $0x20] sm:$0xff] %vm2389_vm8, %v2365_v62 }
 0x44f   :  { %2462 = vst.msk [vmem:[#allocation4 + $0x20] sm:$0xff] %vm2457_vm9, %v2433_v31  ;;  %v2367_v41 = vpop.permute.xlu0 %2366 }
 0x450   :  { %2395 = vst.msk [vmem:[#allocation4 + $0x28] sm:$0xff] %vm2389_vm8, %v2367_v41  ;;  %vm5476_vm8 = vmmov %vm5475_vm7 }
 0x451   :  { %v2501_v54 = vpop.permute.xlu1 %2500  ;;  %v3129_v19 = vld [vmem:[#allocation6] sm:$0x3] }
 0x452   :  { %2530 = vst.msk [vmem:[#allocation4 + $0x20] sm:$0xff] %vm2525_vm10, %v2501_v54  ;;  %3342 = vmatmul.mubr.msk.f32.vlgmr.msra.gmra.mrb[10].mxu1 %vm3142_vm0, %v3129_v19 }
 0x453   :  { %v2435_v58 = vpop.permute.xlu0 %2434 }
 0x454   :  { %2463 = vst.msk [vmem:[#allocation4 + $0x28] sm:$0xff] %vm2457_vm9, %v2435_v58 }
 0x455   :  { %v2569_v48 = vpop.permute.xlu1 %2568 }
 0x456   :  { %2598 = vst.msk [vmem:[#allocation4 + $0x20] sm:$0xff] %vm2593_vm11, %v2569_v48 }
 0x457   :  { %v2503_v38 = vpop.permute.xlu0 %2502 }
 0x458   :  { %2531 = vst.msk [vmem:[#allocation4 + $0x28] sm:$0xff] %vm2525_vm10, %v2503_v38 }
 0x459   :  { %v2637_v17 = vpop.permute.xlu1 %2636 }
 0x45a   :  { %2666 = vst.msk [vmem:[#allocation4 + $0x20] sm:$0xff] %vm2661_vm12, %v2637_v17 }
 0x45b   :  { %v2571_v53 = vpop.permute.xlu0 %2570 }
 0x45c   :  { %2599 = vst.msk [vmem:[#allocation4 + $0x28] sm:$0xff] %vm2593_vm11, %v2571_v53 }
 0x45d   :  { %v2705_v50 = vpop.permute.xlu1 %2704 }
 0x45e   :  { %2734 = vst.msk [vmem:[#allocation4 + $0x20] sm:$0xff] %vm2729_vm13, %v2705_v50 }
 0x45f   :  { %v2707_v52 = vpop.permute.xlu0 %2706 }
 0x461   :  { %v2773_v40 = vpop.permute.xlu1 %2772 }
 0x462   :  { %2802 = vst.msk [vmem:[#allocation4 + $0x20] sm:$0xff] %vm5475_vm7, %v2773_v40 }
 0x465   :  { %v2639_v56 = vpop.permute.xlu1 %2638 }
 0x466   :  { %2667 = vst.msk [vmem:[#allocation4 + $0x28] sm:$0xff] %vm2661_vm12, %v2639_v56 }
 0x467   :  { %2735 = vst.msk [vmem:[#allocation4 + $0x28] sm:$0xff] %vm2729_vm13, %v2707_v52 }
 0x469   :  { %v2775_v22 = vpop.permute.xlu1 %2774  ;;  %v2814_v12 = vld [vmem:[#allocation4 + $0x20] sm:$0xff] }
 0x46a   :  { %2803 = vst.msk [vmem:[#allocation4 + $0x28] sm:$0xff] %vm5476_vm8, %v2775_v22  ;;  %3311 = vmatmul.mubr.msk.f32.gmra.mrb[8].mxu0 %vm2834_vm15, %v2814_v12 }
 0x46b   :  { %3313 = vmatprep.mubr.msk.f32.mxu0 %vm3406_vm5, %v3407_v16  ;;  %v1073_v16 = vld [vmem:[%s5354_s0 + $0x1e0] sm:$0xff]  ;;  %vm3232_vm5 = vcmask 156752  }
 0x471   :  { %v2815_v63 = vld [vmem:[#allocation4 + $0x28] sm:$0xff] }
 0x472   :  { %3314 = vmatmul.mubr.msk.f32.gmra.mrb[10].mxu0 %vm2834_vm15, %v2815_v63 }
 0x525   :  { %v3212_v9 = vpop.f32.mrb[10].mxu1 }
 0x526   :  { %v3213_v55 = vadd.f32 %v3261_v13, %v3212_v9  ;;  %v3343_v57 = vpop.f32.mrb[11].mxu1 }
 0x528   :  { %3227 = vst.msk [vmem:[%s5361_s7] sm:$0x3] %vm3003_vm14, %v3213_v55  ;;  %v3216_v47 = vsel %vm3003_vm14, %v3213_v55, -inf }
 0x529   :  { %3217 = vmax.xlane.f32.xlu0 %v3216_v47 }
 0x53d   :  { %v2958_v20 = vpop.f32.mrb[8].mxu0 }
 0x53e   :  { %v3312_v33 = vpop.f32.mrb[9].mxu0 }
 0x53f   :  { %1218 = vperm.xlu0 %3379, %v1073_v16  }
 0x543   :  { %1433 = vperm.xlu0 %3379, %v1288_v49  }
 0x545   :  { %v2963_v6 = vpop.f32.mrb[10].mxu0 }
 0x546   :  { %v3315_v37 = vpop.f32.mrb[11].mxu0 }
 0x547   :  { %659 = vperm.xlu0 %3379, %v514_v46  }
 0x54b   :  { %1678 = vperm.xlu0 %3379, %v1533_v60  }
 0x54f   :  { %904 = vperm.xlu0 %3379, %v759_v39  }
 0x553   :  { %1923 = vperm.xlu0 %3379, %v1778_v30  }
 0x5b6   :  { %v3218_v36 = vpop.xlane.xlu0 %3217 }
 0x5b7   :  { %v3219_v32 = vsub.f32 %v3213_v55, %v3218_v36 }
 0x5b9   :  { %v3220_v7 = vmul.f32 1.442695, %v3219_v32 }
 0x5bb   :  { %3381 = vpow2.f32 %v3220_v7 }
 0x5be   :  { %v1219_v8 = vpop.permute.xlu0 %1218 }
 0x5c2   :  { %v1434_v3 = vpop.permute.xlu0 %1433 }
 0x5c5   :  { %v3382_v23 = vpop.eup %3381 }
 0x5c6   :  { %v660_v61 = vpop.permute.xlu0 %659  ;;  %v3222_v18 = vsel %vm3003_vm14, %v3382_v23, 0.0 }
 0x5c7   :  { %3223 = vadd.xlane.f32.xlu1 %v3222_v18 }
 0x5ca   :  { %v1679_v1 = vpop.permute.xlu0 %1678 }
 0x5ce   :  { %v905_v44 = vpop.permute.xlu0 %904 }
 0x5d2   :  { %v1924_v45 = vpop.permute.xlu0 %1923 }
 0x5d8   :  { %1223 = vperm.xlu1 %3380, %v1074_v28  }
 0x5dc   :  { %1438 = vperm.xlu1 %3380, %v1289_v10  }
 0x5e0   :  { %664 = vperm.xlu1 %3380, %v515_v21  }
 0x5e4   :  { %1683 = vperm.xlu1 %3380, %v1534_v29  }
 0x5e8   :  { %909 = vperm.xlu1 %3380, %v760_v14  }
 0x5ec   :  { %1928 = vperm.xlu1 %3380, %v1779_v0  }
 0x654   :  { %v3224_v42 = vpop.xlane.xlu1 %3223 }
 0x655   :  { %3383 = vrcp.f32 %v3224_v42 }
 0x658   :  { %v1224_v24 = vpop.permute.xlu1 %1223 }
 0x65c   :  { %v1439_v43 = vpop.permute.xlu1 %1438 }
 0x65f   :  { %v3384_v34 = vpop.eup %3383 }
 0x660   :  { %v665_v11 = vpop.permute.xlu1 %664  ;;  %v3226_v51 = vmul.f32 %v3384_v34, %v3382_v23 }
 0x662   :  { %3229 = vrot.lane.b32.xlu0 %v3226_v51, %s3397_s24 }
 0x664   :  { %v1684_v15 = vpop.permute.xlu1 %1683 }
 0x668   :  { %v910_v27 = vpop.permute.xlu1 %909 }
 0x66c   :  { %v1929_v4 = vpop.permute.xlu1 %1928 }
 0x6d4   :  { %v3230_v25 = vpop.permute.xlu0 %3229 }
 0x6d5   :  { %3233 = vst.msk [vmem:[%s5361_s7] sm:$0x3] %vm3232_vm5, %v3230_v25 }

</bundles_post_ra>
